<compile_context>
chip_gen: v5e
topology: v5e:2x2
jax: 0.10.0
libtpu: 0.0.40
codegen_flags: <defaults>
</compile_context>

<pallas_src>
import jax
import jax.numpy as jnp
from jax.experimental import pallas as pl
from jax.experimental.pallas import tpu as pltpu

# ---------------- scaled-down ViT config (shapes consistent with the module) ----------------
BATCH = 2
CHANNELS = 3
IMG = 16
PATCH = 4
NUM_PATCHES = (IMG // PATCH) ** 2        # 16
SEQ = NUM_PATCHES + 1                    # 17 (CLS token prepended)
SEQ_PAD = 24                             # padded to a multiple of 8 sublanes
TOK = BATCH * SEQ_PAD                    # 48 token rows held in the kernel
HIDDEN = 32                              # vit hidden_size (scaled down from 768)
HEADS = 2
HEAD_DIM = HIDDEN // HEADS               # 16
INTERMEDIATE = 4 * HIDDEN                # 128
LAYERS = 2
CLS_HIDDEN = 512                         # classifier: Linear(hidden, 512)
NUM_LABELS = 8
CPP = CHANNELS * PATCH * PATCH           # 48 (flattened conv patch)
EPS = 1e-12                              # HF ViT layer_norm_eps


# ---------------------------------- fused kernel ----------------------------------
def _ln(x, g, b):
    """Row-wise layernorm over the last (feature) axis, f32 stats."""
    xf = x.astype(jnp.float32)
    mu = jnp.mean(xf, axis=-1, keepdims=True)
    xc = xf - mu
    var = jnp.mean(xc * xc, axis=-1, keepdims=True)
    return xc * jax.lax.rsqrt(var + EPS) * g + b


def _fused_vit_kernel(patch_ref, pw_ref, posb_ref, mask_ref, lvec_ref,
                      wqkv_ref, wo_ref, wfc1_ref, wfc2_ref,
                      hvec_ref, poolw_ref, cls1w_ref, cls1b_ref, cls2w_ref,
                      out_ref):
    f32 = jnp.float32
    bf16 = jnp.bfloat16

    # --- patch embedding (Conv2d k=s=PATCH as one bf16 matmul) + folded
    #     cls/pos/conv-bias table.  Padded token rows stay exactly zero. ---
    x = jnp.dot(patch_ref[...], pw_ref[...], preferred_element_type=f32) + posb_ref[...]

    attn_bias = mask_ref[...]                       # (TOK, TOK) additive block mask, f32
    scale = 1.0 / float(HEAD_DIM) ** 0.5

    for l in range(LAYERS):
        lv = lvec_ref[l]                            # (8, 128) per-layer vector slab, f32

        # ---------------- self-attention block (pre-LN) ----------------
        h = _ln(x, lv[0:1, :HIDDEN], lv[1:2, :HIDDEN]).astype(bf16)
        qkv = (jnp.dot(h, wqkv_ref[l], preferred_element_type=f32)
               + lv[2:3, :3 * HIDDEN])              # (TOK, 96), f32 accum + f32 bias
        qkv = qkv.astype(bf16)
        wol = wo_ref[l]                             # (HIDDEN, HIDDEN) bf16

        attn = jnp.zeros((TOK, HIDDEN), f32)
        for hd in range(HEADS):
            c0 = hd * HEAD_DIM
            qh = qkv[:, c0:c0 + HEAD_DIM]
            kh = qkv[:, HIDDEN + c0:HIDDEN + c0 + HEAD_DIM]
            vh = qkv[:, 2 * HIDDEN + c0:2 * HIDDEN + c0 + HEAD_DIM]
            # All 48 token rows at once; mask forbids cross-image + padded keys.
            s = jax.lax.dot_general(qh, kh, (((1,), (1,)), ((), ())),
                                    preferred_element_type=f32) * scale + attn_bias
            m = jnp.max(s, axis=-1, keepdims=True)
            p = jnp.exp(s - m)
            p = p * pl.reciprocal(jnp.sum(p, axis=-1, keepdims=True), approx=True)
            ctx = jnp.dot(p.astype(bf16), vh, preferred_element_type=f32)   # (TOK, HD)
            # Head merge folded into the output projection (sum over heads).
            attn += jnp.dot(ctx.astype(bf16), wol[c0:c0 + HEAD_DIM, :],
                            preferred_element_type=f32)
        x = attn + lv[3:4, :HIDDEN] + x             # + bo + residual (f32)

        # ---------------- MLP block (pre-LN) ----------------
        h = _ln(x, lv[4:5, :HIDDEN], lv[5:6, :HIDDEN]).astype(bf16)
        h = jnp.dot(h, wfc1_ref[l], preferred_element_type=f32) + lv[6:7, :]
        # TODO(synk): HF ViT uses erf GELU; tanh-approx GELU used (matches the reference here).
        h = jax.nn.gelu(h, approximate=True).astype(bf16)
        x = jnp.dot(h, wfc2_ref[l], preferred_element_type=f32) + lv[7:8, :HIDDEN] + x

    # ------------- final LN + pooler (tanh) + classifier, on all 48 rows -------------
    hv = hvec_ref[...]                              # (4, 128) f32
    xn = _ln(x, hv[0:1, :HIDDEN], hv[1:2, :HIDDEN]).astype(bf16)
    pooled = jnp.tanh(jnp.dot(xn, poolw_ref[...], preferred_element_type=f32)
                      + hv[2:3, :HIDDEN]).astype(bf16)
    hcls = jnp.maximum(jnp.dot(pooled, cls1w_ref[...], preferred_element_type=f32)
                       + cls1b_ref[...], 0.0).astype(bf16)
    # TODO(synk): Dropout(0.3) omitted — deterministic inference identity.
    probs = jax.nn.sigmoid(jnp.dot(hcls, cls2w_ref[...], preferred_element_type=f32)
                           + hv[3:4, :NUM_LABELS])                          # (TOK, 8) f32
    for b in range(BATCH):                          # CLS row of image b -> output row b
        out_ref[b:b + 1, :] = probs[b * SEQ_PAD:b * SEQ_PAD + 1, :].astype(out_ref.dtype)


def _full_spec(shape):
    n = len(shape)
    return pl.BlockSpec(shape, lambda i, _n=n: (0,) * _n)


# ---------------------------------- parameters ----------------------------------
def init_params(key):
    def nrm(k, shape, scale=0.02):
        return (scale * jax.random.normal(k, shape)).astype(jnp.float32)

    keys = iter(jax.random.split(key, 128))
    zeros = lambda *s: jnp.zeros(s, jnp.float32)
    ones = lambda *s: jnp.ones(s, jnp.float32)

    p = {
        # Conv2d(C, HIDDEN, kernel=PATCH, stride=PATCH) expressed as a matmul on
        # flattened (C, PATCH, PATCH) patches.
        "patch_w": nrm(next(keys), (CPP, HIDDEN)),
        "patch_b": zeros(HIDDEN),
        "cls": nrm(next(keys), (1, 1, HIDDEN)),
        "pos": nrm(next(keys), (1, SEQ, HIDDEN)),
        "lnf_g": ones(HIDDEN), "lnf_b": zeros(HIDDEN),
        "pool_w": nrm(next(keys), (HIDDEN, HIDDEN)), "pool_b": zeros(HIDDEN),
        "cls1_w": nrm(next(keys), (HIDDEN, CLS_HIDDEN)), "cls1_b": zeros(CLS_HIDDEN),
        "cls2_w": nrm(next(keys), (CLS_HIDDEN, NUM_LABELS)), "cls2_b": zeros(NUM_LABELS),
        "layers": [],
    }
    for _ in range(LAYERS):
        p["layers"].append({
            "ln1_g": ones(HIDDEN), "ln1_b": zeros(HIDDEN),
            "wq": nrm(next(keys), (HIDDEN, HIDDEN)), "bq": zeros(HIDDEN),
            "wk": nrm(next(keys), (HIDDEN, HIDDEN)), "bk": zeros(HIDDEN),
            "wv": nrm(next(keys), (HIDDEN, HIDDEN)), "bv": zeros(HIDDEN),
            "wo": nrm(next(keys), (HIDDEN, HIDDEN)), "bo": zeros(HIDDEN),
            "ln2_g": ones(HIDDEN), "ln2_b": zeros(HIDDEN),
            "w_fc1": nrm(next(keys), (HIDDEN, INTERMEDIATE)), "b_fc1": zeros(INTERMEDIATE),
            "w_fc2": nrm(next(keys), (INTERMEDIATE, HIDDEN)), "b_fc2": zeros(HIDDEN),
        })
    return p


_PACKED_ORDER = (
    "patch_w", "pos_bias", "attn_bias", "layer_vecs",
    "wqkv", "wo", "w_fc1", "w_fc2",
    "head_vecs", "pool_w", "cls1_w", "cls1_b", "cls2_w",
)


def pack_params(params):
    """One-time packing: bf16 weights, consolidated bias slabs, additive attention mask."""
    L = params["layers"]
    bf = lambda a: a.astype(jnp.bfloat16)

    # Packed QKV weight: (LAYERS, HIDDEN, 3*HIDDEN); columns [0:32)=Q, [32:64)=K, [64:96)=V.
    wqkv = jnp.stack([jnp.concatenate([lyr["wq"], lyr["wk"], lyr["wv"]], axis=1) for lyr in L])
    wo = jnp.stack([lyr["wo"] for lyr in L])
    w_fc1 = jnp.stack([lyr["w_fc1"] for lyr in L])
    w_fc2 = jnp.stack([lyr["w_fc2"] for lyr in L])

    # All per-layer small vectors in one (LAYERS, 8, 128) f32 slab (row -> vector).
    lvec = jnp.zeros((LAYERS, 8, 128), jnp.float32)
    for i, lyr in enumerate(L):
        rows = (
            (0, lyr["ln1_g"]), (1, lyr["ln1_b"]),
            (2, jnp.concatenate([lyr["bq"], lyr["bk"], lyr["bv"]])),
            (3, lyr["bo"]), (4, lyr["ln2_g"]), (5, lyr["ln2_b"]),
            (6, lyr["b_fc1"]), (7, lyr["b_fc2"]),
        )
        for r, vec in rows:
            lvec = lvec.at[i, r, :vec.shape[0]].set(vec)

    # Additive table folding CLS token, position embeddings and the conv bias;
    # padded token rows (SEQ..SEQ_PAD-1) are exactly zero.
    pb = jnp.zeros((SEQ_PAD, HIDDEN), jnp.float32)
    pb = pb.at[0].set(params["cls"][0, 0] + params["pos"][0, 0])
    pb = pb.at[1:SEQ].set(params["pos"][0, 1:] + params["patch_b"])
    pos_bias = jnp.tile(pb, (BATCH, 1))                                  # (TOK, HIDDEN)

    # Additive attention mask: 0 where key is a real token of the same image, else -1e30.
    idx = jnp.arange(TOK)
    same_img = (idx[:, None] // SEQ_PAD) == (idx[None, :] // SEQ_PAD)
    valid_key = (idx[None, :] % SEQ_PAD) < SEQ
    attn_bias = jnp.where(same_img & valid_key, 0.0, -1e30).astype(jnp.float32)

    # Head-side small vectors in one (4, 128) f32 slab.
    hvec = jnp.zeros((4, 128), jnp.float32)
    hvec = hvec.at[0, :HIDDEN].set(params["lnf_g"])
    hvec = hvec.at[1, :HIDDEN].set(params["lnf_b"])
    hvec = hvec.at[2, :HIDDEN].set(params["pool_b"])
    hvec = hvec.at[3, :NUM_LABELS].set(params["cls2_b"])

    return {
        "patch_w": bf(params["patch_w"]),
        "pos_bias": pos_bias,
        "attn_bias": attn_bias,
        "layer_vecs": lvec,
        "wqkv": bf(wqkv), "wo": bf(wo), "w_fc1": bf(w_fc1), "w_fc2": bf(w_fc2),
        "head_vecs": hvec,
        "pool_w": bf(params["pool_w"]),
        "cls1_w": bf(params["cls1_w"]),
        "cls1_b": params["cls1_b"].reshape(1, CLS_HIDDEN),
        "cls2_w": bf(params["cls2_w"]),                 # (512, NUM_LABELS) — no lane padding
    }


# ---------------------------------- forward ----------------------------------
def vit_forward(packed, pixel_values):
    """Whole ViT + classifier forward in a single fused Pallas kernel call."""
    assert pixel_values.shape == (BATCH, CHANNELS, IMG, IMG)

    # im2col patch extraction + zero-pad to SEQ_PAD tokens per image (layout only).
    p = pixel_values.reshape(BATCH, CHANNELS, IMG // PATCH, PATCH, IMG // PATCH, PATCH)
    p = p.transpose(0, 2, 4, 1, 3, 5).reshape(BATCH, NUM_PATCHES, CPP)
    tok = jnp.zeros((BATCH, SEQ_PAD, CPP), jnp.float32)
    tok = tok.at[:, 1:1 + NUM_PATCHES, :].set(p)        # row 0 (CLS) and pad rows stay zero
    patch_tokens = tok.reshape(TOK, CPP).astype(jnp.bfloat16)

    args = (patch_tokens,) + tuple(packed[k] for k in _PACKED_ORDER)
    in_specs = [_full_spec(a.shape) for a in args]

    out = pl.pallas_call(
        _fused_vit_kernel,
        grid=(1,),
        in_specs=in_specs,
        out_specs=_full_spec((BATCH, NUM_LABELS)),
        out_shape=jax.ShapeDtypeStruct((BATCH, NUM_LABELS), jnp.float32),
        compiler_params=pltpu.CompilerParams(dimension_semantics=("arbitrary",)),
    )(*args)
    return out


# ------------------------------ pure-JAX reference ------------------------------
def _reference_forward(params, pixel_values):
    B = pixel_values.shape[0]
    x = pixel_values.reshape(B, CHANNELS, IMG // PATCH, PATCH, IMG // PATCH, PATCH)
    x = x.transpose(0, 2, 4, 1, 3, 5).reshape(B, NUM_PATCHES, CPP)
    x = x @ params["patch_w"] + params["patch_b"]
    cls = jnp.broadcast_to(params["cls"], (B, 1, HIDDEN))
    x = jnp.concatenate([cls, x], axis=1) + params["pos"]

    def ln(t, g, b):
        mu = t.mean(-1, keepdims=True)
        tc = t - mu
        var = (tc * tc).mean(-1, keepdims=True)
        return tc * jax.lax.rsqrt(var + EPS) * g + b

    for lyr in params["layers"]:
        h = ln(x, lyr["ln1_g"], lyr["ln1_b"])
        q = h @ lyr["wq"] + lyr["bq"]
        k = h @ lyr["wk"] + lyr["bk"]
        v = h @ lyr["wv"] + lyr["bv"]
        sh = lambda t: t.reshape(B, SEQ, HEADS, HEAD_DIM).transpose(0, 2, 1, 3)
        qh, kh, vh = sh(q), sh(k), sh(v)
        s = jnp.einsum("bhqd,bhkd->bhqk", qh, kh) / float(HEAD_DIM) ** 0.5
        p = jax.nn.softmax(s, axis=-1)
        a = jnp.einsum("bhqk,bhkd->bhqd", p, vh).transpose(0, 2, 1, 3).reshape(B, SEQ, HIDDEN)
        x = a @ lyr["wo"] + lyr["bo"] + x
        h = ln(x, lyr["ln2_g"], lyr["ln2_b"])
        h = jax.nn.gelu(h @ lyr["w_fc1"] + lyr["b_fc1"], approximate=True)
        x = h @ lyr["w_fc2"] + lyr["b_fc2"] + x

    xn = ln(x, params["lnf_g"], params["lnf_b"])
    pooled = jnp.tanh(xn[:, 0] @ params["pool_w"] + params["pool_b"])
    hcls = jax.nn.relu(pooled @ params["cls1_w"] + params["cls1_b"])
    return jax.nn.sigmoid(hcls @ params["cls2_w"] + params["cls2_b"])


# ---------------------------------- main ----------------------------------
if __name__ == "__main__":
    key = jax.random.PRNGKey(0)
    pkey, xkey = jax.random.split(key)
    params = init_params(pkey)
    pixel_values = jax.random.normal(xkey, (BATCH, CHANNELS, IMG, IMG), jnp.float32)

    packed = pack_params(params)

    probs = jax.jit(vit_forward)(packed, pixel_values)
    probs = jax.block_until_ready(probs)

    assert probs.shape == (BATCH, NUM_LABELS), probs.shape
    assert bool(jnp.all((probs >= 0.0) & (probs <= 1.0)))

    ref = jax.block_until_ready(jax.jit(_reference_forward)(params, pixel_values))
    max_err = float(jnp.max(jnp.abs(probs - ref)))
    assert max_err < 2e-3, f"max |pallas - ref| = {max_err}"

    print("KERNEL_OK")
</pallas_src>

<mosaic_0001>
module attributes {stable_mosaic.version = 11 : i64} {
  func.func @_fused_vit_kernel(%arg0: i32, %arg1: memref<48x48xbf16, #tpu.memory_space<vmem>>, %arg2: memref<48x32xbf16, #tpu.memory_space<vmem>>, %arg3: memref<48x32xf32, #tpu.memory_space<vmem>>, %arg4: memref<48x48xf32, #tpu.memory_space<vmem>>, %arg5: memref<2x8x128xf32, #tpu.memory_space<vmem>>, %arg6: memref<2x32x96xbf16, #tpu.memory_space<vmem>>, %arg7: memref<2x32x32xbf16, #tpu.memory_space<vmem>>, %arg8: memref<2x32x128xbf16, #tpu.memory_space<vmem>>, %arg9: memref<2x128x32xbf16, #tpu.memory_space<vmem>>, %arg10: memref<4x128xf32, #tpu.memory_space<vmem>>, %arg11: memref<32x32xbf16, #tpu.memory_space<vmem>>, %arg12: memref<32x512xbf16, #tpu.memory_space<vmem>>, %arg13: memref<1x512xf32, #tpu.memory_space<vmem>>, %arg14: memref<512x8xbf16, #tpu.memory_space<vmem>>, %arg15: memref<2x8xf32, #tpu.memory_space<vmem>>) attributes {dimension_semantics = [#tpu.dimension_semantics<arbitrary>], iteration_bounds = array<i64: 1>, scalar_prefetch = 0 : i64, scratch_operands = 0 : i64, tpu.core_type = #tpu.core_type<tc>, window_params = [{pipeline_mode = #tpu.pipeline_mode<synchronous>, transform_indices = @transform_0, window_bounds = array<i64: 48, 48>}, {pipeline_mode = #tpu.pipeline_mode<synchronous>, transform_indices = @transform_1, window_bounds = array<i64: 48, 32>}, {pipeline_mode = #tpu.pipeline_mode<synchronous>, transform_indices = @transform_2, window_bounds = array<i64: 48, 32>}, {pipeline_mode = #tpu.pipeline_mode<synchronous>, transform_indices = @transform_3, window_bounds = array<i64: 48, 48>}, {pipeline_mode = #tpu.pipeline_mode<synchronous>, transform_indices = @transform_4, window_bounds = array<i64: 2, 8, 128>}, {pipeline_mode = #tpu.pipeline_mode<synchronous>, transform_indices = @transform_5, window_bounds = array<i64: 2, 32, 96>}, {pipeline_mode = #tpu.pipeline_mode<synchronous>, transform_indices = @transform_6, window_bounds = array<i64: 2, 32, 32>}, {pipeline_mode = #tpu.pipeline_mode<synchronous>, transform_indices = @transform_7, window_bounds = array<i64: 2, 32, 128>}, {pipeline_mode = #tpu.pipeline_mode<synchronous>, transform_indices = @transform_8, window_bounds = array<i64: 2, 128, 32>}, {pipeline_mode = #tpu.pipeline_mode<synchronous>, transform_indices = @transform_9, window_bounds = array<i64: 4, 128>}, {pipeline_mode = #tpu.pipeline_mode<synchronous>, transform_indices = @transform_10, window_bounds = array<i64: 32, 32>}, {pipeline_mode = #tpu.pipeline_mode<synchronous>, transform_indices = @transform_11, window_bounds = array<i64: 32, 512>}, {pipeline_mode = #tpu.pipeline_mode<synchronous>, transform_indices = @transform_12, window_bounds = array<i64: 1, 512>}, {pipeline_mode = #tpu.pipeline_mode<synchronous>, transform_indices = @transform_13, window_bounds = array<i64: 512, 8>}, {pipeline_mode = #tpu.pipeline_mode<synchronous>, transform_indices = @transform_14, window_bounds = array<i64: 2, 8>}]} {
    %c0 = arith.constant 0 : index
    %c0_0 = arith.constant 0 : index
    %0 = vector.load %arg1[%c0, %c0_0] : memref<48x48xbf16, #tpu.memory_space<vmem>>, vector<48x48xbf16>
    %c0_1 = arith.constant 0 : index
    %c0_2 = arith.constant 0 : index
    %1 = vector.load %arg2[%c0_1, %c0_2] : memref<48x32xbf16, #tpu.memory_space<vmem>>, vector<48x32xbf16>
    %cst = arith.constant dense<0.000000e+00> : vector<48x32xf32>
    %2 = tpu.matmul %0, %1, %cst {dimension_numbers = #tpu.dot_dimension_numbers<[1], [0], [0], [1], [0, 0, 1, 1], [], []>} : vector<48x48xbf16>, vector<48x32xbf16>, vector<48x32xf32> -> vector<48x32xf32>
    %c0_3 = arith.constant 0 : index
    %c0_4 = arith.constant 0 : index
    %3 = vector.load %arg3[%c0_3, %c0_4] : memref<48x32xf32, #tpu.memory_space<vmem>>, vector<48x32xf32>
    %4 = arith.addf %2, %3 : vector<48x32xf32>
    %c0_5 = arith.constant 0 : index
    %c0_6 = arith.constant 0 : index
    %5 = vector.load %arg4[%c0_5, %c0_6] : memref<48x48xf32, #tpu.memory_space<vmem>>, vector<48x48xf32>
    %c0_7 = arith.constant 0 : index
    %c0_8 = arith.constant 0 : index
    %c0_9 = arith.constant 0 : index
    %6 = vector.load %arg5[%c0_7, %c0_8, %c0_9] : memref<2x8x128xf32, #tpu.memory_space<vmem>>, vector<1x8x128xf32>
    %7 = vector.shape_cast %6 : vector<1x8x128xf32> to vector<8x128xf32>
    %8 = vector.extract_strided_slice %7 {offsets = [0, 0], sizes = [1, 32], strides = [1, 1]} : vector<8x128xf32> to vector<1x32xf32>
    %9 = vector.extract_strided_slice %7 {offsets = [1, 0], sizes = [1, 32], strides = [1, 1]} : vector<8x128xf32> to vector<1x32xf32>
    %cst_10 = arith.constant dense<0.000000e+00> : vector<48xf32>
    %10 = vector.multi_reduction <add>, %4, %cst_10 [1] : vector<48x32xf32> to vector<48xf32>
    %11 = vector.shape_cast %10 : vector<48xf32> to vector<48x1xf32>
    %cst_11 = arith.constant 3.200000e+01 : f32
    %12 = vector.broadcast %cst_11 : f32 to vector<48x1xf32>
    %13 = arith.divf %11, %12 : vector<48x1xf32>
    %14 = vector.broadcast %13 : vector<48x1xf32> to vector<48x32xf32>
    %15 = arith.subf %4, %14 : vector<48x32xf32>
    %16 = arith.mulf %15, %15 : vector<48x32xf32>
    %cst_12 = arith.constant dense<0.000000e+00> : vector<48xf32>
    %17 = vector.multi_reduction <add>, %16, %cst_12 [1] : vector<48x32xf32> to vector<48xf32>
    %18 = vector.shape_cast %17 : vector<48xf32> to vector<48x1xf32>
    %cst_13 = arith.constant 3.200000e+01 : f32
    %19 = vector.broadcast %cst_13 : f32 to vector<48x1xf32>
    %20 = arith.divf %18, %19 : vector<48x1xf32>
    %cst_14 = arith.constant 9.99999996E-13 : f32
    %21 = vector.broadcast %cst_14 : f32 to vector<48x1xf32>
    %22 = arith.addf %20, %21 : vector<48x1xf32>
    %23 = math.rsqrt %22 : vector<48x1xf32>
    %24 = vector.broadcast %23 : vector<48x1xf32> to vector<48x32xf32>
    %25 = arith.mulf %15, %24 : vector<48x32xf32>
    %26 = vector.broadcast %8 : vector<1x32xf32> to vector<48x32xf32>
    %27 = arith.mulf %25, %26 : vector<48x32xf32>
    %28 = vector.broadcast %9 : vector<1x32xf32> to vector<48x32xf32>
    %29 = arith.addf %27, %28 : vector<48x32xf32>
    %30 = arith.truncf %29 : vector<48x32xf32> to vector<48x32xbf16>
    %c0_15 = arith.constant 0 : index
    %c0_16 = arith.constant 0 : index
    %c0_17 = arith.constant 0 : index
    %31 = vector.load %arg6[%c0_15, %c0_16, %c0_17] : memref<2x32x96xbf16, #tpu.memory_space<vmem>>, vector<1x32x96xbf16>
    %32 = vector.shape_cast %31 : vector<1x32x96xbf16> to vector<32x96xbf16>
    %cst_18 = arith.constant dense<0.000000e+00> : vector<48x96xf32>
    %33 = tpu.matmul %30, %32, %cst_18 {dimension_numbers = #tpu.dot_dimension_numbers<[1], [0], [0], [1], [0, 0, 1, 1], [], []>} : vector<48x32xbf16>, vector<32x96xbf16>, vector<48x96xf32> -> vector<48x96xf32>
    %34 = vector.extract_strided_slice %7 {offsets = [2, 0], sizes = [1, 96], strides = [1, 1]} : vector<8x128xf32> to vector<1x96xf32>
    %35 = vector.broadcast %34 : vector<1x96xf32> to vector<48x96xf32>
    %36 = arith.addf %33, %35 : vector<48x96xf32>
    %37 = arith.truncf %36 : vector<48x96xf32> to vector<48x96xbf16>
    %c0_19 = arith.constant 0 : index
    %c0_20 = arith.constant 0 : index
    %c0_21 = arith.constant 0 : index
    %38 = vector.load %arg7[%c0_19, %c0_20, %c0_21] : memref<2x32x32xbf16, #tpu.memory_space<vmem>>, vector<1x32x32xbf16>
    %39 = vector.shape_cast %38 : vector<1x32x32xbf16> to vector<32x32xbf16>
    %cst_22 = arith.constant 0.000000e+00 : f32
    %40 = vector.broadcast %cst_22 : f32 to vector<48x32xf32>
    %41 = vector.extract_strided_slice %37 {offsets = [0, 0], sizes = [48, 16], strides = [1, 1]} : vector<48x96xbf16> to vector<48x16xbf16>
    %42 = vector.extract_strided_slice %37 {offsets = [0, 32], sizes = [48, 16], strides = [1, 1]} : vector<48x96xbf16> to vector<48x16xbf16>
    %43 = vector.extract_strided_slice %37 {offsets = [0, 64], sizes = [48, 16], strides = [1, 1]} : vector<48x96xbf16> to vector<48x16xbf16>
    %cst_23 = arith.constant dense<0.000000e+00> : vector<48x48xf32>
    %44 = tpu.matmul %41, %42, %cst_23 {dimension_numbers = #tpu.dot_dimension_numbers<[1], [1], [0], [0], [0, 0, 1, 0], [], []>} : vector<48x16xbf16>, vector<48x16xbf16>, vector<48x48xf32> -> vector<48x48xf32>
    %cst_24 = arith.constant 2.500000e-01 : f32
    %45 = vector.broadcast %cst_24 : f32 to vector<48x48xf32>
    %46 = arith.mulf %44, %45 : vector<48x48xf32>
    %47 = arith.addf %46, %5 : vector<48x48xf32>
    %cst_25 = arith.constant dense<0xFF800000> : vector<48xf32>
    %48 = vector.multi_reduction <maximumf>, %47, %cst_25 [1] : vector<48x48xf32> to vector<48xf32>
    %49 = vector.shape_cast %48 : vector<48xf32> to vector<48x1xf32>
    %50 = vector.broadcast %49 : vector<48x1xf32> to vector<48x48xf32>
    %51 = arith.subf %47, %50 : vector<48x48xf32>
    %52 = math.exp %51 : vector<48x48xf32>
    %cst_26 = arith.constant dense<0.000000e+00> : vector<48xf32>
    %53 = vector.multi_reduction <add>, %52, %cst_26 [1] : vector<48x48xf32> to vector<48xf32>
    %54 = vector.shape_cast %53 : vector<48xf32> to vector<48x1xf32>
    %55 = tpu.reciprocal %54 {approx = true} : vector<48x1xf32> -> vector<48x1xf32>
    %56 = vector.broadcast %55 : vector<48x1xf32> to vector<48x48xf32>
    %57 = arith.mulf %52, %56 : vector<48x48xf32>
    %58 = arith.truncf %57 : vector<48x48xf32> to vector<48x48xbf16>
    %cst_27 = arith.constant dense<0.000000e+00> : vector<48x16xf32>
    %59 = tpu.matmul %58, %43, %cst_27 {dimension_numbers = #tpu.dot_dimension_numbers<[1], [0], [0], [1], [0, 0, 1, 1], [], []>} : vector<48x48xbf16>, vector<48x16xbf16>, vector<48x16xf32> -> vector<48x16xf32>
    %60 = arith.truncf %59 : vector<48x16xf32> to vector<48x16xbf16>
    %61 = vector.extract_strided_slice %39 {offsets = [0, 0], sizes = [16, 32], strides = [1, 1]} : vector<32x32xbf16> to vector<16x32xbf16>
    %cst_28 = arith.constant dense<0.000000e+00> : vector<48x32xf32>
    %62 = tpu.matmul %60, %61, %cst_28 {dimension_numbers = #tpu.dot_dimension_numbers<[1], [0], [0], [1], [0, 0, 1, 1], [], []>} : vector<48x16xbf16>, vector<16x32xbf16>, vector<48x32xf32> -> vector<48x32xf32>
    %63 = arith.addf %40, %62 : vector<48x32xf32>
    %64 = vector.extract_strided_slice %37 {offsets = [0, 16], sizes = [48, 16], strides = [1, 1]} : vector<48x96xbf16> to vector<48x16xbf16>
    %65 = vector.extract_strided_slice %37 {offsets = [0, 48], sizes = [48, 16], strides = [1, 1]} : vector<48x96xbf16> to vector<48x16xbf16>
    %66 = vector.extract_strided_slice %37 {offsets = [0, 80], sizes = [48, 16], strides = [1, 1]} : vector<48x96xbf16> to vector<48x16xbf16>
    %cst_29 = arith.constant dense<0.000000e+00> : vector<48x48xf32>
    %67 = tpu.matmul %64, %65, %cst_29 {dimension_numbers = #tpu.dot_dimension_numbers<[1], [1], [0], [0], [0, 0, 1, 0], [], []>} : vector<48x16xbf16>, vector<48x16xbf16>, vector<48x48xf32> -> vector<48x48xf32>
    %cst_30 = arith.constant 2.500000e-01 : f32
    %68 = vector.broadcast %cst_30 : f32 to vector<48x48xf32>
    %69 = arith.mulf %67, %68 : vector<48x48xf32>
    %70 = arith.addf %69, %5 : vector<48x48xf32>
    %cst_31 = arith.constant dense<0xFF800000> : vector<48xf32>
    %71 = vector.multi_reduction <maximumf>, %70, %cst_31 [1] : vector<48x48xf32> to vector<48xf32>
    %72 = vector.shape_cast %71 : vector<48xf32> to vector<48x1xf32>
    %73 = vector.broadcast %72 : vector<48x1xf32> to vector<48x48xf32>
    %74 = arith.subf %70, %73 : vector<48x48xf32>
    %75 = math.exp %74 : vector<48x48xf32>
    %cst_32 = arith.constant dense<0.000000e+00> : vector<48xf32>
    %76 = vector.multi_reduction <add>, %75, %cst_32 [1] : vector<48x48xf32> to vector<48xf32>
    %77 = vector.shape_cast %76 : vector<48xf32> to vector<48x1xf32>
    %78 = tpu.reciprocal %77 {approx = true} : vector<48x1xf32> -> vector<48x1xf32>
    %79 = vector.broadcast %78 : vector<48x1xf32> to vector<48x48xf32>
    %80 = arith.mulf %75, %79 : vector<48x48xf32>
    %81 = arith.truncf %80 : vector<48x48xf32> to vector<48x48xbf16>
    %cst_33 = arith.constant dense<0.000000e+00> : vector<48x16xf32>
    %82 = tpu.matmul %81, %66, %cst_33 {dimension_numbers = #tpu.dot_dimension_numbers<[1], [0], [0], [1], [0, 0, 1, 1], [], []>} : vector<48x48xbf16>, vector<48x16xbf16>, vector<48x16xf32> -> vector<48x16xf32>
    %83 = arith.truncf %82 : vector<48x16xf32> to vector<48x16xbf16>
    %84 = vector.extract_strided_slice %39 {offsets = [16, 0], sizes = [16, 32], strides = [1, 1]} : vector<32x32xbf16> to vector<16x32xbf16>
    %cst_34 = arith.constant dense<0.000000e+00> : vector<48x32xf32>
    %85 = tpu.matmul %83, %84, %cst_34 {dimension_numbers = #tpu.dot_dimension_numbers<[1], [0], [0], [1], [0, 0, 1, 1], [], []>} : vector<48x16xbf16>, vector<16x32xbf16>, vector<48x32xf32> -> vector<48x32xf32>
    %86 = arith.addf %63, %85 : vector<48x32xf32>
    %87 = vector.extract_strided_slice %7 {offsets = [3, 0], sizes = [1, 32], strides = [1, 1]} : vector<8x128xf32> to vector<1x32xf32>
    %88 = vector.broadcast %87 : vector<1x32xf32> to vector<48x32xf32>
    %89 = arith.addf %86, %88 : vector<48x32xf32>
    %90 = arith.addf %89, %4 : vector<48x32xf32>
    %91 = vector.extract_strided_slice %7 {offsets = [4, 0], sizes = [1, 32], strides = [1, 1]} : vector<8x128xf32> to vector<1x32xf32>
    %92 = vector.extract_strided_slice %7 {offsets = [5, 0], sizes = [1, 32], strides = [1, 1]} : vector<8x128xf32> to vector<1x32xf32>
    %cst_35 = arith.constant dense<0.000000e+00> : vector<48xf32>
    %93 = vector.multi_reduction <add>, %90, %cst_35 [1] : vector<48x32xf32> to vector<48xf32>
    %94 = vector.shape_cast %93 : vector<48xf32> to vector<48x1xf32>
    %cst_36 = arith.constant 3.200000e+01 : f32
    %95 = vector.broadcast %cst_36 : f32 to vector<48x1xf32>
    %96 = arith.divf %94, %95 : vector<48x1xf32>
    %97 = vector.broadcast %96 : vector<48x1xf32> to vector<48x32xf32>
    %98 = arith.subf %90, %97 : vector<48x32xf32>
    %99 = arith.mulf %98, %98 : vector<48x32xf32>
    %cst_37 = arith.constant dense<0.000000e+00> : vector<48xf32>
    %100 = vector.multi_reduction <add>, %99, %cst_37 [1] : vector<48x32xf32> to vector<48xf32>
    %101 = vector.shape_cast %100 : vector<48xf32> to vector<48x1xf32>
    %cst_38 = arith.constant 3.200000e+01 : f32
    %102 = vector.broadcast %cst_38 : f32 to vector<48x1xf32>
    %103 = arith.divf %101, %102 : vector<48x1xf32>
    %cst_39 = arith.constant 9.99999996E-13 : f32
    %104 = vector.broadcast %cst_39 : f32 to vector<48x1xf32>
    %105 = arith.addf %103, %104 : vector<48x1xf32>
    %106 = math.rsqrt %105 : vector<48x1xf32>
    %107 = vector.broadcast %106 : vector<48x1xf32> to vector<48x32xf32>
    %108 = arith.mulf %98, %107 : vector<48x32xf32>
    %109 = vector.broadcast %91 : vector<1x32xf32> to vector<48x32xf32>
    %110 = arith.mulf %108, %109 : vector<48x32xf32>
    %111 = vector.broadcast %92 : vector<1x32xf32> to vector<48x32xf32>
    %112 = arith.addf %110, %111 : vector<48x32xf32>
    %113 = arith.truncf %112 : vector<48x32xf32> to vector<48x32xbf16>
    %c0_40 = arith.constant 0 : index
    %c0_41 = arith.constant 0 : index
    %c0_42 = arith.constant 0 : index
    %114 = vector.load %arg8[%c0_40, %c0_41, %c0_42] : memref<2x32x128xbf16, #tpu.memory_space<vmem>>, vector<1x32x128xbf16>
    %115 = vector.shape_cast %114 : vector<1x32x128xbf16> to vector<32x128xbf16>
    %cst_43 = arith.constant dense<0.000000e+00> : vector<48x128xf32>
    %116 = tpu.matmul %113, %115, %cst_43 {dimension_numbers = #tpu.dot_dimension_numbers<[1], [0], [0], [1], [0, 0, 1, 1], [], []>} : vector<48x32xbf16>, vector<32x128xbf16>, vector<48x128xf32> -> vector<48x128xf32>
    %117 = vector.extract_strided_slice %7 {offsets = [6, 0], sizes = [1, 128], strides = [1, 1]} : vector<8x128xf32> to vector<1x128xf32>
    %118 = vector.broadcast %117 : vector<1x128xf32> to vector<48x128xf32>
    %119 = arith.addf %116, %118 : vector<48x128xf32>
    %120 = arith.mulf %119, %119 : vector<48x128xf32>
    %121 = arith.mulf %119, %120 : vector<48x128xf32>
    %cst_44 = arith.constant 4.471500e-02 : f32
    %122 = vector.broadcast %cst_44 : f32 to vector<48x128xf32>
    %123 = arith.mulf %122, %121 : vector<48x128xf32>
    %124 = arith.addf %119, %123 : vector<48x128xf32>
    %cst_45 = arith.constant 0.797884583 : f32
    %125 = vector.broadcast %cst_45 : f32 to vector<48x128xf32>
    %126 = arith.mulf %125, %124 : vector<48x128xf32>
    %127 = math.tanh %126 : vector<48x128xf32>
    %cst_46 = arith.constant 1.000000e+00 : f32
    %128 = vector.broadcast %cst_46 : f32 to vector<48x128xf32>
    %129 = arith.addf %128, %127 : vector<48x128xf32>
    %cst_47 = arith.constant 5.000000e-01 : f32
    %130 = vector.broadcast %cst_47 : f32 to vector<48x128xf32>
    %131 = arith.mulf %130, %129 : vector<48x128xf32>
    %132 = arith.mulf %119, %131 : vector<48x128xf32>
    %133 = arith.truncf %132 : vector<48x128xf32> to vector<48x128xbf16>
    %c0_48 = arith.constant 0 : index
    %c0_49 = arith.constant 0 : index
    %c0_50 = arith.constant 0 : index
    %134 = vector.load %arg9[%c0_48, %c0_49, %c0_50] : memref<2x128x32xbf16, #tpu.memory_space<vmem>>, vector<1x128x32xbf16>
    %135 = vector.shape_cast %134 : vector<1x128x32xbf16> to vector<128x32xbf16>
    %cst_51 = arith.constant dense<0.000000e+00> : vector<48x32xf32>
    %136 = tpu.matmul %133, %135, %cst_51 {dimension_numbers = #tpu.dot_dimension_numbers<[1], [0], [0], [1], [0, 0, 1, 1], [], []>} : vector<48x128xbf16>, vector<128x32xbf16>, vector<48x32xf32> -> vector<48x32xf32>
    %137 = vector.extract_strided_slice %7 {offsets = [7, 0], sizes = [1, 32], strides = [1, 1]} : vector<8x128xf32> to vector<1x32xf32>
    %138 = vector.broadcast %137 : vector<1x32xf32> to vector<48x32xf32>
    %139 = arith.addf %136, %138 : vector<48x32xf32>
    %140 = arith.addf %139, %90 : vector<48x32xf32>
    %c1 = arith.constant 1 : index
    %c0_52 = arith.constant 0 : index
    %c0_53 = arith.constant 0 : index
    %141 = vector.load %arg5[%c1, %c0_52, %c0_53] : memref<2x8x128xf32, #tpu.memory_space<vmem>>, vector<1x8x128xf32>
    %142 = vector.shape_cast %141 : vector<1x8x128xf32> to vector<8x128xf32>
    %143 = vector.extract_strided_slice %142 {offsets = [0, 0], sizes = [1, 32], strides = [1, 1]} : vector<8x128xf32> to vector<1x32xf32>
    %144 = vector.extract_strided_slice %142 {offsets = [1, 0], sizes = [1, 32], strides = [1, 1]} : vector<8x128xf32> to vector<1x32xf32>
    %cst_54 = arith.constant dense<0.000000e+00> : vector<48xf32>
    %145 = vector.multi_reduction <add>, %140, %cst_54 [1] : vector<48x32xf32> to vector<48xf32>
    %146 = vector.shape_cast %145 : vector<48xf32> to vector<48x1xf32>
    %cst_55 = arith.constant 3.200000e+01 : f32
    %147 = vector.broadcast %cst_55 : f32 to vector<48x1xf32>
    %148 = arith.divf %146, %147 : vector<48x1xf32>
    %149 = vector.broadcast %148 : vector<48x1xf32> to vector<48x32xf32>
    %150 = arith.subf %140, %149 : vector<48x32xf32>
    %151 = arith.mulf %150, %150 : vector<48x32xf32>
    %cst_56 = arith.constant dense<0.000000e+00> : vector<48xf32>
    %152 = vector.multi_reduction <add>, %151, %cst_56 [1] : vector<48x32xf32> to vector<48xf32>
    %153 = vector.shape_cast %152 : vector<48xf32> to vector<48x1xf32>
    %cst_57 = arith.constant 3.200000e+01 : f32
    %154 = vector.broadcast %cst_57 : f32 to vector<48x1xf32>
    %155 = arith.divf %153, %154 : vector<48x1xf32>
    %cst_58 = arith.constant 9.99999996E-13 : f32
    %156 = vector.broadcast %cst_58 : f32 to vector<48x1xf32>
    %157 = arith.addf %155, %156 : vector<48x1xf32>
    %158 = math.rsqrt %157 : vector<48x1xf32>
    %159 = vector.broadcast %158 : vector<48x1xf32> to vector<48x32xf32>
    %160 = arith.mulf %150, %159 : vector<48x32xf32>
    %161 = vector.broadcast %143 : vector<1x32xf32> to vector<48x32xf32>
    %162 = arith.mulf %160, %161 : vector<48x32xf32>
    %163 = vector.broadcast %144 : vector<1x32xf32> to vector<48x32xf32>
    %164 = arith.addf %162, %163 : vector<48x32xf32>
    %165 = arith.truncf %164 : vector<48x32xf32> to vector<48x32xbf16>
    %c1_59 = arith.constant 1 : index
    %c0_60 = arith.constant 0 : index
    %c0_61 = arith.constant 0 : index
    %166 = vector.load %arg6[%c1_59, %c0_60, %c0_61] : memref<2x32x96xbf16, #tpu.memory_space<vmem>>, vector<1x32x96xbf16>
    %167 = vector.shape_cast %166 : vector<1x32x96xbf16> to vector<32x96xbf16>
    %cst_62 = arith.constant dense<0.000000e+00> : vector<48x96xf32>
    %168 = tpu.matmul %165, %167, %cst_62 {dimension_numbers = #tpu.dot_dimension_numbers<[1], [0], [0], [1], [0, 0, 1, 1], [], []>} : vector<48x32xbf16>, vector<32x96xbf16>, vector<48x96xf32> -> vector<48x96xf32>
    %169 = vector.extract_strided_slice %142 {offsets = [2, 0], sizes = [1, 96], strides = [1, 1]} : vector<8x128xf32> to vector<1x96xf32>
    %170 = vector.broadcast %169 : vector<1x96xf32> to vector<48x96xf32>
    %171 = arith.addf %168, %170 : vector<48x96xf32>
    %172 = arith.truncf %171 : vector<48x96xf32> to vector<48x96xbf16>
    %c1_63 = arith.constant 1 : index
    %c0_64 = arith.constant 0 : index
    %c0_65 = arith.constant 0 : index
    %173 = vector.load %arg7[%c1_63, %c0_64, %c0_65] : memref<2x32x32xbf16, #tpu.memory_space<vmem>>, vector<1x32x32xbf16>
    %174 = vector.shape_cast %173 : vector<1x32x32xbf16> to vector<32x32xbf16>
    %cst_66 = arith.constant 0.000000e+00 : f32
    %175 = vector.broadcast %cst_66 : f32 to vector<48x32xf32>
    %176 = vector.extract_strided_slice %172 {offsets = [0, 0], sizes = [48, 16], strides = [1, 1]} : vector<48x96xbf16> to vector<48x16xbf16>
    %177 = vector.extract_strided_slice %172 {offsets = [0, 32], sizes = [48, 16], strides = [1, 1]} : vector<48x96xbf16> to vector<48x16xbf16>
    %178 = vector.extract_strided_slice %172 {offsets = [0, 64], sizes = [48, 16], strides = [1, 1]} : vector<48x96xbf16> to vector<48x16xbf16>
    %cst_67 = arith.constant dense<0.000000e+00> : vector<48x48xf32>
    %179 = tpu.matmul %176, %177, %cst_67 {dimension_numbers = #tpu.dot_dimension_numbers<[1], [1], [0], [0], [0, 0, 1, 0], [], []>} : vector<48x16xbf16>, vector<48x16xbf16>, vector<48x48xf32> -> vector<48x48xf32>
    %cst_68 = arith.constant 2.500000e-01 : f32
    %180 = vector.broadcast %cst_68 : f32 to vector<48x48xf32>
    %181 = arith.mulf %179, %180 : vector<48x48xf32>
    %182 = arith.addf %181, %5 : vector<48x48xf32>
    %cst_69 = arith.constant dense<0xFF800000> : vector<48xf32>
    %183 = vector.multi_reduction <maximumf>, %182, %cst_69 [1] : vector<48x48xf32> to vector<48xf32>
    %184 = vector.shape_cast %183 : vector<48xf32> to vector<48x1xf32>
    %185 = vector.broadcast %184 : vector<48x1xf32> to vector<48x48xf32>
    %186 = arith.subf %182, %185 : vector<48x48xf32>
    %187 = math.exp %186 : vector<48x48xf32>
    %cst_70 = arith.constant dense<0.000000e+00> : vector<48xf32>
    %188 = vector.multi_reduction <add>, %187, %cst_70 [1] : vector<48x48xf32> to vector<48xf32>
    %189 = vector.shape_cast %188 : vector<48xf32> to vector<48x1xf32>
    %190 = tpu.reciprocal %189 {approx = true} : vector<48x1xf32> -> vector<48x1xf32>
    %191 = vector.broadcast %190 : vector<48x1xf32> to vector<48x48xf32>
    %192 = arith.mulf %187, %191 : vector<48x48xf32>
    %193 = arith.truncf %192 : vector<48x48xf32> to vector<48x48xbf16>
    %cst_71 = arith.constant dense<0.000000e+00> : vector<48x16xf32>
    %194 = tpu.matmul %193, %178, %cst_71 {dimension_numbers = #tpu.dot_dimension_numbers<[1], [0], [0], [1], [0, 0, 1, 1], [], []>} : vector<48x48xbf16>, vector<48x16xbf16>, vector<48x16xf32> -> vector<48x16xf32>
    %195 = arith.truncf %194 : vector<48x16xf32> to vector<48x16xbf16>
    %196 = vector.extract_strided_slice %174 {offsets = [0, 0], sizes = [16, 32], strides = [1, 1]} : vector<32x32xbf16> to vector<16x32xbf16>
    %cst_72 = arith.constant dense<0.000000e+00> : vector<48x32xf32>
    %197 = tpu.matmul %195, %196, %cst_72 {dimension_numbers = #tpu.dot_dimension_numbers<[1], [0], [0], [1], [0, 0, 1, 1], [], []>} : vector<48x16xbf16>, vector<16x32xbf16>, vector<48x32xf32> -> vector<48x32xf32>
    %198 = arith.addf %175, %197 : vector<48x32xf32>
    %199 = vector.extract_strided_slice %172 {offsets = [0, 16], sizes = [48, 16], strides = [1, 1]} : vector<48x96xbf16> to vector<48x16xbf16>
    %200 = vector.extract_strided_slice %172 {offsets = [0, 48], sizes = [48, 16], strides = [1, 1]} : vector<48x96xbf16> to vector<48x16xbf16>
    %201 = vector.extract_strided_slice %172 {offsets = [0, 80], sizes = [48, 16], strides = [1, 1]} : vector<48x96xbf16> to vector<48x16xbf16>
    %cst_73 = arith.constant dense<0.000000e+00> : vector<48x48xf32>
    %202 = tpu.matmul %199, %200, %cst_73 {dimension_numbers = #tpu.dot_dimension_numbers<[1], [1], [0], [0], [0, 0, 1, 0], [], []>} : vector<48x16xbf16>, vector<48x16xbf16>, vector<48x48xf32> -> vector<48x48xf32>
    %cst_74 = arith.constant 2.500000e-01 : f32
    %203 = vector.broadcast %cst_74 : f32 to vector<48x48xf32>
    %204 = arith.mulf %202, %203 : vector<48x48xf32>
    %205 = arith.addf %204, %5 : vector<48x48xf32>
    %cst_75 = arith.constant dense<0xFF800000> : vector<48xf32>
    %206 = vector.multi_reduction <maximumf>, %205, %cst_75 [1] : vector<48x48xf32> to vector<48xf32>
    %207 = vector.shape_cast %206 : vector<48xf32> to vector<48x1xf32>
    %208 = vector.broadcast %207 : vector<48x1xf32> to vector<48x48xf32>
    %209 = arith.subf %205, %208 : vector<48x48xf32>
    %210 = math.exp %209 : vector<48x48xf32>
    %cst_76 = arith.constant dense<0.000000e+00> : vector<48xf32>
    %211 = vector.multi_reduction <add>, %210, %cst_76 [1] : vector<48x48xf32> to vector<48xf32>
    %212 = vector.shape_cast %211 : vector<48xf32> to vector<48x1xf32>
    %213 = tpu.reciprocal %212 {approx = true} : vector<48x1xf32> -> vector<48x1xf32>
    %214 = vector.broadcast %213 : vector<48x1xf32> to vector<48x48xf32>
    %215 = arith.mulf %210, %214 : vector<48x48xf32>
    %216 = arith.truncf %215 : vector<48x48xf32> to vector<48x48xbf16>
    %cst_77 = arith.constant dense<0.000000e+00> : vector<48x16xf32>
    %217 = tpu.matmul %216, %201, %cst_77 {dimension_numbers = #tpu.dot_dimension_numbers<[1], [0], [0], [1], [0, 0, 1, 1], [], []>} : vector<48x48xbf16>, vector<48x16xbf16>, vector<48x16xf32> -> vector<48x16xf32>
    %218 = arith.truncf %217 : vector<48x16xf32> to vector<48x16xbf16>
    %219 = vector.extract_strided_slice %174 {offsets = [16, 0], sizes = [16, 32], strides = [1, 1]} : vector<32x32xbf16> to vector<16x32xbf16>
    %cst_78 = arith.constant dense<0.000000e+00> : vector<48x32xf32>
    %220 = tpu.matmul %218, %219, %cst_78 {dimension_numbers = #tpu.dot_dimension_numbers<[1], [0], [0], [1], [0, 0, 1, 1], [], []>} : vector<48x16xbf16>, vector<16x32xbf16>, vector<48x32xf32> -> vector<48x32xf32>
    %221 = arith.addf %198, %220 : vector<48x32xf32>
    %222 = vector.extract_strided_slice %142 {offsets = [3, 0], sizes = [1, 32], strides = [1, 1]} : vector<8x128xf32> to vector<1x32xf32>
    %223 = vector.broadcast %222 : vector<1x32xf32> to vector<48x32xf32>
    %224 = arith.addf %221, %223 : vector<48x32xf32>
    %225 = arith.addf %224, %140 : vector<48x32xf32>
    %226 = vector.extract_strided_slice %142 {offsets = [4, 0], sizes = [1, 32], strides = [1, 1]} : vector<8x128xf32> to vector<1x32xf32>
    %227 = vector.extract_strided_slice %142 {offsets = [5, 0], sizes = [1, 32], strides = [1, 1]} : vector<8x128xf32> to vector<1x32xf32>
    %cst_79 = arith.constant dense<0.000000e+00> : vector<48xf32>
    %228 = vector.multi_reduction <add>, %225, %cst_79 [1] : vector<48x32xf32> to vector<48xf32>
    %229 = vector.shape_cast %228 : vector<48xf32> to vector<48x1xf32>
    %cst_80 = arith.constant 3.200000e+01 : f32
    %230 = vector.broadcast %cst_80 : f32 to vector<48x1xf32>
    %231 = arith.divf %229, %230 : vector<48x1xf32>
    %232 = vector.broadcast %231 : vector<48x1xf32> to vector<48x32xf32>
    %233 = arith.subf %225, %232 : vector<48x32xf32>
    %234 = arith.mulf %233, %233 : vector<48x32xf32>
    %cst_81 = arith.constant dense<0.000000e+00> : vector<48xf32>
    %235 = vector.multi_reduction <add>, %234, %cst_81 [1] : vector<48x32xf32> to vector<48xf32>
    %236 = vector.shape_cast %235 : vector<48xf32> to vector<48x1xf32>
    %cst_82 = arith.constant 3.200000e+01 : f32
    %237 = vector.broadcast %cst_82 : f32 to vector<48x1xf32>
    %238 = arith.divf %236, %237 : vector<48x1xf32>
    %cst_83 = arith.constant 9.99999996E-13 : f32
    %239 = vector.broadcast %cst_83 : f32 to vector<48x1xf32>
    %240 = arith.addf %238, %239 : vector<48x1xf32>
    %241 = math.rsqrt %240 : vector<48x1xf32>
    %242 = vector.broadcast %241 : vector<48x1xf32> to vector<48x32xf32>
    %243 = arith.mulf %233, %242 : vector<48x32xf32>
    %244 = vector.broadcast %226 : vector<1x32xf32> to vector<48x32xf32>
    %245 = arith.mulf %243, %244 : vector<48x32xf32>
    %246 = vector.broadcast %227 : vector<1x32xf32> to vector<48x32xf32>
    %247 = arith.addf %245, %246 : vector<48x32xf32>
    %248 = arith.truncf %247 : vector<48x32xf32> to vector<48x32xbf16>
    %c1_84 = arith.constant 1 : index
    %c0_85 = arith.constant 0 : index
    %c0_86 = arith.constant 0 : index
    %249 = vector.load %arg8[%c1_84, %c0_85, %c0_86] : memref<2x32x128xbf16, #tpu.memory_space<vmem>>, vector<1x32x128xbf16>
    %250 = vector.shape_cast %249 : vector<1x32x128xbf16> to vector<32x128xbf16>
    %cst_87 = arith.constant dense<0.000000e+00> : vector<48x128xf32>
    %251 = tpu.matmul %248, %250, %cst_87 {dimension_numbers = #tpu.dot_dimension_numbers<[1], [0], [0], [1], [0, 0, 1, 1], [], []>} : vector<48x32xbf16>, vector<32x128xbf16>, vector<48x128xf32> -> vector<48x128xf32>
    %252 = vector.extract_strided_slice %142 {offsets = [6, 0], sizes = [1, 128], strides = [1, 1]} : vector<8x128xf32> to vector<1x128xf32>
    %253 = vector.broadcast %252 : vector<1x128xf32> to vector<48x128xf32>
    %254 = arith.addf %251, %253 : vector<48x128xf32>
    %255 = arith.mulf %254, %254 : vector<48x128xf32>
    %256 = arith.mulf %254, %255 : vector<48x128xf32>
    %cst_88 = arith.constant 4.471500e-02 : f32
    %257 = vector.broadcast %cst_88 : f32 to vector<48x128xf32>
    %258 = arith.mulf %257, %256 : vector<48x128xf32>
    %259 = arith.addf %254, %258 : vector<48x128xf32>
    %cst_89 = arith.constant 0.797884583 : f32
    %260 = vector.broadcast %cst_89 : f32 to vector<48x128xf32>
    %261 = arith.mulf %260, %259 : vector<48x128xf32>
    %262 = math.tanh %261 : vector<48x128xf32>
    %cst_90 = arith.constant 1.000000e+00 : f32
    %263 = vector.broadcast %cst_90 : f32 to vector<48x128xf32>
    %264 = arith.addf %263, %262 : vector<48x128xf32>
    %cst_91 = arith.constant 5.000000e-01 : f32
    %265 = vector.broadcast %cst_91 : f32 to vector<48x128xf32>
    %266 = arith.mulf %265, %264 : vector<48x128xf32>
    %267 = arith.mulf %254, %266 : vector<48x128xf32>
    %268 = arith.truncf %267 : vector<48x128xf32> to vector<48x128xbf16>
    %c1_92 = arith.constant 1 : index
    %c0_93 = arith.constant 0 : index
    %c0_94 = arith.constant 0 : index
    %269 = vector.load %arg9[%c1_92, %c0_93, %c0_94] : memref<2x128x32xbf16, #tpu.memory_space<vmem>>, vector<1x128x32xbf16>
    %270 = vector.shape_cast %269 : vector<1x128x32xbf16> to vector<128x32xbf16>
    %cst_95 = arith.constant dense<0.000000e+00> : vector<48x32xf32>
    %271 = tpu.matmul %268, %270, %cst_95 {dimension_numbers = #tpu.dot_dimension_numbers<[1], [0], [0], [1], [0, 0, 1, 1], [], []>} : vector<48x128xbf16>, vector<128x32xbf16>, vector<48x32xf32> -> vector<48x32xf32>
    %272 = vector.extract_strided_slice %142 {offsets = [7, 0], sizes = [1, 32], strides = [1, 1]} : vector<8x128xf32> to vector<1x32xf32>
    %273 = vector.broadcast %272 : vector<1x32xf32> to vector<48x32xf32>
    %274 = arith.addf %271, %273 : vector<48x32xf32>
    %275 = arith.addf %274, %225 : vector<48x32xf32>
    %c0_96 = arith.constant 0 : index
    %c0_97 = arith.constant 0 : index
    %276 = vector.load %arg10[%c0_96, %c0_97] : memref<4x128xf32, #tpu.memory_space<vmem>>, vector<4x128xf32>
    %277 = vector.extract_strided_slice %276 {offsets = [0, 0], sizes = [1, 32], strides = [1, 1]} : vector<4x128xf32> to vector<1x32xf32>
    %278 = vector.extract_strided_slice %276 {offsets = [1, 0], sizes = [1, 32], strides = [1, 1]} : vector<4x128xf32> to vector<1x32xf32>
    %cst_98 = arith.constant dense<0.000000e+00> : vector<48xf32>
    %279 = vector.multi_reduction <add>, %275, %cst_98 [1] : vector<48x32xf32> to vector<48xf32>
    %280 = vector.shape_cast %279 : vector<48xf32> to vector<48x1xf32>
    %cst_99 = arith.constant 3.200000e+01 : f32
    %281 = vector.broadcast %cst_99 : f32 to vector<48x1xf32>
    %282 = arith.divf %280, %281 : vector<48x1xf32>
    %283 = vector.broadcast %282 : vector<48x1xf32> to vector<48x32xf32>
    %284 = arith.subf %275, %283 : vector<48x32xf32>
    %285 = arith.mulf %284, %284 : vector<48x32xf32>
    %cst_100 = arith.constant dense<0.000000e+00> : vector<48xf32>
    %286 = vector.multi_reduction <add>, %285, %cst_100 [1] : vector<48x32xf32> to vector<48xf32>
    %287 = vector.shape_cast %286 : vector<48xf32> to vector<48x1xf32>
    %cst_101 = arith.constant 3.200000e+01 : f32
    %288 = vector.broadcast %cst_101 : f32 to vector<48x1xf32>
    %289 = arith.divf %287, %288 : vector<48x1xf32>
    %cst_102 = arith.constant 9.99999996E-13 : f32
    %290 = vector.broadcast %cst_102 : f32 to vector<48x1xf32>
    %291 = arith.addf %289, %290 : vector<48x1xf32>
    %292 = math.rsqrt %291 : vector<48x1xf32>
    %293 = vector.broadcast %292 : vector<48x1xf32> to vector<48x32xf32>
    %294 = arith.mulf %284, %293 : vector<48x32xf32>
    %295 = vector.broadcast %277 : vector<1x32xf32> to vector<48x32xf32>
    %296 = arith.mulf %294, %295 : vector<48x32xf32>
    %297 = vector.broadcast %278 : vector<1x32xf32> to vector<48x32xf32>
    %298 = arith.addf %296, %297 : vector<48x32xf32>
    %299 = arith.truncf %298 : vector<48x32xf32> to vector<48x32xbf16>
    %c0_103 = arith.constant 0 : index
    %c0_104 = arith.constant 0 : index
    %300 = vector.load %arg11[%c0_103, %c0_104] : memref<32x32xbf16, #tpu.memory_space<vmem>>, vector<32x32xbf16>
    %cst_105 = arith.constant dense<0.000000e+00> : vector<48x32xf32>
    %301 = tpu.matmul %299, %300, %cst_105 {dimension_numbers = #tpu.dot_dimension_numbers<[1], [0], [0], [1], [0, 0, 1, 1], [], []>} : vector<48x32xbf16>, vector<32x32xbf16>, vector<48x32xf32> -> vector<48x32xf32>
    %302 = vector.extract_strided_slice %276 {offsets = [2, 0], sizes = [1, 32], strides = [1, 1]} : vector<4x128xf32> to vector<1x32xf32>
    %303 = vector.broadcast %302 : vector<1x32xf32> to vector<48x32xf32>
    %304 = arith.addf %301, %303 : vector<48x32xf32>
    %305 = math.tanh %304 : vector<48x32xf32>
    %306 = arith.truncf %305 : vector<48x32xf32> to vector<48x32xbf16>
    %c0_106 = arith.constant 0 : index
    %c0_107 = arith.constant 0 : index
    %307 = vector.load %arg12[%c0_106, %c0_107] : memref<32x512xbf16, #tpu.memory_space<vmem>>, vector<32x512xbf16>
    %cst_108 = arith.constant dense<0.000000e+00> : vector<48x512xf32>
    %308 = tpu.matmul %306, %307, %cst_108 {dimension_numbers = #tpu.dot_dimension_numbers<[1], [0], [0], [1], [0, 0, 1, 1], [], []>} : vector<48x32xbf16>, vector<32x512xbf16>, vector<48x512xf32> -> vector<48x512xf32>
    %c0_109 = arith.constant 0 : index
    %c0_110 = arith.constant 0 : index
    %309 = vector.load %arg13[%c0_109, %c0_110] : memref<1x512xf32, #tpu.memory_space<vmem>>, vector<1x512xf32>
    %310 = vector.broadcast %309 : vector<1x512xf32> to vector<48x512xf32>
    %311 = arith.addf %308, %310 : vector<48x512xf32>
    %cst_111 = arith.constant 0.000000e+00 : f32
    %312 = vector.broadcast %cst_111 : f32 to vector<48x512xf32>
    %313 = arith.maximumf %311, %312 : vector<48x512xf32>
    %314 = arith.truncf %313 : vector<48x512xf32> to vector<48x512xbf16>
    %c0_112 = arith.constant 0 : index
    %c0_113 = arith.constant 0 : index
    %315 = vector.load %arg14[%c0_112, %c0_113] : memref<512x8xbf16, #tpu.memory_space<vmem>>, vector<512x8xbf16>
    %cst_114 = arith.constant dense<0.000000e+00> : vector<48x8xf32>
    %316 = tpu.matmul %314, %315, %cst_114 {dimension_numbers = #tpu.dot_dimension_numbers<[1], [0], [0], [1], [0, 0, 1, 1], [], []>} : vector<48x512xbf16>, vector<512x8xbf16>, vector<48x8xf32> -> vector<48x8xf32>
    %317 = vector.extract_strided_slice %276 {offsets = [3, 0], sizes = [1, 8], strides = [1, 1]} : vector<4x128xf32> to vector<1x8xf32>
    %318 = vector.broadcast %317 : vector<1x8xf32> to vector<48x8xf32>
    %319 = arith.addf %316, %318 : vector<48x8xf32>
    %320 = arith.negf %319 : vector<48x8xf32>
    %321 = math.exp %320 : vector<48x8xf32>
    %cst_115 = arith.constant 1.000000e+00 : f32
    %322 = vector.broadcast %cst_115 : f32 to vector<48x8xf32>
    %323 = arith.addf %322, %321 : vector<48x8xf32>
    %324 = arith.divf %322, %323 : vector<48x8xf32>
    %325 = vector.extract_strided_slice %324 {offsets = [0, 0], sizes = [1, 8], strides = [1, 1]} : vector<48x8xf32> to vector<1x8xf32>
    %c0_116 = arith.constant 0 : index
    %c0_117 = arith.constant 0 : index
    %326 = vector.load %arg15[%c0_116, %c0_117] : memref<2x8xf32, #tpu.memory_space<vmem>>, vector<1x8xf32>
    tpu.vector_store %arg15[%c0_116, %c0_117], %325 {strides = array<i32>} : memref<2x8xf32, #tpu.memory_space<vmem>>, vector<1x8xf32>,
    %327 = vector.extract_strided_slice %324 {offsets = [24, 0], sizes = [1, 8], strides = [1, 1]} : vector<48x8xf32> to vector<1x8xf32>
    %c1_118 = arith.constant 1 : index
    %c0_119 = arith.constant 0 : index
    %328 = vector.load %arg15[%c1_118, %c0_119] : memref<2x8xf32, #tpu.memory_space<vmem>>, vector<1x8xf32>
    tpu.vector_store %arg15[%c1_118, %c0_119], %327 {strides = array<i32>} : memref<2x8xf32, #tpu.memory_space<vmem>>, vector<1x8xf32>,
    return
  }
  func.func @transform_0(%arg0: i32) -> (i32, i32) {
    %c0_i32 = arith.constant 0 : i32
    %c0_i32_0 = arith.constant 0 : i32
    %c0_i32_1 = arith.constant 0 : i32
    return %c0_i32, %c0_i32_0 : i32, i32
  }
  func.func @transform_1(%arg0: i32) -> (i32, i32) {
    %c0_i32 = arith.constant 0 : i32
    %c0_i32_0 = arith.constant 0 : i32
    %c0_i32_1 = arith.constant 0 : i32
    return %c0_i32, %c0_i32_0 : i32, i32
  }
  func.func @transform_2(%arg0: i32) -> (i32, i32) {
    %c0_i32 = arith.constant 0 : i32
    %c0_i32_0 = arith.constant 0 : i32
    %c0_i32_1 = arith.constant 0 : i32
    return %c0_i32, %c0_i32_0 : i32, i32
  }
  func.func @transform_3(%arg0: i32) -> (i32, i32) {
    %c0_i32 = arith.constant 0 : i32
    %c0_i32_0 = arith.constant 0 : i32
    %c0_i32_1 = arith.constant 0 : i32
    return %c0_i32, %c0_i32_0 : i32, i32
  }
  func.func @transform_4(%arg0: i32) -> (i32, i32, i32) {
    %c0_i32 = arith.constant 0 : i32
    %c0_i32_0 = arith.constant 0 : i32
    %c0_i32_1 = arith.constant 0 : i32
    %c0_i32_2 = arith.constant 0 : i32
    return %c0_i32, %c0_i32_0, %c0_i32_1 : i32, i32, i32
  }
  func.func @transform_5(%arg0: i32) -> (i32, i32, i32) {
    %c0_i32 = arith.constant 0 : i32
    %c0_i32_0 = arith.constant 0 : i32
    %c0_i32_1 = arith.constant 0 : i32
    %c0_i32_2 = arith.constant 0 : i32
    return %c0_i32, %c0_i32_0, %c0_i32_1 : i32, i32, i32
  }
  func.func @transform_6(%arg0: i32) -> (i32, i32, i32) {
    %c0_i32 = arith.constant 0 : i32
    %c0_i32_0 = arith.constant 0 : i32
    %c0_i32_1 = arith.constant 0 : i32
    %c0_i32_2 = arith.constant 0 : i32
    return %c0_i32, %c0_i32_0, %c0_i32_1 : i32, i32, i32
  }
  func.func @transform_7(%arg0: i32) -> (i32, i32, i32) {
    %c0_i32 = arith.constant 0 : i32
    %c0_i32_0 = arith.constant 0 : i32
    %c0_i32_1 = arith.constant 0 : i32
    %c0_i32_2 = arith.constant 0 : i32
    return %c0_i32, %c0_i32_0, %c0_i32_1 : i32, i32, i32
  }
  func.func @transform_8(%arg0: i32) -> (i32, i32, i32) {
    %c0_i32 = arith.constant 0 : i32
    %c0_i32_0 = arith.constant 0 : i32
    %c0_i32_1 = arith.constant 0 : i32
    %c0_i32_2 = arith.constant 0 : i32
    return %c0_i32, %c0_i32_0, %c0_i32_1 : i32, i32, i32
  }
  func.func @transform_9(%arg0: i32) -> (i32, i32) {
    %c0_i32 = arith.constant 0 : i32
    %c0_i32_0 = arith.constant 0 : i32
    %c0_i32_1 = arith.constant 0 : i32
    return %c0_i32, %c0_i32_0 : i32, i32
  }
  func.func @transform_10(%arg0: i32) -> (i32, i32) {
    %c0_i32 = arith.constant 0 : i32
    %c0_i32_0 = arith.constant 0 : i32
    %c0_i32_1 = arith.constant 0 : i32
    return %c0_i32, %c0_i32_0 : i32, i32
  }
  func.func @transform_11(%arg0: i32) -> (i32, i32) {
    %c0_i32 = arith.constant 0 : i32
    %c0_i32_0 = arith.constant 0 : i32
    %c0_i32_1 = arith.constant 0 : i32
    return %c0_i32, %c0_i32_0 : i32, i32
  }
  func.func @transform_12(%arg0: i32) -> (i32, i32) {
    %c0_i32 = arith.constant 0 : i32
    %c0_i32_0 = arith.constant 0 : i32
    %c0_i32_1 = arith.constant 0 : i32
    return %c0_i32, %c0_i32_0 : i32, i32
  }
  func.func @transform_13(%arg0: i32) -> (i32, i32) {
    %c0_i32 = arith.constant 0 : i32
    %c0_i32_0 = arith.constant 0 : i32
    %c0_i32_1 = arith.constant 0 : i32
    return %c0_i32, %c0_i32_0 : i32, i32
  }
  func.func @transform_14(%arg0: i32) -> (i32, i32) {
    %c0_i32 = arith.constant 0 : i32
    %c0_i32_0 = arith.constant 0 : i32
    %c0_i32_1 = arith.constant 0 : i32
    return %c0_i32, %c0_i32_0 : i32, i32
  }
}

</mosaic_0001>

<bundles_post_ra>
// kernel: vit_forward.1
= control target key start
LH: loop header
LB: loop body
LE: loop exit
PB: predicated region body
PF: predicated region fallthrough
CT: control target
= control target key end

     0   :  { %s5051_s0 = inlined_call_operand.vmem [shape: bf16[48,48], index: 0, kind: input, shape index: {}]   ;;  %s5052_s1 = inlined_call_operand.vmem [shape: bf16[48,32], index: 1, kind: input, shape index: {}]   ;;  %s5053_s2 = inlined_call_operand.vmem [shape: f32[48,32], index: 2, kind: input, shape index: {}]   ;;  %s5054_s3 = inlined_call_operand.vmem [shape: f32[48,48], index: 3, kind: input, shape index: {}]   ;;  %s5055_s4 = inlined_call_operand.vmem [shape: f32[2,8,128], index: 4, kind: input, shape index: {}]   ;;  %s5056_s5 = inlined_call_operand.vmem [shape: bf16[2,32,96], index: 5, kind: input, shape index: {}]   ;;  %s5057_s6 = inlined_call_operand.vmem [shape: bf16[2,32,32], index: 6, kind: input, shape index: {}]   ;;  %s5058_s7 = inlined_call_operand.vmem [shape: bf16[2,32,128], index: 7, kind: input, shape index: {}]   ;;  %s5059_s8 = inlined_call_operand.vmem [shape: bf16[2,128,32], index: 8, kind: input, shape index: {}]   ;;  %s5060_s9 = inlined_call_operand.vmem [shape: f32[4,128], index: 9, kind: input, shape index: {}]   ;;  %s5061_s10 = inlined_call_operand.vmem [shape: bf16[32,32], index: 10, kind: input, shape index: {}]   ;;  %s5062_s11 = inlined_call_operand.vmem [shape: bf16[32,512], index: 11, kind: input, shape index: {}]   ;;  %s5063_s12 = inlined_call_operand.vmem [shape: f32[1,512], index: 12, kind: input, shape index: {}]   ;;  %s5064_s13 = inlined_call_operand.vmem [shape: bf16[512,8], index: 13, kind: input, shape index: {}]   ;;  %s5065_s14 = inlined_call_operand.hbm [shape: f32[2,8], index: 14, kind: output, shape index: {}]  }
   0x1   :  { %v3404_v0 = vld [vmem:[%s5052_s1 + $0x10] sm:$0xff]  ;;  %v3403_v1 = vld [vmem:[%s5052_s1 + $0x8] sm:$0xff] }
   0x2   :  { %115 = vmatpush.bf16.msra.mxu0 %v3404_v0 }
   0x3   :  { %19 = vsyncpa [#allocation3], 0  ;;  %v3402_v2 = vld [vmem:[%s5052_s1] sm:$0xff]  ;;  %vm100_vm0 = vcmask 392192   ;;  %v3400_v4 = vld [vmem:[%s5051_s0 + $0x8] sm:$0xff]  ;;  %vm141_vm1 = vcmask 261120  }
   0x4   :  { %v3399_v3 = vld [vmem:[%s5051_s0] sm:$0xff]  ;;  %v3401_v5 = vld [vmem:[%s5051_s0 + $0x10] sm:$0xff]  ;;  %v62_v10 = vld [vmem:[%s5053_s2 + $0x8] sm:$0xff]  ;;  %v3718_v30 = vmov 32.0   ;;  %s3719_s24 = smov 96   ;;  %s3720_s1 = smov 80  }
   0x5   :  { %v61_v6 = vld [vmem:[%s5053_s2] sm:$0xff]  ;;  %v63_v14 = vld [vmem:[%s5053_s2 + $0x10] sm:$0xff]  ;;  %v64_v18 = vld [vmem:[%s5053_s2 + $0x18] sm:$0xff]  ;;  %3482 = vrcp.f32 %v3718_v30  ;;  %s3721_s25 = smov 112   ;;  %s3722_s26 = smov 64  }
   0x6   :  { %116 = vmatpush.bf16.msra.mxu0 %v3403_v1  ;;  %v65_v22 = vld [vmem:[%s5053_s2 + $0x20] sm:$0xff]  ;;  %v66_v26 = vld [vmem:[%s5053_s2 + $0x28] sm:$0xff]  ;;  %s3723_s21 = smov 48   ;;  %s2989_s16 = sshll.u32 %s5065_s14, 4  ;;  %s2990_s16 = int_to_ptr.hbm [resolvable:$true] %s2989_s16 }
   0xa   :  { %117 = vmatpush.bf16.msra.mxu0 %v3402_v2 }
   0xb   :  { %v3483_v31 = vpop.eup %3482 }
   0xc   :  { %v161_v32 = vmul.f32 32.0, %v3483_v31  ;;  %vm165_vm2 = vweird.f32 %v3483_v31 }
   0xd   :  { %3022 = vmatmul.msk.bf16.vlgmr.msra.gmra.mxu0 %vm100_vm0, %v3399_v3  ;;  %v3406_v3 = vld [vmem:[%s5056_s5 + $0x8] sm:$0xff] }
   0xe   :  { %v162_v33 = vsub.f32 1.0, %v161_v32  ;;  %330 = vmatpush.bf16.msra.mxu1 %v3406_v3  ;;  %v3919_v32 = vld [vmem:[%s5055_s4] sm:$0xff] }
  0x10   :  { %v163_v34 = vmul.f32 %v3483_v31, %v162_v33 }
  0x12   :  { %v164_v35 = vadd.f32 %v3483_v31, %v163_v34 }
  0x14   :  { %v3863_v36 = vsel %vm165_vm2, %v3483_v31, %v164_v35 }
  0x1d   :  { %3023 = vmatmul.msk.bf16.gmra.mxu0 %vm100_vm0, %v3400_v4 }
  0x2d   :  { %3024 = vmatmul.msk.bf16.gmra.mxu0 %vm100_vm0, %v3401_v5 }
  0x8a   :  { %v119_v7 = vpop.f32.mrf.mxu0 }
  0x8b   :  { %v3824_v8 = vadd.f32 %v119_v7, %v61_v6  ;;  %v3405_v6 = vld [vmem:[%s5056_s5] sm:$0xff] }
  0x8c   :  { %331 = vmatpush.bf16.msra.mxu1 %v3405_v6 }
  0x8d   :  { %v142_v9 = vsel %vm141_vm1, %v3824_v8, 0.0 }
  0x8e   :  { %143 = vadd.xlane.f32.xlu0 %v142_v9 }
  0x92   :  { %v121_v11 = vpop.f32.mrf.mxu0 }
  0x93   :  { %v3831_v12 = vadd.f32 %v121_v11, %v62_v10 }
  0x95   :  { %v145_v13 = vsel %vm141_vm1, %v3831_v12, 0.0 }
  0x96   :  { %146 = vadd.xlane.f32.xlu0 %v145_v13 }
  0x9a   :  { %v124_v15 = vpop.f32.mrf.mxu0 }
  0x9b   :  { %v3838_v16 = vadd.f32 %v124_v15, %v63_v14 }
  0x9d   :  { %v148_v17 = vsel %vm141_vm1, %v3838_v16, 0.0 }
  0x9e   :  { %149 = vadd.xlane.f32.xlu1 %v148_v17 }
  0xa2   :  { %v126_v19 = vpop.f32.mrf.mxu0 }
  0xa3   :  { %v3845_v20 = vadd.f32 %v126_v19, %v64_v18 }
  0xa5   :  { %v151_v21 = vsel %vm141_vm1, %v3845_v20, 0.0 }
  0xa6   :  { %152 = vadd.xlane.f32.xlu1 %v151_v21 }
  0xaa   :  { %v129_v23 = vpop.f32.mrf.mxu0 }
  0xab   :  { %v3852_v24 = vadd.f32 %v129_v23, %v65_v22 }
  0xad   :  { %v154_v25 = vsel %vm141_vm1, %v3852_v24, 0.0 }
  0xae   :  { %155 = vadd.xlane.f32.xlu2 %v154_v25 }
  0xb2   :  { %v131_v27 = vpop.f32.mrf.mxu0 }
  0xb3   :  { %v3859_v28 = vadd.f32 %v131_v27, %v66_v26 }
  0xb5   :  { %v157_v29 = vsel %vm141_vm1, %v3859_v28, 0.0 }
  0xb6   :  { %158 = vadd.xlane.f32.xlu2 %v157_v29 }
 0x101   :  { %v144_v37 = vpop.xlane.xlu0 %143 }
 0x102   :  { %v167_v38 = vmul.f32 %v3863_v36, %v144_v37 }
 0x104   :  { %v3867_v39 = vsub.f32 %v3824_v8, %v167_v38 }
 0x106   :  { %v179_v40 = vmul.f32 %v3867_v39, %v3867_v39 }
 0x108   :  { %v185_v41 = vsel %vm141_vm1, %v179_v40, 0.0  ;;  %v3924_v40 = vperm.slane %v3919_v32, 0 }
 0x109   :  { %186 = vadd.xlane.f32.xlu0 %v185_v41  ;;  %v147_v42 = vpop.xlane.xlu0 %146 }
 0x10a   :  { %v168_v43 = vmul.f32 %v3863_v36, %v147_v42 }
 0x10c   :  { %v3874_v44 = vsub.f32 %v3831_v12, %v168_v43 }
 0x10e   :  { %v180_v45 = vmul.f32 %v3874_v44, %v3874_v44 }
 0x110   :  { %v188_v46 = vsel %vm141_vm1, %v180_v45, 0.0 }
 0x111   :  { %v150_v47 = vpop.xlane.xlu1 %149  ;;  %189 = vadd.xlane.f32.xlu1 %v188_v46 }
 0x112   :  { %v169_v48 = vmul.f32 %v3863_v36, %v150_v47 }
 0x114   :  { %v3881_v49 = vsub.f32 %v3838_v16, %v169_v48  ;;  %v3929_v48 = vperm.slane %v3919_v32, 1 }
 0x116   :  { %v181_v50 = vmul.f32 %v3881_v49, %v3881_v49 }
 0x118   :  { %v191_v51 = vsel %vm141_vm1, %v181_v50, 0.0 }
 0x119   :  { %192 = vadd.xlane.f32.xlu2 %v191_v51  ;;  %v153_v52 = vpop.xlane.xlu1 %152 }
 0x11a   :  { %v170_v53 = vmul.f32 %v3863_v36, %v153_v52 }
 0x11c   :  { %v3888_v54 = vsub.f32 %v3845_v20, %v170_v53 }
 0x11e   :  { %v182_v55 = vmul.f32 %v3888_v54, %v3888_v54 }
 0x120   :  { %v194_v56 = vsel %vm141_vm1, %v182_v55, 0.0 }
 0x121   :  { %v156_v57 = vpop.xlane.xlu2 %155  ;;  %195 = vadd.xlane.f32.xlu0 %v194_v56 }
 0x122   :  { %v171_v58 = vmul.f32 %v3863_v36, %v156_v57 }
 0x124   :  { %v3895_v59 = vsub.f32 %v3852_v24, %v171_v58 }
 0x126   :  { %v183_v60 = vmul.f32 %v3895_v59, %v3895_v59 }
 0x128   :  { %v197_v61 = vsel %vm141_vm1, %v183_v60, 0.0 }
 0x129   :  { %v159_v62 = vpop.xlane.xlu2 %158  ;;  %198 = vadd.xlane.f32.xlu1 %v197_v61 }
 0x12a   :  { %v172_v63 = vmul.f32 %v3863_v36, %v159_v62 }
 0x12c   :  { %v3902_v0 = vsub.f32 %v3859_v28, %v172_v63 }
 0x12e   :  { %v184_v1 = vmul.f32 %v3902_v0, %v3902_v0 }
 0x130   :  { %v200_v2 = vsel %vm141_vm1, %v184_v1, 0.0 }
 0x131   :  { %201 = vadd.xlane.f32.xlu2 %v200_v2 }
 0x17c   :  { %v187_v4 = vpop.xlane.xlu0 %186 }
 0x17d   :  { %v203_v5 = vmul.f32 %v187_v4, %v3863_v36 }
 0x17f   :  { %v209_v7 = vadd.f32 1e-12, %v203_v5 }
 0x181   :  { %3484 = vrsqrt.f32 %v209_v7  ;;  %vm221_vm4 = vweird.f32 %v209_v7 }
 0x184   :  { %v190_v9 = vpop.xlane.xlu1 %189 }
 0x185   :  { %v204_v10 = vmul.f32 %v190_v9, %v3863_v36 }
 0x187   :  { %v3485_v11 = vpop.eup %3484  ;;  %v210_v13 = vadd.f32 1e-12, %v204_v10 }
 0x188   :  { %v216_v14 = vmul.f32 %v3485_v11, %v209_v7  ;;  %vm222_vm3 = vweird.f32 %v3485_v11 }
 0x189   :  { %3486 = vrsqrt.f32 %v210_v13  ;;  %vm223_vm5 = vmor %vm221_vm4, %vm222_vm3  ;;  %vm231_vm7 = vweird.f32 %v210_v13 }
 0x18a   :  { %v217_v15 = vmul.f32 %v3485_v11, %v216_v14 }
 0x18c   :  { %v218_v17 = vmul.f32 0.5, %v217_v15  ;;  %v193_v18 = vpop.xlane.xlu2 %192 }
 0x18d   :  { %v205_v19 = vmul.f32 %v193_v18, %v3863_v36 }
 0x18e   :  { %v219_v21 = vsub.f32 1.5, %v218_v17 }
 0x18f   :  { %v3487_v22 = vpop.eup %3486  ;;  %v211_v23 = vadd.f32 1e-12, %v205_v19 }
 0x190   :  { %v220_v25 = vmul.f32 %v3485_v11, %v219_v21  ;;  %v226_v26 = vmul.f32 %v3487_v22, %v210_v13  ;;  %vm232_vm6 = vweird.f32 %v3487_v22 }
 0x191   :  { %3488 = vrsqrt.f32 %v211_v23  ;;  %vm233_vm8 = vmor %vm231_vm7, %vm232_vm6  ;;  %vm241_vm10 = vweird.f32 %v211_v23  ;;  %vm379_vm7 = vcmask 130048  }
 0x192   :  { %v227_v27 = vmul.f32 %v3487_v22, %v226_v26  ;;  %v224_v29 = vsel %vm223_vm5, %v3485_v11, %v220_v25 }
 0x193   :  { %v275_v37 = vmul.f32 %v224_v29, %v3867_v39 }
 0x194   :  { %v228_v30 = vmul.f32 0.5, %v227_v27  ;;  %v196_v31 = vpop.xlane.xlu0 %195 }
 0x195   :  { %v206_v33 = vmul.f32 %v196_v31, %v3863_v36  ;;  %v282_v47 = vmul.f32 %v3924_v40, %v275_v37 }
 0x196   :  { %v229_v34 = vsub.f32 1.5, %v228_v30 }
 0x197   :  { %v3489_v35 = vpop.eup %3488  ;;  %v212_v38 = vadd.f32 1e-12, %v206_v33  ;;  %v289_v57 = vadd.f32 %v3929_v48, %v282_v47  ;;  %v302_v47 = vperm.slane %v3919_v32, 2 }
 0x198   :  { %v230_v41 = vmul.f32 %v3487_v22, %v229_v34  ;;  %v236_v42 = vmul.f32 %v3489_v35, %v211_v23  ;;  %vm242_vm9 = vweird.f32 %v3489_v35 }
 0x199   :  { %3490 = vrsqrt.f32 %v212_v38  ;;  %vm243_vm11 = vmor %vm241_vm10, %vm242_vm9  ;;  %vm251_vm13 = vweird.f32 %v212_v38 }
 0x19a   :  { %v234_v43 = vsel %vm233_vm8, %v3487_v22, %v230_v41  ;;  %v237_v45 = vmul.f32 %v3489_v35, %v236_v42 }
 0x19b   :  { %v276_v46 = vmul.f32 %v234_v43, %v3874_v44 }
 0x19c   :  { %v238_v50 = vmul.f32 0.5, %v237_v45  ;;  %v199_v39 = vpop.xlane.xlu1 %198 }
 0x19d   :  { %v207_v51 = vmul.f32 %v199_v39, %v3863_v36  ;;  %v283_v52 = vmul.f32 %v3924_v40, %v276_v46 }
 0x19e   :  { %v239_v53 = vsub.f32 1.5, %v238_v50 }
 0x19f   :  { %v3491_v55 = vpop.eup %3490  ;;  %v213_v56 = vadd.f32 1e-12, %v207_v51  ;;  %v290_v58 = vadd.f32 %v3929_v48, %v283_v52 }
 0x1a0   :  { %v240_v60 = vmul.f32 %v3489_v35, %v239_v53  ;;  %v246_v44 = vmul.f32 %v3491_v55, %v212_v38  ;;  %vm252_vm12 = vweird.f32 %v3491_v55 }
 0x1a1   :  { %3492 = vrsqrt.f32 %v213_v56  ;;  %v295_v61 = vpack.c.bf16 %v290_v58, %v289_v57  ;;  %vm253_vm14 = vmor %vm251_vm13, %vm252_vm12  ;;  %vm261_vm2 = vweird.f32 %v213_v56 }
 0x1a2   :  { %v247_v62 = vmul.f32 %v3491_v55, %v246_v44  ;;  %v244_v63 = vsel %vm243_vm11, %v3489_v35, %v240_v60 }
 0x1a3   :  { %3033 = vmatmul.msk.bf16.vlgmr.msra.gmra.mxu1 %vm141_vm1, %v295_v61  ;;  %v277_v6 = vmul.f32 %v244_v63, %v3881_v49 }
 0x1a4   :  { %v248_v1 = vmul.f32 0.5, %v247_v62  ;;  %v202_v2 = vpop.xlane.xlu2 %201 }
 0x1a5   :  { %v208_v3 = vmul.f32 %v202_v2, %v3863_v36  ;;  %v284_v15 = vmul.f32 %v3924_v40, %v277_v6 }
 0x1a6   :  { %v249_v4 = vsub.f32 1.5, %v248_v1 }
 0x1a7   :  { %v3493_v5 = vpop.eup %3492  ;;  %v214_v7 = vadd.f32 1e-12, %v208_v3  ;;  %v291_v22 = vadd.f32 %v3929_v48, %v284_v15 }
 0x1a8   :  { %v250_v9 = vmul.f32 %v3491_v55, %v249_v4  ;;  %v256_v10 = vmul.f32 %v3493_v5, %v213_v56  ;;  %vm262_vm15 = vweird.f32 %v3493_v5 }
 0x1a9   :  { %3494 = vrsqrt.f32 %v214_v7  ;;  %vm263_vm3 = vmor %vm261_vm2, %vm262_vm15  ;;  %vm271_vm5 = vweird.f32 %v214_v7 }
 0x1aa   :  { %v254_v11 = vsel %vm253_vm14, %v3491_v55, %v250_v9  ;;  %v257_v13 = vmul.f32 %v3493_v5, %v256_v10 }
 0x1ab   :  { %v278_v14 = vmul.f32 %v254_v11, %v3888_v54 }
 0x1ac   :  { %v258_v17 = vmul.f32 0.5, %v257_v13 }
 0x1ad   :  { %v285_v18 = vmul.f32 %v3924_v40, %v278_v14 }
 0x1ae   :  { %v259_v19 = vsub.f32 1.5, %v258_v17 }
 0x1af   :  { %v3495_v21 = vpop.eup %3494  ;;  %v292_v49 = vadd.f32 %v3929_v48, %v285_v18 }
 0x1b0   :  { %v260_v23 = vmul.f32 %v3493_v5, %v259_v19  ;;  %v266_v25 = vmul.f32 %v3495_v21, %v214_v7  ;;  %vm272_vm4 = vweird.f32 %v3495_v21 }
 0x1b1   :  { %v296_v26 = vpack.c.bf16 %v292_v49, %v291_v22  ;;  %vm273_vm6 = vmor %vm271_vm5, %vm272_vm4 }
 0x1b2   :  { %v267_v27 = vmul.f32 %v3495_v21, %v266_v25  ;;  %v264_v54 = vsel %vm263_vm3, %v3493_v5, %v260_v23 }
 0x1b3   :  { %3034 = vmatmul.msk.bf16.gmra.mxu1 %vm141_vm1, %v296_v26  ;;  %v279_v31 = vmul.f32 %v264_v54, %v3895_v59 }
 0x1b4   :  { %v268_v29 = vmul.f32 0.5, %v267_v27 }
 0x1b5   :  { %v286_v37 = vmul.f32 %v3924_v40, %v279_v31 }
 0x1b6   :  { %v269_v30 = vsub.f32 1.5, %v268_v29 }
 0x1b7   :  { %v293_v41 = vadd.f32 %v3929_v48, %v286_v37 }
 0x1b8   :  { %v270_v33 = vmul.f32 %v3495_v21, %v269_v30  ;;  %v134_v30 = vld [vmem:[%s5054_s3] sm:$0xff] }
 0x1ba   :  { %v274_v34 = vsel %vm273_vm6, %v3495_v21, %v270_v33 }
 0x1bb   :  { %v280_v35 = vmul.f32 %v274_v34, %v3902_v0 }
 0x1bd   :  { %v287_v38 = vmul.f32 %v3924_v40, %v280_v35 }
 0x1bf   :  { %v294_v42 = vadd.f32 %v3929_v48, %v287_v38 }
 0x1c1   :  { %v297_v43 = vpack.c.bf16 %v294_v42, %v293_v41 }
 0x1c3   :  { %3035 = vmatmul.msk.bf16.gmra.mxu1 %vm141_vm1, %v297_v43 }
 0x220   :  { %v333_v45 = vpop.f32.mrf.mxu1 }
 0x221   :  { %v334_v55 = vadd.f32 %v333_v45, %v302_v47 }
 0x223   :  { %v348_v60 = vpack.c.bf16 %v334_v55, %v334_v55  ;;  %v136_v55 = vld [vmem:[%s5054_s3 + $0x10] sm:$0xff] }
 0x225   :  { %v364_v61 = vunpack.c.l.b16 %v348_v60 }
 0x228   :  { %v335_v46 = vpop.f32.mrf.mxu1 }
 0x229   :  { %v336_v52 = vadd.f32 %v335_v46, %v302_v47  ;;  %v135_v46 = vld [vmem:[%s5054_s3 + $0x8] sm:$0xff] }
 0x22b   :  { %v349_v57 = vpack.c.bf16 %v336_v52, %v336_v52 }
 0x22d   :  { %v365_v44 = vunpack.c.l.b16 %v349_v57 }
 0x22f   :  { %v3956_v63 = vpack.c.b16 %v365_v44, %v364_v61 }
 0x230   :  { %v338_v59 = vpop.f32.mrf.mxu1 }
 0x231   :  { %v339_v50 = vadd.f32 %v338_v59, %v302_v47 }
 0x233   :  { %v350_v51 = vpack.c.bf16 %v339_v50, %v339_v50 }
 0x235   :  { %v366_v40 = vunpack.c.l.b16 %v350_v51 }
 0x238   :  { %v340_v39 = vpop.f32.mrf.mxu1 }
 0x239   :  { %v341_v0 = vadd.f32 %v340_v39, %v302_v47 }
 0x23b   :  { %v351_v53 = vpack.c.bf16 %v341_v0, %v341_v0 }
 0x23d   :  { %v367_v56 = vunpack.c.l.b16 %v351_v53 }
 0x23f   :  { %v3952_v58 = vpack.c.b16 %v367_v56, %v366_v40 }
 0x240   :  { %v343_v48 = vpop.f32.mrf.mxu1 }
 0x241   :  { %375 = vrot.lane.b32.xlu1 %v3952_v58, %s3719_s24  ;;  %v344_v62 = vadd.f32 %v343_v48, %v302_v47 }
 0x243   :  { %v352_v2 = vpack.c.bf16 %v344_v62, %v344_v62  ;;  %v137_v62 = vld [vmem:[%s5054_s3 + $0x18] sm:$0xff] }
 0x245   :  { %v368_v5 = vunpack.c.l.b16 %v352_v2 }
 0x248   :  { %v345_v1 = vpop.f32.mrf.mxu1 }
 0x249   :  { %v346_v3 = vadd.f32 %v345_v1, %v302_v47  ;;  %554 = vrot.lane.b32.xlu1 %v3956_v63, %s3720_s1 }
 0x24b   :  { %v353_v4 = vpack.c.bf16 %v346_v3, %v346_v3 }
 0x24d   :  { %v369_v6 = vunpack.c.l.b16 %v353_v4 }
 0x24f   :  { %v3960_v7 = vpack.c.b16 %v369_v6, %v368_v5 }
 0x251   :  { %558 = vrot.lane.b32.xlu2 %v3960_v7, %s3720_s1  ;;  %377 = vrot.lane.b32.xlu0 %v3960_v7, %s3719_s24 }
 0x252   :  { %552 = vrot.lane.b32.xlu1 %v3960_v7, %s3721_s25 }
 0x259   :  { %373 = vrot.lane.b32.xlu0 %v3956_v63, %s3719_s24  ;;  %556 = vrot.lane.b32.xlu2 %v3952_v58, %s3720_s1 }
 0x25a   :  { %507 = vrot.lane.b32.xlu1 %v3960_v7, %s3722_s26 }
 0x261   :  { %548 = vrot.lane.b32.xlu0 %v3956_v63, %s3721_s25  ;;  %550 = vrot.lane.b32.xlu2 %v3952_v58, %s3721_s25 }
 0x269   :  { %505 = vrot.lane.b32.xlu0 %v3952_v58, %s3722_s26 }
 0x2ab   :  { %v559_v9 = vpop.permute.xlu2 %558 }
 0x2ac   :  { %v576_v10 = vsel %vm379_vm7, %v559_v9, 0 }
 0x2ad   :  { %583 = vmatpush.bf16.xpose.msrb.mxu1 %v576_v10 }
 0x2b3   :  { %v557_v11 = vpop.permute.xlu2 %556  ;;  %v376_v13 = vpop.permute.xlu1 %375 }
 0x2b4   :  { %v573_v14 = vsel %vm379_vm7, %v557_v11, 0  ;;  %v393_v23 = vsel %vm379_vm7, %v376_v13, 0  ;;  %v138_v11 = vld [vmem:[%s5054_s3 + $0x20] sm:$0xff] }
 0x2b5   :  { %584 = vmatpush.bf16.xpose.msrb.mxu1 %v573_v14 }
 0x2bb   :  { %v555_v15 = vpop.permute.xlu1 %554  ;;  %v551_v54 = vpop.permute.xlu2 %550 }
 0x2bc   :  { %v570_v17 = vsel %vm379_vm7, %v555_v15, 0 }
 0x2bd   :  { %585 = vmatpush.bf16.xpose.msrb.mxu1 %v570_v17 }
 0x2c3   :  { %v378_v18 = vpop.permute.xlu0 %377 }
 0x2c4   :  { %v553_v19 = vpop.permute.xlu1 %552  ;;  %v396_v21 = vsel %vm379_vm7, %v378_v18, 0 }
 0x2c5   :  { %403 = vmatpush.bf16.xpose.msra.mxu2 %v396_v21 }
 0x2cb   :  { %v374_v22 = vpop.permute.xlu0 %373 }
 0x2cc   :  { %v508_v49 = vpop.permute.xlu1 %507  ;;  %v390_v26 = vsel %vm379_vm7, %v374_v22, 0 }
 0x2cd   :  { %526 = vmatpush.bf16.msra.mxu3 %v508_v49  ;;  %404 = vmatpush.bf16.xpose.msra.mxu2 %v393_v23  ;;  %v139_v49 = vld [vmem:[%s5054_s3 + $0x28] sm:$0xff] }
 0x2d3   :  { %v549_v25 = vpop.permute.xlu0 %548 }
 0x2d4   :  { %3042 = vmatmul.msk.bf16.vlgmr.msrb.gmra.mxu1 %vm379_vm7, %v549_v25 }
 0x2d5   :  { %405 = vmatpush.bf16.xpose.msra.mxu2 %v390_v26 }
 0x2db   :  { %v506_v27 = vpop.permute.xlu0 %505 }
 0x2dc   :  { %3036 = vmatmul.msk.bf16.vlgmr.msra.gmra.mxu2 %vm379_vm7, %v3956_v63  ;;  %527 = vmatpush.bf16.msra.mxu3 %v506_v27 }
 0x2e4   :  { %3043 = vmatmul.msk.bf16.gmra.mxu1 %vm379_vm7, %v551_v54 }
 0x2ec   :  { %3037 = vmatmul.msk.bf16.gmra.mxu2 %vm379_vm7, %v3952_v58 }
 0x2f4   :  { %3044 = vmatmul.msk.bf16.gmra.mxu1 %vm379_vm7, %v553_v19 }
 0x2fc   :  { %3038 = vmatmul.msk.bf16.gmra.mxu2 %vm379_vm7, %v3960_v7 }
 0x351   :  { %v587_v29 = vpop.f32.mrf.mxu1 }
 0x352   :  { %v602_v31 = vmul.f32 0.25, %v587_v29 }
 0x354   :  { %v3998_v33 = vadd.f32 %v602_v31, %v134_v30 }
 0x356   :  { %v614_v34 = vsel %vm100_vm0, %v3998_v33, -inf }
 0x357   :  { %615 = vmax.xlane.f32.xlu1 %v614_v34 }
 0x359   :  { %v589_v35 = vpop.f32.mrf.mxu1 }
 0x35a   :  { %v603_v43 = vmul.f32 0.25, %v589_v35 }
 0x35c   :  { %v4009_v50 = vadd.f32 %v603_v43, %v135_v46 }
 0x35e   :  { %v617_v52 = vsel %vm100_vm0, %v4009_v50, -inf }
 0x35f   :  { %v407_v37 = vpop.f32.mrf.mxu2 }
 0x360   :  { %v422_v38 = vmul.f32 0.25, %v407_v37 }
 0x361   :  { %v592_v42 = vpop.f32.mrf.mxu1 }
 0x362   :  { %v4002_v41 = vadd.f32 %v422_v38, %v134_v30  ;;  %v604_v51 = vmul.f32 0.25, %v592_v42 }
 0x364   :  { %v434_v45 = vsel %vm100_vm0, %v4002_v41, -inf  ;;  %v4020_v57 = vadd.f32 %v604_v51, %v136_v55 }
 0x365   :  { %435 = vmax.xlane.f32.xlu0 %v434_v45 }
 0x366   :  { %v620_v61 = vsel %vm100_vm0, %v4020_v57, -inf }
 0x367   :  { %v409_v59 = vpop.f32.mrf.mxu2 }
 0x368   :  { %v423_v47 = vmul.f32 0.25, %v409_v59 }
 0x369   :  { %v594_v53 = vpop.f32.mrf.mxu1 }
 0x36a   :  { %v4011_v39 = vadd.f32 %v423_v47, %v135_v46  ;;  %v605_v60 = vmul.f32 0.25, %v594_v53 }
 0x36c   :  { %v437_v0 = vsel %vm100_vm0, %v4011_v39, -inf  ;;  %v611_v4 = vadd.f32 %v605_v60, %v137_v62 }
 0x36d   :  { %438 = vmax.xlane.f32.xlu2 %v437_v0  ;;  %618 = vmax.xlane.f32.xlu0 %v617_v52 }
 0x36e   :  { %v623_v10 = vsel %vm100_vm0, %v611_v4, -inf }
 0x36f   :  { %v412_v40 = vpop.f32.mrf.mxu2 }
 0x370   :  { %v424_v56 = vmul.f32 0.25, %v412_v40 }
 0x371   :  { %v597_v1 = vpop.f32.mrf.mxu1 }
 0x372   :  { %v430_v48 = vadd.f32 %v424_v56, %v136_v55  ;;  %v606_v6 = vmul.f32 0.25, %v597_v1 }
 0x374   :  { %v440_v44 = vsel %vm100_vm0, %v430_v48, -inf  ;;  %v4036_v15 = vadd.f32 %v606_v6, %v138_v11 }
 0x375   :  { %441 = vmax.xlane.f32.xlu2 %v440_v44  ;;  %621 = vmax.xlane.f32.xlu0 %v620_v61 }
 0x376   :  { %v626_v22 = vsel %vm100_vm0, %v4036_v15, -inf }
 0x377   :  { %v414_v2 = vpop.f32.mrf.mxu2 }
 0x378   :  { %v425_v3 = vmul.f32 0.25, %v414_v2 }
 0x379   :  { %v599_v17 = vpop.f32.mrf.mxu1 }
 0x37a   :  { %v4028_v5 = vadd.f32 %v425_v3, %v137_v62  ;;  %v607_v19 = vmul.f32 0.25, %v599_v17 }
 0x37c   :  { %v443_v9 = vsel %vm100_vm0, %v4028_v5, -inf  ;;  %v4047_v26 = vadd.f32 %v607_v19, %v139_v49 }
 0x37d   :  { %444 = vmax.xlane.f32.xlu1 %v443_v9  ;;  %624 = vmax.xlane.f32.xlu2 %v623_v10 }
 0x37e   :  { %v629_v29 = vsel %vm100_vm0, %v4047_v26, -inf }
 0x37f   :  { %v417_v13 = vpop.f32.mrf.mxu2 }
 0x380   :  { %v426_v14 = vmul.f32 0.25, %v417_v13 }
 0x382   :  { %v4038_v18 = vadd.f32 %v426_v14, %v138_v11 }
 0x384   :  { %v446_v21 = vsel %vm100_vm0, %v4038_v18, -inf }
 0x385   :  { %447 = vmax.xlane.f32.xlu1 %v446_v21  ;;  %627 = vmax.xlane.f32.xlu2 %v626_v22 }
 0x387   :  { %v419_v23 = vpop.f32.mrf.mxu2 }
 0x388   :  { %v427_v25 = vmul.f32 0.25, %v419_v23 }
 0x38a   :  { %v433_v27 = vadd.f32 %v427_v25, %v139_v49 }
 0x38c   :  { %v449_v54 = vsel %vm100_vm0, %v433_v27, -inf }
 0x38d   :  { %450 = vmax.xlane.f32.xlu0 %v449_v54  ;;  %630 = vmax.xlane.f32.xlu1 %v629_v29 }
 0x3a6   :  { %685 = vrot.lane.b32.xlu1 %v3952_v58, %s3723_s21 }
 0x3ca   :  { %v616_v30 = vpop.xlane.xlu1 %615 }
 0x3cb   :  { %v632_v31 = vsub.f32 %v3998_v33, %v616_v30 }
 0x3cd   :  { %v638_v34 = vmul.f32 1.442695, %v632_v31 }
 0x3cf   :  { %3496 = vpow2.f32 %v638_v34 }
 0x3d5   :  { %v4055_v35 = vpop.eup %3496 }
 0x3d6   :  { %v650_v37 = vsel %vm100_vm0, %v4055_v35, 0.0 }
 0x3d7   :  { %651 = vadd.xlane.f32.xlu2 %v650_v37 }
 0x3d8   :  { %v436_v38 = vpop.xlane.xlu0 %435 }
 0x3d9   :  { %v452_v42 = vsub.f32 %v4002_v41, %v436_v38 }
 0x3db   :  { %v458_v43 = vmul.f32 1.442695, %v452_v42 }
 0x3dd   :  { %3498 = vpow2.f32 %v458_v43 }
 0x3e0   :  { %v439_v45 = vpop.xlane.xlu2 %438  ;;  %v619_v46 = vpop.xlane.xlu0 %618 }
 0x3e1   :  { %v633_v58 = vsub.f32 %v4009_v50, %v619_v46  ;;  %v453_v47 = vsub.f32 %v4011_v39, %v439_v45 }
 0x3e3   :  { %v4061_v59 = vpop.eup %3498  ;;  %v640_v33 = vmul.f32 1.442695, %v633_v58  ;;  %v460_v0 = vmul.f32 1.442695, %v453_v47 }
 0x3e4   :  { %v470_v51 = vsel %vm100_vm0, %v4061_v59, 0.0 }
 0x3e5   :  { %471 = vadd.xlane.f32.xlu0 %v470_v51  ;;  %3500 = vpow2.f32 %v640_v33 }
 0x3e6   :  { %3502 = vpow2.f32 %v460_v0 }
 0x3e8   :  { %v442_v52 = vpop.xlane.xlu2 %441  ;;  %v622_v62 = vpop.xlane.xlu0 %621 }
 0x3e9   :  { %v454_v53 = vsub.f32 %v430_v48, %v442_v52 }
 0x3eb   :  { %v462_v41 = vmul.f32 1.442695, %v454_v53  ;;  %v4066_v55 = vpop.eup %3500 }
 0x3ec   :  { %v653_v50 = vsel %vm100_vm0, %v4066_v55, 0.0  ;;  %v4070_v39 = vpop.eup %3502 }
 0x3ed   :  { %3504 = vpow2.f32 %v462_v41  ;;  %654 = vadd.xlane.f32.xlu2 %v653_v50  ;;  %v473_v48 = vsel %vm100_vm0, %v4070_v39, 0.0 }
 0x3f0   :  { %v625_v40 = vpop.xlane.xlu2 %624  ;;  %v445_v11 = vpop.xlane.xlu1 %444 }
 0x3f1   :  { %v635_v56 = vsub.f32 %v611_v4, %v625_v40  ;;  %v455_v13 = vsub.f32 %v4028_v5, %v445_v11 }
 0x3f3   :  { %v4072_v60 = vpop.eup %3504  ;;  %v644_v44 = vmul.f32 1.442695, %v635_v56  ;;  %v464_v17 = vmul.f32 1.442695, %v455_v13 }
 0x3f4   :  { %v476_v61 = vsel %vm100_vm0, %v4072_v60, 0.0 }
 0x3f5   :  { %3506 = vpow2.f32 %v644_v44  ;;  %477 = vadd.xlane.f32.xlu1 %v476_v61  ;;  %474 = vadd.xlane.f32.xlu2 %v473_v48 }
 0x3f8   :  { %v448_v14 = vpop.xlane.xlu1 %447 }
 0x3f9   :  { %503 = vrot.lane.b32.xlu0 %v3956_v63, %s3722_s26  ;;  %v456_v19 = vsub.f32 %v4038_v18, %v448_v14 }
 0x3fb   :  { %v4080_v1 = vpop.eup %3506  ;;  %v466_v21 = vmul.f32 1.442695, %v456_v19 }
 0x3fc   :  { %v659_v2 = vsel %vm100_vm0, %v4080_v1, 0.0 }
 0x3fd   :  { %660 = vadd.xlane.f32.xlu1 %v659_v2 }
 0x400   :  { %v451_v3 = vpop.xlane.xlu0 %450  ;;  %v631_v22 = vpop.xlane.xlu1 %630 }
 0x401   :  { %v457_v4 = vsub.f32 %v433_v27, %v451_v3  ;;  %683 = vrot.lane.b32.xlu0 %v3956_v63, %s3723_s21  ;;  %v634_v63 = vsub.f32 %v4020_v57, %v622_v62  ;;  %v637_v25 = vsub.f32 %v4047_v26, %v631_v22  ;;  %v628_v27 = vpop.xlane.xlu2 %627 }
 0x402   :  { %v636_v5 = vsub.f32 %v4036_v15, %v628_v27 }
 0x403   :  { %v468_v6 = vmul.f32 1.442695, %v457_v4  ;;  %v642_v23 = vmul.f32 1.442695, %v634_v63  ;;  %v648_v54 = vmul.f32 1.442695, %v637_v25 }
 0x404   :  { %v646_v18 = vmul.f32 1.442695, %v636_v5 }
 0x405   :  { %3508 = vpow2.f32 %v468_v6 }
 0x406   :  { %3510 = vpow2.f32 %v464_v17 }
 0x407   :  { %3512 = vpow2.f32 %v466_v21 }
 0x408   :  { %3514 = vpow2.f32 %v642_v23 }
 0x409   :  { %3516 = vpow2.f32 %v648_v54 }
 0x40a   :  { %3518 = vpow2.f32 %v646_v18 }
 0x40b   :  { %v4086_v9 = vpop.eup %3508 }
 0x40c   :  { %v485_v10 = vsel %vm100_vm0, %v4086_v9, 0.0  ;;  %v3511_v49 = vpop.eup %3510 }
 0x40d   :  { %486 = vadd.xlane.f32.xlu1 %v485_v10  ;;  %687 = vrot.lane.b32.xlu2 %v3960_v7, %s3723_s21  ;;  %v479_v7 = vsel %vm100_vm0, %v3511_v49, 0.0  ;;  %v4098_v29 = vpop.eup %3512 }
 0x40e   :  { %v482_v57 = vsel %vm100_vm0, %v4098_v29, 0.0  ;;  %v3515_v30 = vpop.eup %3514 }
 0x40f   :  { %v656_v26 = vsel %vm100_vm0, %v3515_v30, 0.0  ;;  %v4103_v31 = vpop.eup %3516 }
 0x410   :  { %v665_v34 = vsel %vm100_vm0, %v4103_v31, 0.0  ;;  %v4107_v15 = vpop.eup %3518 }
 0x411   :  { %v662_v37 = vsel %vm100_vm0, %v4107_v15, 0.0 }
 0x418   :  { %v686_v41 = vpop.permute.xlu1 %685 }
 0x42b   :  { %480 = vadd.xlane.f32.xlu0 %v479_v7 }
 0x433   :  { %483 = vadd.xlane.f32.xlu0 %v482_v57 }
 0x436   :  { %657 = vadd.xlane.f32.xlu2 %v656_v26 }
 0x43b   :  { %666 = vadd.xlane.f32.xlu0 %v665_v34 }
 0x43e   :  { %663 = vadd.xlane.f32.xlu2 %v662_v37 }
 0x44a   :  { %v652_v38 = vpop.xlane.xlu2 %651 }
 0x458   :  { %v472_v43 = vpop.xlane.xlu0 %471 }
 0x459   :  { %3520 = vrcp.f32 %v472_v43 }
 0x45f   :  { %v3521_v58 = vpop.eup %3520 }
 0x460   :  { %v655_v42 = vpop.xlane.xlu2 %654  ;;  %v494_v51 = vmul.f32 %v3521_v58, %v4061_v59 }
 0x468   :  { %v475_v45 = vpop.xlane.xlu2 %474  ;;  %v478_v59 = vpop.xlane.xlu1 %477 }
 0x469   :  { %3522 = vrcp.f32 %v475_v45 }
 0x46a   :  { %3524 = vrcp.f32 %v655_v42 }
 0x46b   :  { %v504_v46 = vpop.permute.xlu0 %503  ;;  %3526 = vrcp.f32 %v652_v38 }
 0x46c   :  { %528 = vmatpush.bf16.msra.mxu3 %v504_v46  ;;  %3528 = vrcp.f32 %v478_v59 }
 0x46f   :  { %v3523_v33 = vpop.eup %3522 }
 0x470   :  { %v688_v47 = vpop.permute.xlu2 %687  ;;  %v495_v0 = vmul.f32 %v3523_v33, %v4070_v39  ;;  %v3525_v53 = vpop.eup %3524 }
 0x471   :  { %706 = vmatpush.bf16.msrb.mxu0 %v688_v47  ;;  %v3527_v50 = vpop.eup %3526  ;;  %v675_v40 = vmul.f32 %v3525_v53, %v4066_v55  ;;  %v661_v48 = vpop.xlane.xlu1 %660  ;;  %v806_v53 = vperm.slane %v3919_v32, 3 }
 0x472   :  { %v500_v52 = vpack.c.bf16 %v495_v0, %v494_v51  ;;  %v674_v56 = vmul.f32 %v3527_v50, %v4055_v35  ;;  %v3529_v62 = vpop.eup %3528 }
 0x473   :  { %v684_v44 = vpop.permute.xlu0 %683  ;;  %v496_v3 = vmul.f32 %v3529_v62, %v4072_v60 }
 0x474   :  { %3039 = vmatmul.msk.bf16.vlgmr.msra.gmra.mxu3 %vm100_vm0, %v500_v52  ;;  %v680_v61 = vpack.c.bf16 %v675_v40, %v674_v56 }
 0x475   :  { %707 = vmatpush.bf16.msrb.mxu0 %v686_v41 }
 0x479   :  { %708 = vmatpush.bf16.msrb.mxu0 %v684_v44 }
 0x47c   :  { %3045 = vmatmul.msk.bf16.vlgmr.msrb.gmra.mxu0 %vm100_vm0, %v680_v61 }
 0x480   :  { %v487_v55 = vpop.xlane.xlu1 %486 }
 0x49e   :  { %v481_v39 = vpop.xlane.xlu0 %480 }
 0x49f   :  { %3530 = vrcp.f32 %v481_v39 }
 0x4a0   :  { %3532 = vrcp.f32 %v661_v48 }
 0x4a5   :  { %v3531_v2 = vpop.eup %3530 }
 0x4a6   :  { %v497_v4 = vmul.f32 %v3531_v2, %v3511_v49  ;;  %v484_v6 = vpop.xlane.xlu0 %483  ;;  %v3533_v11 = vpop.eup %3532 }
 0x4a7   :  { %3534 = vrcp.f32 %v484_v6  ;;  %v677_v19 = vmul.f32 %v3533_v11, %v4080_v1 }
 0x4a8   :  { %v501_v10 = vpack.c.bf16 %v497_v4, %v496_v3 }
 0x4a9   :  { %v658_v35 = vpop.xlane.xlu2 %657 }
 0x4aa   :  { %3040 = vmatmul.msk.bf16.gmra.mxu3 %vm100_vm0, %v501_v10  ;;  %3536 = vrcp.f32 %v658_v35 }
 0x4ab   :  { %3538 = vrcp.f32 %v487_v55 }
 0x4ad   :  { %v3535_v13 = vpop.eup %3534 }
 0x4ae   :  { %v498_v22 = vmul.f32 %v3535_v13, %v4098_v29  ;;  %v667_v49 = vpop.xlane.xlu0 %666  ;;  %v3407_v29 = vld [vmem:[%s5057_s6] sm:$0xff] }
 0x4af   :  { %789 = vmatpush.bf16.msrb.mxu2 %v3407_v29 }
 0x4b0   :  { %v3537_v14 = vpop.eup %3536 }
 0x4b1   :  { %v676_v17 = vmul.f32 %v3537_v14, %v3515_v30  ;;  %v3539_v63 = vpop.eup %3538  ;;  %v664_v21 = vpop.xlane.xlu2 %663 }
 0x4b2   :  { %v499_v23 = vmul.f32 %v3539_v63, %v4086_v9  ;;  %3540 = vrcp.f32 %v664_v21  ;;  %v3408_v9 = vld [vmem:[%s5057_s6 + $0x8] sm:$0xff] }
 0x4b3   :  { %v681_v60 = vpack.c.bf16 %v677_v19, %v676_v17  ;;  %3542 = vrcp.f32 %v667_v49  ;;  %750 = vmatpush.bf16.msrb.mxu3 %v3408_v9 }
 0x4b4   :  { %v502_v25 = vpack.c.bf16 %v499_v23, %v498_v22 }
 0x4b5   :  { %3046 = vmatmul.msk.bf16.gmra.mxu0 %vm100_vm0, %v681_v60 }
 0x4b8   :  { %v3541_v27 = vpop.eup %3540 }
 0x4b9   :  { %v3543_v7 = vpop.eup %3542  ;;  %v678_v5 = vmul.f32 %v3541_v27, %v4107_v15 }
 0x4ba   :  { %3041 = vmatmul.msk.bf16.gmra.mxu3 %vm100_vm0, %v502_v25  ;;  %v679_v1 = vmul.f32 %v3543_v7, %v4103_v31 }
 0x4bc   :  { %v682_v54 = vpack.c.bf16 %v679_v1, %v678_v5 }
 0x4c5   :  { %3047 = vmatmul.msk.bf16.gmra.mxu0 %vm100_vm0, %v682_v54 }
 0x4f7   :  { %v530_v18 = vpop.f32.mrf.mxu3 }
 0x4f9   :  { %v710_v57 = vpop.f32.mrf.mxu0 }
 0x4ff   :  { %v532_v30 = vpop.f32.mrf.mxu3 }
 0x500   :  { %v545_v26 = vpack.c.bf16 %v532_v30, %v530_v18 }
 0x501   :  { %v712_v34 = vpop.f32.mrf.mxu0 }
 0x502   :  { %v725_v15 = vpack.c.bf16 %v712_v34, %v710_v57  ;;  %3059 = vmatmul.msk.bf16.vlgmr.msrb.gmra.mxu2 %vm379_vm7, %v545_v26 }
 0x504   :  { %3052 = vmatmul.msk.bf16.vlgmr.msrb.gmra.mxu3 %vm379_vm7, %v725_v15 }
 0x52d   :  { %v535_v31 = vpop.f32.mrf.mxu3 }
 0x532   :  { %v715_v37 = vpop.f32.mrf.mxu0 }
 0x535   :  { %v537_v38 = vpop.f32.mrf.mxu3 }
 0x536   :  { %v546_v42 = vpack.c.bf16 %v537_v38, %v535_v31 }
 0x538   :  { %3060 = vmatmul.msk.bf16.gmra.mxu2 %vm379_vm7, %v546_v42 }
 0x53a   :  { %v717_v43 = vpop.f32.mrf.mxu0 }
 0x53b   :  { %v726_v45 = vpack.c.bf16 %v717_v43, %v715_v37 }
 0x53d   :  { %v540_v46 = vpop.f32.mrf.mxu3  ;;  %3053 = vmatmul.msk.bf16.gmra.mxu3 %vm379_vm7, %v726_v45 }
 0x542   :  { %v720_v58 = vpop.f32.mrf.mxu0 }
 0x545   :  { %v542_v33 = vpop.f32.mrf.mxu3 }
 0x546   :  { %v547_v47 = vpack.c.bf16 %v542_v33, %v540_v46 }
 0x548   :  { %3061 = vmatmul.msk.bf16.gmra.mxu2 %vm379_vm7, %v547_v47 }
 0x54a   :  { %v722_v51 = vpop.f32.mrf.mxu0 }
 0x54b   :  { %v727_v0 = vpack.c.bf16 %v722_v51, %v720_v58 }
 0x54d   :  { %3054 = vmatmul.msk.bf16.gmra.mxu3 %vm379_vm7, %v727_v0 }
 0x585   :  { %v791_v52 = vpop.f32.mrf.mxu2 }
 0x587   :  { %v752_v41 = vpop.f32.mrf.mxu3 }
 0x588   :  { %v792_v50 = vadd.f32 %v791_v52, %v752_v41 }
 0x58a   :  { %v807_v40 = vadd.f32 %v806_v53, %v792_v50 }
 0x58c   :  { %v4141_v56 = vadd.f32 %v807_v40, %v3824_v8  ;;  %v3410_v40 = vld [vmem:[%s5058_s7 + $0x8] sm:$0xff] }
 0x58d   :  { %v793_v61 = vpop.f32.mrf.mxu2  ;;  %1000 = vmatpush.bf16.msra.mxu1 %v3410_v40 }
 0x58e   :  { %v819_v44 = vsel %vm141_vm1, %v4141_v56, 0.0 }
 0x58f   :  { %820 = vadd.xlane.f32.xlu1 %v819_v44  ;;  %v754_v59 = vpop.f32.mrf.mxu3 }
 0x590   :  { %v794_v39 = vadd.f32 %v793_v61, %v754_v59  ;;  %v3409_v59 = vld [vmem:[%s5058_s7] sm:$0xff] }
 0x591   :  { %1001 = vmatpush.bf16.msra.mxu1 %v3409_v59 }
 0x592   :  { %v808_v48 = vadd.f32 %v806_v53, %v794_v39 }
 0x594   :  { %v4146_v62 = vadd.f32 %v808_v48, %v3831_v12 }
 0x596   :  { %v822_v32 = vsel %vm141_vm1, %v4146_v62, 0.0 }
 0x597   :  { %823 = vadd.xlane.f32.xlu2 %v822_v32 }
 0x5bb   :  { %v796_v2 = vpop.f32.mrf.mxu2 }
 0x5c0   :  { %v757_v3 = vpop.f32.mrf.mxu3 }
 0x5c1   :  { %v797_v4 = vadd.f32 %v796_v2, %v757_v3 }
 0x5c3   :  { %v809_v8 = vadd.f32 %v806_v53, %v797_v4  ;;  %v798_v6 = vpop.f32.mrf.mxu2 }
 0x5c5   :  { %v4151_v10 = vadd.f32 %v809_v8, %v3838_v16 }
 0x5c7   :  { %v825_v55 = vsel %vm141_vm1, %v4151_v10, 0.0 }
 0x5c8   :  { %826 = vadd.xlane.f32.xlu0 %v825_v55  ;;  %v759_v35 = vpop.f32.mrf.mxu3 }
 0x5c9   :  { %v799_v11 = vadd.f32 %v798_v6, %v759_v35 }
 0x5cb   :  { %v810_v12 = vadd.f32 %v806_v53, %v799_v11  ;;  %v801_v14 = vpop.f32.mrf.mxu2 }
 0x5cd   :  { %v4156_v13 = vadd.f32 %v810_v12, %v3845_v20 }
 0x5cf   :  { %v828_v17 = vsel %vm141_vm1, %v4156_v13, 0.0 }
 0x5d0   :  { %829 = vadd.xlane.f32.xlu1 %v828_v17  ;;  %v762_v19 = vpop.f32.mrf.mxu3 }
 0x5d1   :  { %v802_v63 = vadd.f32 %v801_v14, %v762_v19 }
 0x5d3   :  { %v811_v21 = vadd.f32 %v806_v53, %v802_v63  ;;  %v803_v22 = vpop.f32.mrf.mxu2 }
 0x5d5   :  { %v4161_v16 = vadd.f32 %v811_v21, %v3852_v24  ;;  %v4223_v21 = vld [vmem:[%s5055_s4] sm:$0xff] }
 0x5d7   :  { %v831_v60 = vsel %vm141_vm1, %v4161_v16, 0.0 }
 0x5d8   :  { %v764_v49 = vpop.f32.mrf.mxu3  ;;  %832 = vadd.xlane.f32.xlu2 %v831_v60  ;;  %v4226_v60 = vperm.slane %v4223_v21, 4 }
 0x5d9   :  { %v804_v23 = vadd.f32 %v803_v22, %v764_v49 }
 0x5db   :  { %v812_v20 = vadd.f32 %v806_v53, %v804_v23 }
 0x5dd   :  { %v4166_v25 = vadd.f32 %v812_v20, %v3859_v28  ;;  %v4230_v20 = vperm.slane %v4223_v21, 5 }
 0x5df   :  { %v834_v27 = vsel %vm141_vm1, %v4166_v25, 0.0 }
 0x5e0   :  { %835 = vadd.xlane.f32.xlu0 %v834_v27 }
 0x602   :  { %v821_v7 = vpop.xlane.xlu1 %820 }
 0x603   :  { %v837_v5 = vmul.f32 %v821_v7, %v3863_v36 }
 0x605   :  { %v4172_v24 = vsub.f32 %v4141_v56, %v837_v5 }
 0x607   :  { %v849_v1 = vmul.f32 %v4172_v24, %v4172_v24 }
 0x609   :  { %v855_v54 = vsel %vm141_vm1, %v849_v1, 0.0 }
 0x60a   :  { %v824_v29 = vpop.xlane.xlu2 %823  ;;  %856 = vadd.xlane.f32.xlu1 %v855_v54 }
 0x60b   :  { %v838_v28 = vmul.f32 %v824_v29, %v3863_v36 }
 0x60d   :  { %v4179_v9 = vsub.f32 %v4146_v62, %v838_v28 }
 0x60f   :  { %v850_v18 = vmul.f32 %v4179_v9, %v4179_v9 }
 0x611   :  { %v858_v57 = vsel %vm141_vm1, %v850_v18, 0.0 }
 0x612   :  { %859 = vadd.xlane.f32.xlu2 %v858_v57 }
 0x63b   :  { %v827_v30 = vpop.xlane.xlu0 %826 }
 0x63c   :  { %v839_v26 = vmul.f32 %v827_v30, %v3863_v36 }
 0x63e   :  { %v4186_v34 = vsub.f32 %v4151_v10, %v839_v26 }
 0x640   :  { %v851_v15 = vmul.f32 %v4186_v34, %v4186_v34 }
 0x642   :  { %v861_v31 = vsel %vm141_vm1, %v851_v15, 0.0 }
 0x643   :  { %v830_v37 = vpop.xlane.xlu1 %829  ;;  %862 = vadd.xlane.f32.xlu0 %v861_v31 }
 0x644   :  { %v840_v38 = vmul.f32 %v830_v37, %v3863_v36 }
 0x646   :  { %v4193_v42 = vsub.f32 %v4156_v13, %v840_v38 }
 0x648   :  { %v852_v43 = vmul.f32 %v4193_v42, %v4193_v42 }
 0x64a   :  { %v864_v45 = vsel %vm141_vm1, %v852_v43, 0.0 }
 0x64b   :  { %865 = vadd.xlane.f32.xlu1 %v864_v45  ;;  %v833_v46 = vpop.xlane.xlu2 %832 }
 0x64c   :  { %v841_v58 = vmul.f32 %v833_v46, %v3863_v36 }
 0x64e   :  { %v4200_v33 = vsub.f32 %v4161_v16, %v841_v58 }
 0x650   :  { %v853_v47 = vmul.f32 %v4200_v33, %v4200_v33 }
 0x652   :  { %v867_v51 = vsel %vm141_vm1, %v853_v47, 0.0 }
 0x653   :  { %v836_v0 = vpop.xlane.xlu0 %835  ;;  %868 = vadd.xlane.f32.xlu2 %v867_v51 }
 0x654   :  { %v842_v52 = vmul.f32 %v836_v0, %v3863_v36 }
 0x656   :  { %v4207_v53 = vsub.f32 %v4166_v25, %v842_v52 }
 0x658   :  { %v854_v41 = vmul.f32 %v4207_v53, %v4207_v53 }
 0x65a   :  { %v870_v50 = vsel %vm141_vm1, %v854_v41, 0.0 }
 0x65b   :  { %871 = vadd.xlane.f32.xlu0 %v870_v50 }
 0x67d   :  { %v857_v44 = vpop.xlane.xlu1 %856 }
 0x67e   :  { %v873_v61 = vmul.f32 %v857_v44, %v3863_v36 }
 0x680   :  { %v879_v39 = vadd.f32 1e-12, %v873_v61 }
 0x682   :  { %3544 = vrsqrt.f32 %v879_v39  ;;  %vm891_vm9 = vweird.f32 %v879_v39 }
 0x685   :  { %v860_v48 = vpop.xlane.xlu2 %859 }
 0x686   :  { %v874_v32 = vmul.f32 %v860_v48, %v3863_v36 }
 0x688   :  { %v3545_v2 = vpop.eup %3544  ;;  %v880_v3 = vadd.f32 1e-12, %v874_v32 }
 0x689   :  { %v886_v4 = vmul.f32 %v3545_v2, %v879_v39  ;;  %vm892_vm8 = vweird.f32 %v3545_v2 }
 0x68a   :  { %3546 = vrsqrt.f32 %v880_v3  ;;  %vm893_vm10 = vmor %vm891_vm9, %vm892_vm8  ;;  %vm901_vm12 = vweird.f32 %v880_v3 }
 0x68b   :  { %v887_v8 = vmul.f32 %v3545_v2, %v886_v4 }
 0x68d   :  { %v888_v6 = vmul.f32 0.5, %v887_v8 }
 0x68f   :  { %v889_v55 = vsub.f32 1.5, %v888_v6 }
 0x690   :  { %v3547_v35 = vpop.eup %3546 }
 0x691   :  { %v890_v11 = vmul.f32 %v3545_v2, %v889_v55  ;;  %v896_v12 = vmul.f32 %v3547_v35, %v880_v3  ;;  %vm902_vm11 = vweird.f32 %v3547_v35 }
 0x692   :  { %vm903_vm13 = vmor %vm901_vm12, %vm902_vm11 }
 0x693   :  { %v897_v14 = vmul.f32 %v3547_v35, %v896_v12  ;;  %v894_v17 = vsel %vm893_vm10, %v3545_v2, %v890_v11 }
 0x694   :  { %v945_v22 = vmul.f32 %v894_v17, %v4172_v24 }
 0x695   :  { %v898_v19 = vmul.f32 0.5, %v897_v14 }
 0x696   :  { %v952_v27 = vmul.f32 %v4226_v60, %v945_v22 }
 0x697   :  { %v899_v63 = vsub.f32 1.5, %v898_v19 }
 0x698   :  { %v959_v1 = vadd.f32 %v4230_v20, %v952_v27 }
 0x699   :  { %v900_v49 = vmul.f32 %v3547_v35, %v899_v63 }
 0x69b   :  { %v904_v23 = vsel %vm903_vm13, %v3547_v35, %v900_v49 }
 0x69c   :  { %v946_v7 = vmul.f32 %v904_v23, %v4179_v9 }
 0x69e   :  { %v953_v5 = vmul.f32 %v4226_v60, %v946_v7 }
 0x6a0   :  { %v960_v54 = vadd.f32 %v4230_v20, %v953_v5 }
 0x6a2   :  { %v965_v29 = vpack.c.bf16 %v960_v54, %v959_v1 }
 0x6a4   :  { %3070 = vmatmul.msk.bf16.vlgmr.msra.gmra.mxu1 %vm141_vm1, %v965_v29 }
 0x6b6   :  { %v863_v24 = vpop.xlane.xlu0 %862 }
 0x6b7   :  { %v875_v28 = vmul.f32 %v863_v24, %v3863_v36 }
 0x6b9   :  { %v881_v18 = vadd.f32 1e-12, %v875_v28 }
 0x6bb   :  { %3548 = vrsqrt.f32 %v881_v18  ;;  %vm911_vm15 = vweird.f32 %v881_v18 }
 0x6be   :  { %v866_v57 = vpop.xlane.xlu1 %865 }
 0x6bf   :  { %v876_v30 = vmul.f32 %v866_v57, %v3863_v36  ;;  %v3413_v57 = vld [vmem:[%s5059_s8 + $0x10] sm:$0xff] }
 0x6c1   :  { %v3549_v26 = vpop.eup %3548  ;;  %v882_v15 = vadd.f32 1e-12, %v876_v30  ;;  %v3412_v30 = vld [vmem:[%s5059_s8 + $0x8] sm:$0xff] }
 0x6c2   :  { %v906_v9 = vmul.f32 %v3549_v26, %v881_v18  ;;  %vm912_vm14 = vweird.f32 %v3549_v26  ;;  %v3414_v18 = vld [vmem:[%s5059_s8 + $0x18] sm:$0xff] }
 0x6c3   :  { %3550 = vrsqrt.f32 %v882_v15  ;;  %vm913_vm2 = vmor %vm911_vm15, %vm912_vm14  ;;  %vm921_vm4 = vweird.f32 %v882_v15 }
 0x6c4   :  { %v907_v31 = vmul.f32 %v3549_v26, %v906_v9 }
 0x6c6   :  { %v908_v37 = vmul.f32 0.5, %v907_v31  ;;  %v869_v38 = vpop.xlane.xlu2 %868 }
 0x6c7   :  { %v877_v43 = vmul.f32 %v869_v38, %v3863_v36 }
 0x6c8   :  { %v909_v45 = vsub.f32 1.5, %v908_v37 }
 0x6c9   :  { %v3551_v46 = vpop.eup %3550  ;;  %v883_v58 = vadd.f32 1e-12, %v877_v43 }
 0x6ca   :  { %v910_v47 = vmul.f32 %v3549_v26, %v909_v45  ;;  %v916_v51 = vmul.f32 %v3551_v46, %v882_v15  ;;  %vm922_vm3 = vweird.f32 %v3551_v46  ;;  %v3411_v15 = vld [vmem:[%s5059_s8] sm:$0xff] }
 0x6cb   :  { %3552 = vrsqrt.f32 %v883_v58  ;;  %vm923_vm5 = vmor %vm921_vm4, %vm922_vm3  ;;  %vm931_vm8 = vweird.f32 %v883_v58 }
 0x6cc   :  { %v917_v0 = vmul.f32 %v3551_v46, %v916_v51  ;;  %v914_v52 = vsel %vm913_vm2, %v3549_v26, %v910_v47  ;;  %v972_v26 = vperm.slane %v4223_v21, 6 }
 0x6cd   :  { %v947_v59 = vmul.f32 %v914_v52, %v4186_v34 }
 0x6ce   :  { %v918_v41 = vmul.f32 0.5, %v917_v0  ;;  %v872_v50 = vpop.xlane.xlu0 %871 }
 0x6cf   :  { %v878_v40 = vmul.f32 %v872_v50, %v3863_v36  ;;  %v954_v8 = vmul.f32 %v4226_v60, %v947_v59 }
 0x6d0   :  { %v919_v44 = vsub.f32 1.5, %v918_v41 }
 0x6d1   :  { %v3553_v61 = vpop.eup %3552  ;;  %v884_v39 = vadd.f32 1e-12, %v878_v40  ;;  %v961_v12 = vadd.f32 %v4230_v20, %v954_v8 }
 0x6d2   :  { %v920_v48 = vmul.f32 %v3551_v46, %v919_v44  ;;  %v926_v32 = vmul.f32 %v3553_v61, %v883_v58  ;;  %vm932_vm6 = vweird.f32 %v3553_v61 }
 0x6d3   :  { %3554 = vrsqrt.f32 %v884_v39  ;;  %vm933_vm9 = vmor %vm931_vm8, %vm932_vm6  ;;  %vm941_vm11 = vweird.f32 %v884_v39 }
 0x6d4   :  { %v924_v2 = vsel %vm923_vm5, %v3551_v46, %v920_v48  ;;  %v927_v3 = vmul.f32 %v3553_v61, %v926_v32 }
 0x6d5   :  { %v948_v4 = vmul.f32 %v924_v2, %v4193_v42 }
 0x6d6   :  { %v928_v6 = vmul.f32 0.5, %v927_v3 }
 0x6d7   :  { %v955_v55 = vmul.f32 %v4226_v60, %v948_v4 }
 0x6d8   :  { %v929_v35 = vsub.f32 1.5, %v928_v6 }
 0x6d9   :  { %v3555_v11 = vpop.eup %3554  ;;  %v962_v34 = vadd.f32 %v4230_v20, %v955_v55 }
 0x6da   :  { %v930_v14 = vmul.f32 %v3553_v61, %v929_v35  ;;  %v936_v17 = vmul.f32 %v3555_v11, %v884_v39  ;;  %vm942_vm10 = vweird.f32 %v3555_v11 }
 0x6db   :  { %v966_v19 = vpack.c.bf16 %v962_v34, %v961_v12  ;;  %vm943_vm12 = vmor %vm941_vm11, %vm942_vm10 }
 0x6dc   :  { %v937_v63 = vmul.f32 %v3555_v11, %v936_v17  ;;  %v934_v42 = vsel %vm933_vm9, %v3553_v61, %v930_v14 }
 0x6dd   :  { %3071 = vmatmul.msk.bf16.gmra.mxu1 %vm141_vm1, %v966_v19  ;;  %v949_v23 = vmul.f32 %v934_v42, %v4200_v33  ;;  %v3418_v33 = vld [vmem:[%s5059_s8 + $0x38] sm:$0xff] }
 0x6de   :  { %v938_v22 = vmul.f32 0.5, %v937_v63  ;;  %1140 = vmatpush.bf16.msra.mxu0 %v3418_v33 }
 0x6df   :  { %v956_v1 = vmul.f32 %v4226_v60, %v949_v23 }
 0x6e0   :  { %v939_v49 = vsub.f32 1.5, %v938_v22 }
 0x6e1   :  { %v963_v29 = vadd.f32 %v4230_v20, %v956_v1 }
 0x6e2   :  { %v940_v27 = vmul.f32 %v3555_v11, %v939_v49 }
 0x6e4   :  { %v944_v7 = vsel %vm943_vm12, %v3555_v11, %v940_v27 }
 0x6e5   :  { %v950_v5 = vmul.f32 %v944_v7, %v4207_v53  ;;  %v3417_v53 = vld [vmem:[%s5059_s8 + $0x30] sm:$0xff] }
 0x6e6   :  { %1141 = vmatpush.bf16.msra.mxu0 %v3417_v53 }
 0x6e7   :  { %v957_v54 = vmul.f32 %v4226_v60, %v950_v5  ;;  %v3416_v60 = vld [vmem:[%s5059_s8 + $0x28] sm:$0xff] }
 0x6e9   :  { %v964_v24 = vadd.f32 %v4230_v20, %v957_v54  ;;  %v3415_v20 = vld [vmem:[%s5059_s8 + $0x20] sm:$0xff] }
 0x6ea   :  { %1142 = vmatpush.bf16.msra.mxu0 %v3416_v60 }
 0x6eb   :  { %v967_v28 = vpack.c.bf16 %v964_v24, %v963_v29 }
 0x6ed   :  { %3072 = vmatmul.msk.bf16.gmra.mxu1 %vm141_vm1, %v967_v28 }
 0x6ee   :  { %1143 = vmatpush.bf16.msra.mxu0 %v3415_v20 }
 0x6f2   :  { %1144 = vmatpush.bf16.msra.mxu0 %v3414_v18 }
 0x6f6   :  { %1145 = vmatpush.bf16.msra.mxu0 %v3413_v57 }
 0x6fa   :  { %1146 = vmatpush.bf16.msra.mxu0 %v3412_v30 }
 0x6fe   :  { %1147 = vmatpush.bf16.msra.mxu0 %v3411_v15 }
 0x721   :  { %v1003_v9 = vpop.f32.mrf.mxu1 }
 0x722   :  { %v1004_v31 = vadd.f32 %v1003_v9, %v972_v26 }
 0x724   :  { %v1018_v37 = vmul.f32 %v1004_v31, %v1004_v31 }
 0x726   :  { %v1024_v38 = vmul.f32 %v1018_v37, %v1004_v31 }
 0x728   :  { %v1030_v43 = vmul.f32 0.044715, %v1024_v38 }
 0x729   :  { %v1005_v45 = vpop.f32.mrf.mxu1 }
 0x72a   :  { %v1036_v46 = vadd.f32 %v1030_v43, %v1004_v31  ;;  %v1006_v58 = vadd.f32 %v1005_v45, %v972_v26 }
 0x72c   :  { %v1042_v47 = vmul.f32 0.7978846, %v1036_v46  ;;  %v1019_v51 = vmul.f32 %v1006_v58, %v1006_v58 }
 0x72e   :  { %v1025_v0 = vmul.f32 %v1019_v51, %v1006_v58  ;;  %3556 = vtanh.f32 %v1042_v47 }
 0x730   :  { %v1031_v52 = vmul.f32 0.044715, %v1025_v0 }
 0x732   :  { %v1037_v41 = vadd.f32 %v1031_v52, %v1006_v58 }
 0x734   :  { %v1043_v50 = vmul.f32 0.7978846, %v1037_v41  ;;  %v3557_v40 = vpop.eup %3556 }
 0x735   :  { %v1054_v44 = vadd.f32 1.0, %v3557_v40 }
 0x736   :  { %3558 = vtanh.f32 %v1043_v50  ;;  %v1091_v50 = vperm.slane %v4223_v21, 7 }
 0x737   :  { %v1060_v59 = vmul.f32 0.5, %v1054_v44 }
 0x739   :  { %v1066_v32 = vmul.f32 %v1060_v59, %v1004_v31 }
 0x73c   :  { %v3559_v61 = vpop.eup %3558 }
 0x73d   :  { %v1055_v39 = vadd.f32 1.0, %v3559_v61 }
 0x73f   :  { %v1061_v48 = vmul.f32 0.5, %v1055_v39 }
 0x741   :  { %v1067_v2 = vmul.f32 %v1061_v48, %v1006_v58 }
 0x743   :  { %v1072_v3 = vpack.c.bf16 %v1067_v2, %v1066_v32 }
 0x745   :  { %1148 = vmatmul.bf16.vlgmr.msra.gmra.mxu0 %v1072_v3 }
 0x75a   :  { %v1008_v4 = vpop.f32.mrf.mxu1 }
 0x75b   :  { %v1009_v8 = vadd.f32 %v1008_v4, %v972_v26 }
 0x75d   :  { %v1020_v6 = vmul.f32 %v1009_v8, %v1009_v8 }
 0x75f   :  { %v1026_v55 = vmul.f32 %v1020_v6, %v1009_v8 }
 0x761   :  { %v1032_v35 = vmul.f32 0.044715, %v1026_v55 }
 0x762   :  { %v1010_v11 = vpop.f32.mrf.mxu1 }
 0x763   :  { %v1038_v12 = vadd.f32 %v1032_v35, %v1009_v8  ;;  %v1011_v34 = vadd.f32 %v1010_v11, %v972_v26 }
 0x765   :  { %v1021_v14 = vmul.f32 %v1011_v34, %v1011_v34  ;;  %v1044_v17 = vmul.f32 0.7978846, %v1038_v12 }
 0x767   :  { %v1027_v19 = vmul.f32 %v1021_v14, %v1011_v34  ;;  %3560 = vtanh.f32 %v1044_v17 }
 0x769   :  { %v1033_v63 = vmul.f32 0.044715, %v1027_v19 }
 0x76a   :  { %v1013_v42 = vpop.f32.mrf.mxu1 }
 0x76b   :  { %v1014_v22 = vadd.f32 %v1013_v42, %v972_v26  ;;  %v1039_v49 = vadd.f32 %v1033_v63, %v1011_v34 }
 0x76d   :  { %v1022_v23 = vmul.f32 %v1014_v22, %v1014_v22  ;;  %v1045_v27 = vmul.f32 0.7978846, %v1039_v49  ;;  %v3561_v7 = vpop.eup %3560 }
 0x76e   :  { %v1056_v29 = vadd.f32 1.0, %v3561_v7 }
 0x76f   :  { %v1028_v5 = vmul.f32 %v1022_v23, %v1014_v22  ;;  %3562 = vtanh.f32 %v1045_v27 }
 0x770   :  { %v1062_v18 = vmul.f32 0.5, %v1056_v29 }
 0x771   :  { %v1034_v1 = vmul.f32 0.044715, %v1028_v5 }
 0x772   :  { %v1015_v54 = vpop.f32.mrf.mxu1  ;;  %v1068_v9 = vmul.f32 %v1062_v18, %v1009_v8 }
 0x773   :  { %v1040_v24 = vadd.f32 %v1034_v1, %v1014_v22  ;;  %v1016_v28 = vadd.f32 %v1015_v54, %v972_v26 }
 0x775   :  { %v3563_v33 = vpop.eup %3562  ;;  %v1023_v53 = vmul.f32 %v1016_v28, %v1016_v28  ;;  %v1046_v60 = vmul.f32 0.7978846, %v1040_v24 }
 0x776   :  { %v1057_v20 = vadd.f32 1.0, %v3563_v33 }
 0x777   :  { %v1029_v57 = vmul.f32 %v1023_v53, %v1016_v28  ;;  %3564 = vtanh.f32 %v1046_v60 }
 0x778   :  { %v1063_v30 = vmul.f32 0.5, %v1057_v20 }
 0x779   :  { %v1035_v15 = vmul.f32 0.044715, %v1029_v57 }
 0x77a   :  { %v1069_v31 = vmul.f32 %v1063_v30, %v1011_v34 }
 0x77b   :  { %v1041_v37 = vadd.f32 %v1035_v15, %v1016_v28 }
 0x77c   :  { %v1073_v38 = vpack.c.bf16 %v1069_v31, %v1068_v9 }
 0x77d   :  { %v1047_v43 = vmul.f32 0.7978846, %v1041_v37  ;;  %v3565_v45 = vpop.eup %3564 }
 0x77e   :  { %1153 = vmatmul.bf16.gmra.mxu0 %v1073_v38  ;;  %v1058_v46 = vadd.f32 1.0, %v3565_v45 }
 0x77f   :  { %3566 = vtanh.f32 %v1047_v43 }
 0x780   :  { %v1064_v47 = vmul.f32 0.5, %v1058_v46  ;;  %v3420_v46 = vld [vmem:[%s5056_s5 + $0x18] sm:$0xff] }
 0x781   :  { %1354 = vmatpush.bf16.msra.mxu3 %v3420_v46 }
 0x782   :  { %v1070_v0 = vmul.f32 %v1064_v47, %v1014_v22  ;;  %v3419_v47 = vld [vmem:[%s5056_s5 + $0x10] sm:$0xff] }
 0x785   :  { %v3567_v58 = vpop.eup %3566  ;;  %1355 = vmatpush.bf16.msra.mxu3 %v3419_v47 }
 0x786   :  { %v1059_v26 = vadd.f32 1.0, %v3567_v58 }
 0x788   :  { %v1065_v51 = vmul.f32 0.5, %v1059_v26 }
 0x78a   :  { %v1071_v52 = vmul.f32 %v1065_v51, %v1016_v28 }
 0x78c   :  { %v1074_v41 = vpack.c.bf16 %v1071_v52, %v1070_v0 }
 0x78e   :  { %1158 = vmatmul.bf16.gmra.mxu0 %v1074_v41 }
 0x7c2   :  { %v1149_v40 = vpop.f32.mrf.mxu0 }
 0x7c3   :  { %v1150_v44 = vadd.f32 %v1149_v40, %v1091_v50 }
 0x7c5   :  { %v4283_v61 = vadd.f32 %v1150_v44, %v4141_v56 }
 0x7c7   :  { %v1172_v59 = vsel %vm141_vm1, %v4283_v61, 0.0 }
 0x7c8   :  { %1173 = vadd.xlane.f32.xlu1 %v1172_v59 }
 0x7ca   :  { %v1151_v39 = vpop.f32.mrf.mxu0 }
 0x7cb   :  { %v1152_v48 = vadd.f32 %v1151_v39, %v1091_v50 }
 0x7cd   :  { %v4288_v32 = vadd.f32 %v1152_v48, %v4146_v62 }
 0x7cf   :  { %v1175_v2 = vsel %vm141_vm1, %v4288_v32, 0.0 }
 0x7d0   :  { %1176 = vadd.xlane.f32.xlu2 %v1175_v2 }
 0x7fb   :  { %v1154_v3 = vpop.f32.mrf.mxu0 }
 0x7fc   :  { %v1155_v21 = vadd.f32 %v1154_v3, %v1091_v50 }
 0x7fe   :  { %v4293_v4 = vadd.f32 %v1155_v21, %v4151_v10 }
 0x800   :  { %v1178_v56 = vsel %vm141_vm1, %v4293_v4, 0.0 }
 0x801   :  { %1179 = vadd.xlane.f32.xlu0 %v1178_v56  ;;  %v4365_v56 = vld [vmem:[%s5055_s4 + $0x8] sm:$0xff] }
 0x803   :  { %v1156_v8 = vpop.f32.mrf.mxu0 }
 0x804   :  { %v1157_v6 = vadd.f32 %v1156_v8, %v1091_v50 }
 0x806   :  { %v4298_v55 = vadd.f32 %v1157_v6, %v4156_v13 }
 0x808   :  { %v1181_v62 = vsel %vm141_vm1, %v4298_v55, 0.0 }
 0x809   :  { %1182 = vadd.xlane.f32.xlu1 %v1181_v62 }
 0x80b   :  { %v1159_v35 = vpop.f32.mrf.mxu0 }
 0x80c   :  { %v1160_v11 = vadd.f32 %v1159_v35, %v1091_v50  ;;  %v4368_v35 = vperm.slane %v4365_v56, 0 }
 0x80e   :  { %v4303_v12 = vadd.f32 %v1160_v11, %v4161_v16 }
 0x810   :  { %v1184_v10 = vsel %vm141_vm1, %v4303_v12, 0.0 }
 0x811   :  { %1185 = vadd.xlane.f32.xlu2 %v1184_v10 }
 0x813   :  { %v1161_v34 = vpop.f32.mrf.mxu0 }
 0x814   :  { %v1162_v14 = vadd.f32 %v1161_v34, %v1091_v50 }
 0x816   :  { %v4308_v17 = vadd.f32 %v1162_v14, %v4166_v25  ;;  %v4372_v14 = vperm.slane %v4365_v56, 1 }
 0x818   :  { %v1187_v13 = vsel %vm141_vm1, %v4308_v17, 0.0 }
 0x819   :  { %1188 = vadd.xlane.f32.xlu0 %v1187_v13 }
 0x83b   :  { %v1174_v19 = vpop.xlane.xlu1 %1173 }
 0x83c   :  { %v1190_v63 = vmul.f32 %v1174_v19, %v3863_v36 }
 0x83e   :  { %v4314_v42 = vsub.f32 %v4283_v61, %v1190_v63 }
 0x840   :  { %v1202_v16 = vmul.f32 %v4314_v42, %v4314_v42 }
 0x842   :  { %v1208_v22 = vsel %vm141_vm1, %v1202_v16, 0.0 }
 0x843   :  { %1209 = vadd.xlane.f32.xlu1 %v1208_v22  ;;  %v1177_v49 = vpop.xlane.xlu2 %1176 }
 0x844   :  { %v1191_v25 = vmul.f32 %v1177_v49, %v3863_v36 }
 0x846   :  { %v4321_v23 = vsub.f32 %v4288_v32, %v1191_v25 }
 0x848   :  { %v1203_v27 = vmul.f32 %v4321_v23, %v4321_v23 }
 0x84a   :  { %v1211_v7 = vsel %vm141_vm1, %v1203_v27, 0.0 }
 0x84b   :  { %1212 = vadd.xlane.f32.xlu2 %v1211_v7 }
 0x874   :  { %v1180_v5 = vpop.xlane.xlu0 %1179 }
 0x875   :  { %v1192_v1 = vmul.f32 %v1180_v5, %v3863_v36 }
 0x877   :  { %v4328_v54 = vsub.f32 %v4293_v4, %v1192_v1 }
 0x879   :  { %v1204_v29 = vmul.f32 %v4328_v54, %v4328_v54 }
 0x87b   :  { %v1214_v24 = vsel %vm141_vm1, %v1204_v29, 0.0 }
 0x87c   :  { %v1183_v28 = vpop.xlane.xlu1 %1182  ;;  %1215 = vadd.xlane.f32.xlu0 %v1214_v24 }
 0x87d   :  { %v1193_v33 = vmul.f32 %v1183_v28, %v3863_v36 }
 0x87f   :  { %v4335_v53 = vsub.f32 %v4298_v55, %v1193_v33 }
 0x881   :  { %v1205_v60 = vmul.f32 %v4335_v53, %v4335_v53 }
 0x883   :  { %v1217_v20 = vsel %vm141_vm1, %v1205_v60, 0.0 }
 0x884   :  { %1218 = vadd.xlane.f32.xlu1 %v1217_v20  ;;  %v1186_v18 = vpop.xlane.xlu2 %1185 }
 0x885   :  { %v1194_v57 = vmul.f32 %v1186_v18, %v3863_v36 }
 0x887   :  { %v4342_v30 = vsub.f32 %v4303_v12, %v1194_v57 }
 0x889   :  { %v1206_v15 = vmul.f32 %v4342_v30, %v4342_v30 }
 0x88b   :  { %v1220_v9 = vsel %vm141_vm1, %v1206_v15, 0.0 }
 0x88c   :  { %v1189_v31 = vpop.xlane.xlu0 %1188  ;;  %1221 = vadd.xlane.f32.xlu2 %v1220_v9 }
 0x88d   :  { %v1195_v37 = vmul.f32 %v1189_v31, %v3863_v36 }
 0x88f   :  { %v4349_v38 = vsub.f32 %v4308_v17, %v1195_v37 }
 0x891   :  { %v1207_v43 = vmul.f32 %v4349_v38, %v4349_v38 }
 0x893   :  { %v1223_v45 = vsel %vm141_vm1, %v1207_v43, 0.0 }
 0x894   :  { %1224 = vadd.xlane.f32.xlu0 %v1223_v45 }
 0x8b6   :  { %v1210_v58 = vpop.xlane.xlu1 %1209 }
 0x8b7   :  { %v1226_v26 = vmul.f32 %v1210_v58, %v3863_v36 }
 0x8b9   :  { %v1232_v51 = vadd.f32 1e-12, %v1226_v26 }
 0x8bb   :  { %3568 = vrsqrt.f32 %v1232_v51  ;;  %vm1244_vm14 = vweird.f32 %v1232_v51 }
 0x8be   :  { %v1213_v0 = vpop.xlane.xlu2 %1212 }
 0x8bf   :  { %v1227_v52 = vmul.f32 %v1213_v0, %v3863_v36 }
 0x8c1   :  { %v3569_v41 = vpop.eup %3568  ;;  %v1233_v50 = vadd.f32 1e-12, %v1227_v52 }
 0x8c2   :  { %v1239_v40 = vmul.f32 %v3569_v41, %v1232_v51  ;;  %vm1245_vm13 = vweird.f32 %v3569_v41 }
 0x8c3   :  { %3570 = vrsqrt.f32 %v1233_v50  ;;  %vm1246_vm15 = vmor %vm1244_vm14, %vm1245_vm13  ;;  %vm1254_vm3 = vweird.f32 %v1233_v50 }
 0x8c4   :  { %v1240_v44 = vmul.f32 %v3569_v41, %v1239_v40 }
 0x8c6   :  { %v1241_v59 = vmul.f32 0.5, %v1240_v44 }
 0x8c8   :  { %v1242_v39 = vsub.f32 1.5, %v1241_v59 }
 0x8c9   :  { %v3571_v48 = vpop.eup %3570 }
 0x8ca   :  { %v1243_v2 = vmul.f32 %v3569_v41, %v1242_v39  ;;  %v1249_v3 = vmul.f32 %v3571_v48, %v1233_v50  ;;  %vm1255_vm2 = vweird.f32 %v3571_v48 }
 0x8cb   :  { %vm1256_vm4 = vmor %vm1254_vm3, %vm1255_vm2 }
 0x8cc   :  { %v1250_v21 = vmul.f32 %v3571_v48, %v1249_v3  ;;  %v1247_v8 = vsel %vm1246_vm15, %v3569_v41, %v1243_v2 }
 0x8cd   :  { %v1298_v11 = vmul.f32 %v1247_v8, %v4314_v42 }
 0x8ce   :  { %v1251_v6 = vmul.f32 0.5, %v1250_v21 }
 0x8cf   :  { %v1305_v13 = vmul.f32 %v4368_v35, %v1298_v11 }
 0x8d0   :  { %v1252_v62 = vsub.f32 1.5, %v1251_v6 }
 0x8d1   :  { %v1312_v16 = vadd.f32 %v4372_v14, %v1305_v13 }
 0x8d2   :  { %v1253_v10 = vmul.f32 %v3571_v48, %v1252_v62 }
 0x8d4   :  { %v1257_v34 = vsel %vm1256_vm4, %v3571_v48, %v1253_v10 }
 0x8d5   :  { %v1299_v19 = vmul.f32 %v1257_v34, %v4321_v23 }
 0x8d7   :  { %v1306_v63 = vmul.f32 %v4368_v35, %v1299_v19 }
 0x8d9   :  { %v1313_v22 = vadd.f32 %v4372_v14, %v1306_v63 }
 0x8db   :  { %v1318_v49 = vpack.c.bf16 %v1313_v22, %v1312_v16 }
 0x8dd   :  { %3118 = vmatmul.msk.bf16.vlgmr.msra.gmra.mxu3 %vm141_vm1, %v1318_v49 }
 0x8ef   :  { %v1216_v42 = vpop.xlane.xlu0 %1215 }
 0x8f0   :  { %v1228_v25 = vmul.f32 %v1216_v42, %v3863_v36 }
 0x8f2   :  { %v1234_v27 = vadd.f32 1e-12, %v1228_v25 }
 0x8f4   :  { %3572 = vrsqrt.f32 %v1234_v27  ;;  %vm1264_vm6 = vweird.f32 %v1234_v27 }
 0x8f7   :  { %v1219_v7 = vpop.xlane.xlu1 %1218 }
 0x8f8   :  { %v1229_v5 = vmul.f32 %v1219_v7, %v3863_v36 }
 0x8fa   :  { %v3573_v1 = vpop.eup %3572  ;;  %v1235_v29 = vadd.f32 1e-12, %v1229_v5  ;;  %v1326_v5 = vperm.slane %v4365_v56, 2 }
 0x8fb   :  { %v1259_v23 = vmul.f32 %v3573_v1, %v1234_v27  ;;  %vm1265_vm5 = vweird.f32 %v3573_v1 }
 0x8fc   :  { %3574 = vrsqrt.f32 %v1235_v29  ;;  %vm1266_vm8 = vmor %vm1264_vm6, %vm1265_vm5  ;;  %vm1274_vm10 = vweird.f32 %v1235_v29 }
 0x8fd   :  { %v1260_v24 = vmul.f32 %v3573_v1, %v1259_v23 }
 0x8ff   :  { %v1261_v28 = vmul.f32 0.5, %v1260_v24  ;;  %v1222_v33 = vpop.xlane.xlu2 %1221 }
 0x900   :  { %v1230_v60 = vmul.f32 %v1222_v33, %v3863_v36 }
 0x901   :  { %v1262_v20 = vsub.f32 1.5, %v1261_v28 }
 0x902   :  { %v3575_v18 = vpop.eup %3574  ;;  %v1236_v57 = vadd.f32 1e-12, %v1230_v60 }
 0x903   :  { %v1263_v15 = vmul.f32 %v3573_v1, %v1262_v20  ;;  %v1269_v9 = vmul.f32 %v3575_v18, %v1235_v29  ;;  %vm1275_vm9 = vweird.f32 %v3575_v18 }
 0x904   :  { %3576 = vrsqrt.f32 %v1236_v57  ;;  %vm1276_vm11 = vmor %vm1274_vm10, %vm1275_vm9  ;;  %vm1284_vm13 = vweird.f32 %v1236_v57 }
 0x905   :  { %v1270_v31 = vmul.f32 %v3575_v18, %v1269_v9  ;;  %v1267_v37 = vsel %vm1266_vm8, %v3573_v1, %v1263_v15 }
 0x906   :  { %v1300_v47 = vmul.f32 %v1267_v37, %v4328_v54 }
 0x907   :  { %v1271_v43 = vmul.f32 0.5, %v1270_v31  ;;  %v1225_v45 = vpop.xlane.xlu0 %1224 }
 0x908   :  { %v1231_v46 = vmul.f32 %v1225_v45, %v3863_v36  ;;  %v1307_v44 = vmul.f32 %v4368_v35, %v1300_v47 }
 0x909   :  { %v1272_v58 = vsub.f32 1.5, %v1271_v43 }
 0x90a   :  { %v3577_v26 = vpop.eup %3576  ;;  %v1237_v51 = vadd.f32 1e-12, %v1231_v46  ;;  %v1314_v3 = vadd.f32 %v4372_v14, %v1307_v44 }
 0x90b   :  { %v1273_v0 = vmul.f32 %v3575_v18, %v1272_v58  ;;  %v1279_v52 = vmul.f32 %v3577_v26, %v1236_v57  ;;  %vm1285_vm12 = vweird.f32 %v3577_v26 }
 0x90c   :  { %3578 = vrsqrt.f32 %v1237_v51  ;;  %vm1286_vm14 = vmor %vm1284_vm13, %vm1285_vm12  ;;  %vm1294_vm2 = vweird.f32 %v1237_v51 }
 0x90d   :  { %v1277_v41 = vsel %vm1276_vm11, %v3575_v18, %v1273_v0  ;;  %v1280_v50 = vmul.f32 %v3577_v26, %v1279_v52 }
 0x90e   :  { %v1301_v40 = vmul.f32 %v1277_v41, %v4335_v53 }
 0x90f   :  { %v1281_v59 = vmul.f32 0.5, %v1280_v50 }
 0x910   :  { %v1308_v39 = vmul.f32 %v4368_v35, %v1301_v40 }
 0x911   :  { %v1282_v48 = vsub.f32 1.5, %v1281_v59 }
 0x912   :  { %v3579_v2 = vpop.eup %3578  ;;  %v1315_v54 = vadd.f32 %v4372_v14, %v1308_v39 }
 0x913   :  { %v1283_v21 = vmul.f32 %v3577_v26, %v1282_v48  ;;  %v1289_v8 = vmul.f32 %v3579_v2, %v1237_v51  ;;  %vm1295_vm15 = vweird.f32 %v3579_v2 }
 0x914   :  { %v1319_v6 = vpack.c.bf16 %v1315_v54, %v1314_v3  ;;  %vm1296_vm3 = vmor %vm1294_vm2, %vm1295_vm15 }
 0x915   :  { %v1290_v62 = vmul.f32 %v3579_v2, %v1289_v8  ;;  %v1287_v53 = vsel %vm1286_vm14, %v3577_v26, %v1283_v21 }
 0x916   :  { %3119 = vmatmul.msk.bf16.gmra.mxu3 %vm141_vm1, %v1319_v6  ;;  %v1302_v34 = vmul.f32 %v1287_v53, %v4342_v30 }
 0x917   :  { %v1291_v11 = vmul.f32 0.5, %v1290_v62 }
 0x918   :  { %v1309_v16 = vmul.f32 %v4368_v35, %v1302_v34 }
 0x919   :  { %v1292_v10 = vsub.f32 1.5, %v1291_v11 }
 0x91a   :  { %v1316_v49 = vadd.f32 %v4372_v14, %v1309_v16 }
 0x91b   :  { %v1293_v13 = vmul.f32 %v3579_v2, %v1292_v10 }
 0x91d   :  { %v1297_v19 = vsel %vm1296_vm3, %v3579_v2, %v1293_v13  ;;  %v3685_v13 = vld [vmem:[%s5054_s3] sm:$0xff] }
 0x91e   :  { %v1303_v63 = vmul.f32 %v1297_v19, %v4349_v38 }
 0x920   :  { %v1310_v22 = vmul.f32 %v4368_v35, %v1303_v63 }
 0x922   :  { %v1317_v42 = vadd.f32 %v4372_v14, %v1310_v22 }
 0x924   :  { %v1320_v25 = vpack.c.bf16 %v1317_v42, %v1316_v49 }
 0x926   :  { %3120 = vmatmul.msk.bf16.gmra.mxu3 %vm141_vm1, %v1320_v25 }
 0x960   :  { %v1357_v27 = vpop.f32.mrf.mxu3 }
 0x961   :  { %v1358_v33 = vadd.f32 %v1357_v27, %v1326_v5 }
 0x963   :  { %v1372_v57 = vpack.c.bf16 %v1358_v33, %v1358_v33  ;;  %v3687_v33 = vld [vmem:[%s5054_s3 + $0x10] sm:$0xff] }
 0x965   :  { %v1389_v9 = vunpack.c.l.b16 %v1372_v57 }
 0x968   :  { %v1359_v7 = vpop.f32.mrf.mxu3 }
 0x969   :  { %v1360_v24 = vadd.f32 %v1359_v7, %v1326_v5  ;;  %v3686_v7 = vld [vmem:[%s5054_s3 + $0x8] sm:$0xff] }
 0x96b   :  { %v1373_v20 = vpack.c.bf16 %v1360_v24, %v1360_v24 }
 0x96d   :  { %v1390_v15 = vunpack.c.l.b16 %v1373_v20 }
 0x96f   :  { %v4403_v37 = vpack.c.b16 %v1390_v15, %v1389_v9 }
 0x999   :  { %v1362_v30 = vpop.f32.mrf.mxu3 }
 0x99a   :  { %v1363_v1 = vadd.f32 %v1362_v30, %v1326_v5 }
 0x99c   :  { %v1374_v23 = vpack.c.bf16 %v1363_v1, %v1363_v1 }
 0x99e   :  { %v1391_v35 = vunpack.c.l.b16 %v1374_v23 }
 0x9a1   :  { %v1364_v29 = vpop.f32.mrf.mxu3 }
 0x9a2   :  { %v1365_v38 = vadd.f32 %v1364_v29, %v1326_v5 }
 0x9a4   :  { %v1375_v28 = vpack.c.bf16 %v1365_v38, %v1365_v38 }
 0x9a6   :  { %v1392_v60 = vunpack.c.l.b16 %v1375_v28 }
 0x9a8   :  { %v4399_v18 = vpack.c.b16 %v1392_v60, %v1391_v35 }
 0x9a9   :  { %v1367_v14 = vpop.f32.mrf.mxu3 }
 0x9aa   :  { %1580 = vrot.lane.b32.xlu0 %v4399_v18, %s3720_s1  ;;  %v1368_v31 = vadd.f32 %v1367_v14, %v1326_v5 }
 0x9ac   :  { %v1376_v45 = vpack.c.bf16 %v1368_v31, %v1368_v31 }
 0x9ae   :  { %v1393_v26 = vunpack.c.l.b16 %v1376_v45 }
 0x9b1   :  { %v1369_v43 = vpop.f32.mrf.mxu3 }
 0x9b2   :  { %v1370_v46 = vadd.f32 %v1369_v43, %v1326_v5  ;;  %1578 = vrot.lane.b32.xlu0 %v4403_v37, %s3720_s1  ;;  %v3688_v43 = vld [vmem:[%s5054_s3 + $0x18] sm:$0xff] }
 0x9b4   :  { %v1377_v58 = vpack.c.bf16 %v1370_v46, %v1370_v46 }
 0x9b6   :  { %v1394_v47 = vunpack.c.l.b16 %v1377_v58 }
 0x9b8   :  { %v4407_v51 = vpack.c.b16 %v1394_v47, %v1393_v26 }
 0x9ba   :  { %1574 = vrot.lane.b32.xlu0 %v4399_v18, %s3721_s25  ;;  %1402 = vrot.lane.b32.xlu2 %v4407_v51, %s3719_s24 }
 0x9bb   :  { %1582 = vrot.lane.b32.xlu1 %v4407_v51, %s3720_s1 }
 0x9c2   :  { %1709 = vrot.lane.b32.xlu0 %v4399_v18, %s3723_s21  ;;  %1398 = vrot.lane.b32.xlu2 %v4403_v37, %s3719_s24 }
 0x9c3   :  { %1400 = vrot.lane.b32.xlu1 %v4399_v18, %s3719_s24 }
 0x9ca   :  { %1576 = vrot.lane.b32.xlu2 %v4407_v51, %s3721_s25 }
 0x9cb   :  { %1572 = vrot.lane.b32.xlu1 %v4403_v37, %s3721_s25 }
 0x9d2   :  { %1707 = vrot.lane.b32.xlu2 %v4403_v37, %s3723_s21 }
 0x9d3   :  { %1711 = vrot.lane.b32.xlu1 %v4407_v51, %s3723_s21 }
 0xa14   :  { %v1403_v0 = vpop.permute.xlu2 %1402 }
 0xa15   :  { %v1420_v52 = vsel %vm379_vm7, %v1403_v0, 0 }
 0xa16   :  { %1427 = vmatpush.bf16.xpose.msra.mxu2 %v1420_v52 }
 0xa1c   :  { %v1581_v41 = vpop.permute.xlu0 %1580  ;;  %v1399_v2 = vpop.permute.xlu2 %1398 }
 0xa1d   :  { %v1597_v59 = vsel %vm379_vm7, %v1581_v41, 0  ;;  %v1414_v54 = vsel %vm379_vm7, %v1399_v2, 0 }
 0xa24   :  { %v1579_v39 = vpop.permute.xlu0 %1578  ;;  %v1577_v6 = vpop.permute.xlu2 %1576 }
 0xa25   :  { %v1594_v21 = vsel %vm379_vm7, %v1579_v39, 0 }
 0xa2c   :  { %v1575_v8 = vpop.permute.xlu0 %1574  ;;  %v1708_v11 = vpop.permute.xlu2 %1707 }
 0xa2d   :  { %v1583_v50 = vpop.permute.xlu1 %1582 }
 0xa2e   :  { %v1600_v40 = vsel %vm379_vm7, %v1583_v50, 0  ;;  %v3689_v50 = vld [vmem:[%s5054_s3 + $0x20] sm:$0xff] }
 0xa2f   :  { %1607 = vmatpush.bf16.xpose.msrb.mxu0 %v1600_v40 }
 0xa34   :  { %v1710_v53 = vpop.permute.xlu0 %1709 }
 0xa35   :  { %v1401_v44 = vpop.permute.xlu1 %1400 }
 0xa36   :  { %v1417_v48 = vsel %vm379_vm7, %v1401_v44, 0 }
 0xa37   :  { %1428 = vmatpush.bf16.xpose.msra.mxu2 %v1417_v48  ;;  %1608 = vmatpush.bf16.xpose.msrb.mxu0 %v1597_v59 }
 0xa3d   :  { %v1573_v3 = vpop.permute.xlu1 %1572 }
 0xa3f   :  { %1429 = vmatpush.bf16.xpose.msra.mxu2 %v1414_v54  ;;  %1609 = vmatpush.bf16.xpose.msrb.mxu0 %v1594_v21  ;;  %v3690_v21 = vld [vmem:[%s5054_s3 + $0x28] sm:$0xff] }
 0xa45   :  { %v1712_v62 = vpop.permute.xlu1 %1711 }
 0xa46   :  { %3125 = vmatmul.msk.bf16.vlgmr.msra.gmra.mxu2 %vm379_vm7, %v4403_v37  ;;  %3131 = vmatmul.msk.bf16.vlgmr.msrb.gmra.mxu0 %vm379_vm7, %v1573_v3 }
 0xa47   :  { %1730 = vmatpush.bf16.msrb.mxu3 %v1712_v62 }
 0xa4b   :  { %1731 = vmatpush.bf16.msrb.mxu3 %v1710_v53 }
 0xa4f   :  { %1732 = vmatpush.bf16.msrb.mxu3 %v1708_v11 }
 0xa56   :  { %3126 = vmatmul.msk.bf16.gmra.mxu2 %vm379_vm7, %v4399_v18  ;;  %3132 = vmatmul.msk.bf16.gmra.mxu0 %vm379_vm7, %v1575_v8 }
 0xa66   :  { %3127 = vmatmul.msk.bf16.gmra.mxu2 %vm379_vm7, %v4407_v51  ;;  %3133 = vmatmul.msk.bf16.gmra.mxu0 %vm379_vm7, %v1577_v6 }
 0xac3   :  { %v1611_v10 = vpop.f32.mrf.mxu0 }
 0xac4   :  { %v1626_v34 = vmul.f32 0.25, %v1611_v10 }
 0xac6   :  { %v4447_v19 = vadd.f32 %v3685_v13, %v1626_v34 }
 0xac8   :  { %v1638_v63 = vsel %vm100_vm0, %v4447_v19, -inf }
 0xac9   :  { %v1431_v16 = vpop.f32.mrf.mxu2  ;;  %1639 = vmax.xlane.f32.xlu1 %v1638_v63 }
 0xaca   :  { %v1446_v22 = vmul.f32 0.25, %v1431_v16 }
 0xacb   :  { %v1613_v49 = vpop.f32.mrf.mxu0 }
 0xacc   :  { %v1627_v42 = vmul.f32 0.25, %v1613_v49  ;;  %v4451_v25 = vadd.f32 %v3685_v13, %v1446_v22 }
 0xace   :  { %v1458_v27 = vsel %vm100_vm0, %v4451_v25, -inf  ;;  %v4458_v30 = vadd.f32 %v3686_v7, %v1627_v42 }
 0xacf   :  { %1459 = vmax.xlane.f32.xlu2 %v1458_v27 }
 0xad0   :  { %v1641_v5 = vsel %vm100_vm0, %v4458_v30, -inf }
 0xad1   :  { %v1433_v1 = vpop.f32.mrf.mxu2  ;;  %1642 = vmax.xlane.f32.xlu0 %v1641_v5 }
 0xad2   :  { %v1447_v29 = vmul.f32 0.25, %v1433_v1 }
 0xad3   :  { %v1616_v23 = vpop.f32.mrf.mxu0 }
 0xad4   :  { %v1628_v38 = vmul.f32 0.25, %v1616_v23  ;;  %v4462_v24 = vadd.f32 %v3686_v7, %v1447_v29 }
 0xad6   :  { %v1461_v28 = vsel %vm100_vm0, %v4462_v24, -inf  ;;  %v4469_v35 = vadd.f32 %v3687_v33, %v1628_v38 }
 0xad7   :  { %1462 = vmax.xlane.f32.xlu1 %v1461_v28 }
 0xad8   :  { %v1644_v60 = vsel %vm100_vm0, %v4469_v35, -inf }
 0xad9   :  { %v1436_v20 = vpop.f32.mrf.mxu2  ;;  %1645 = vmax.xlane.f32.xlu0 %v1644_v60 }
 0xada   :  { %v1448_v14 = vmul.f32 0.25, %v1436_v20 }
 0xadb   :  { %v1618_v57 = vpop.f32.mrf.mxu0 }
 0xadc   :  { %v1629_v15 = vmul.f32 0.25, %v1618_v57  ;;  %v4473_v9 = vadd.f32 %v3687_v33, %v1448_v14 }
 0xade   :  { %v1464_v31 = vsel %vm100_vm0, %v4473_v9, -inf  ;;  %v4480_v45 = vadd.f32 %v3688_v43, %v1629_v15 }
 0xadf   :  { %1465 = vmax.xlane.f32.xlu1 %v1464_v31 }
 0xae0   :  { %v1647_v46 = vsel %vm100_vm0, %v4480_v45, -inf }
 0xae1   :  { %v1438_v58 = vpop.f32.mrf.mxu2  ;;  %1648 = vmax.xlane.f32.xlu2 %v1647_v46 }
 0xae2   :  { %v1449_v26 = vmul.f32 0.25, %v1438_v58 }
 0xae3   :  { %v1621_v47 = vpop.f32.mrf.mxu0 }
 0xae4   :  { %v1630_v0 = vmul.f32 0.25, %v1621_v47  ;;  %v4484_v52 = vadd.f32 %v3688_v43, %v1449_v26 }
 0xae6   :  { %v1467_v41 = vsel %vm100_vm0, %v4484_v52, -inf  ;;  %v4491_v40 = vadd.f32 %v3689_v50, %v1630_v0 }
 0xae7   :  { %1468 = vmax.xlane.f32.xlu0 %v1467_v41 }
 0xae8   :  { %v1650_v44 = vsel %vm100_vm0, %v4491_v40, -inf }
 0xae9   :  { %v1441_v59 = vpop.f32.mrf.mxu2  ;;  %1651 = vmax.xlane.f32.xlu2 %v1650_v44 }
 0xaea   :  { %v1450_v39 = vmul.f32 0.25, %v1441_v59 }
 0xaeb   :  { %v1623_v48 = vpop.f32.mrf.mxu0 }
 0xaec   :  { %v1631_v2 = vmul.f32 0.25, %v1623_v48  ;;  %v4495_v3 = vadd.f32 %v3689_v50, %v1450_v39 }
 0xaee   :  { %v1470_v54 = vsel %vm100_vm0, %v4495_v3, -inf  ;;  %v1637_v8 = vadd.f32 %v3690_v21, %v1631_v2 }
 0xaef   :  { %1471 = vmax.xlane.f32.xlu0 %v1470_v54 }
 0xaf0   :  { %v1653_v6 = vsel %vm100_vm0, %v1637_v8, -inf }
 0xaf1   :  { %v1443_v62 = vpop.f32.mrf.mxu2  ;;  %1654 = vmax.xlane.f32.xlu1 %v1653_v6 }
 0xaf2   :  { %v1451_v53 = vmul.f32 0.25, %v1443_v62 }
 0xaf4   :  { %v4503_v11 = vadd.f32 %v3690_v21, %v1451_v53 }
 0xaf6   :  { %v1473_v10 = vsel %vm100_vm0, %v4503_v11, -inf }
 0xaf9   :  { %1474 = vmax.xlane.f32.xlu1 %v1473_v10 }
 0xb12   :  { %1531 = vrot.lane.b32.xlu1 %v4407_v51, %s3722_s26 }
 0xb3c   :  { %v1640_v34 = vpop.xlane.xlu1 %1639 }
 0xb3d   :  { %v1656_v13 = vsub.f32 %v4447_v19, %v1640_v34 }
 0xb3f   :  { %v1662_v63 = vmul.f32 1.442695, %v1656_v13 }
 0xb41   :  { %3580 = vpow2.f32 %v1662_v63 }
 0xb42   :  { %v1460_v16 = vpop.xlane.xlu2 %1459 }
 0xb43   :  { %v1476_v22 = vsub.f32 %v4451_v25, %v1460_v16 }
 0xb44   :  { %v1643_v49 = vpop.xlane.xlu0 %1642 }
 0xb45   :  { %v1482_v42 = vmul.f32 1.442695, %v1476_v22  ;;  %v1657_v27 = vsub.f32 %v4458_v30, %v1643_v49 }
 0xb47   :  { %v4512_v7 = vpop.eup %3580  ;;  %3582 = vpow2.f32 %v1482_v42  ;;  %v1664_v1 = vmul.f32 1.442695, %v1657_v27 }
 0xb48   :  { %v1674_v5 = vsel %vm100_vm0, %v4512_v7, 0.0 }
 0xb49   :  { %1675 = vadd.xlane.f32.xlu0 %v1674_v5  ;;  %3584 = vpow2.f32 %v1664_v1 }
 0xb4a   :  { %v1463_v51 = vpop.xlane.xlu1 %1462 }
 0xb4b   :  { %v1477_v19 = vsub.f32 %v4462_v24, %v1463_v51 }
 0xb4c   :  { %v1646_v29 = vpop.xlane.xlu0 %1645 }
 0xb4d   :  { %v4517_v23 = vpop.eup %3582  ;;  %v1484_v25 = vmul.f32 1.442695, %v1477_v19  ;;  %v1658_v38 = vsub.f32 %v4469_v35, %v1646_v29 }
 0xb4e   :  { %v1494_v30 = vsel %vm100_vm0, %v4517_v23, 0.0 }
 0xb4f   :  { %3586 = vpow2.f32 %v1484_v25  ;;  %1495 = vadd.xlane.f32.xlu2 %v1494_v30  ;;  %v1666_v28 = vmul.f32 1.442695, %v1658_v38  ;;  %v4522_v60 = vpop.eup %3584 }
 0xb50   :  { %v1677_v35 = vsel %vm100_vm0, %v4522_v60, 0.0 }
 0xb51   :  { %3588 = vpow2.f32 %v1666_v28 }
 0xb52   :  { %v1466_v33 = vpop.xlane.xlu1 %1465 }
 0xb53   :  { %v1478_v20 = vsub.f32 %v4473_v9, %v1466_v33 }
 0xb54   :  { %v1649_v14 = vpop.xlane.xlu2 %1648 }
 0xb55   :  { %v4525_v24 = vpop.eup %3586  ;;  %v1486_v57 = vmul.f32 1.442695, %v1478_v20  ;;  %v1659_v15 = vsub.f32 %v4480_v45, %v1649_v14 }
 0xb56   :  { %v1497_v31 = vsel %vm100_vm0, %v4525_v24, 0.0 }
 0xb57   :  { %3590 = vpow2.f32 %v1486_v57  ;;  %v1668_v43 = vmul.f32 1.442695, %v1659_v15  ;;  %1678 = vadd.xlane.f32.xlu2 %v1677_v35  ;;  %1498 = vadd.xlane.f32.xlu0 %v1497_v31  ;;  %v4532_v46 = vpop.eup %3588 }
 0xb58   :  { %v1680_v58 = vsel %vm100_vm0, %v4532_v46, 0.0 }
 0xb59   :  { %3592 = vpow2.f32 %v1668_v43 }
 0xb5a   :  { %v1469_v2 = vpop.xlane.xlu0 %1468 }
 0xb5b   :  { %v1479_v21 = vsub.f32 %v4484_v52, %v1469_v2 }
 0xb5c   :  { %v1652_v54 = vpop.xlane.xlu2 %1651 }
 0xb5d   :  { %v4534_v9 = vpop.eup %3590  ;;  %v1488_v6 = vmul.f32 1.442695, %v1479_v21 }
 0xb5e   :  { %v1500_v45 = vsel %vm100_vm0, %v4534_v9, 0.0 }
 0xb5f   :  { %v4540_v26 = vpop.eup %3592  ;;  %1681 = vadd.xlane.f32.xlu2 %v1680_v58  ;;  %1501 = vadd.xlane.f32.xlu1 %v1500_v45 }
 0xb60   :  { %v1683_v47 = vsel %vm100_vm0, %v4540_v26, 0.0 }
 0xb61   :  { %1684 = vadd.xlane.f32.xlu0 %v1683_v47 }
 0xb62   :  { %v1472_v53 = vpop.xlane.xlu0 %1471 }
 0xb64   :  { %v1655_v0 = vpop.xlane.xlu1 %1654 }
 0xb65   :  { %v1661_v41 = vsub.f32 %v1637_v8, %v1655_v0  ;;  %v1660_v8 = vsub.f32 %v4491_v40, %v1652_v54 }
 0xb67   :  { %v1672_v50 = vmul.f32 1.442695, %v1661_v41  ;;  %v1670_v62 = vmul.f32 1.442695, %v1660_v8 }
 0xb69   :  { %3594 = vpow2.f32 %v1672_v50 }
 0xb6a   :  { %3596 = vpow2.f32 %v1488_v6 }
 0xb6b   :  { %3598 = vpow2.f32 %v1670_v62 }
 0xb6c   :  { %v1475_v39 = vpop.xlane.xlu1 %1474 }
 0xb6d   :  { %v1481_v10 = vsub.f32 %v4503_v11, %v1475_v39 }
 0xb6f   :  { %v4544_v44 = vpop.eup %3594  ;;  %v1492_v34 = vmul.f32 1.442695, %v1481_v10 }
 0xb70   :  { %v1689_v59 = vsel %vm100_vm0, %v4544_v44, 0.0  ;;  %v4556_v13 = vpop.eup %3596 }
 0xb71   :  { %1690 = vadd.xlane.f32.xlu1 %v1689_v59  ;;  %v4558_v63 = vpop.eup %3598  ;;  %3600 = vpow2.f32 %v1492_v34  ;;  %v1503_v52 = vsel %vm100_vm0, %v4556_v13, 0.0 }
 0xb72   :  { %v1686_v40 = vsel %vm100_vm0, %v4558_v63, 0.0 }
 0xb75   :  { %1527 = vrot.lane.b32.xlu0 %v4403_v37, %s3722_s26  ;;  %v1480_v37 = vsub.f32 %v4495_v3, %v1472_v53 }
 0xb77   :  { %1529 = vrot.lane.b32.xlu2 %v4399_v18, %s3722_s26  ;;  %v1490_v18 = vmul.f32 1.442695, %v1480_v37  ;;  %v4564_v11 = vpop.eup %3600 }
 0xb78   :  { %v1509_v3 = vsel %vm100_vm0, %v4564_v11, 0.0 }
 0xb79   :  { %3602 = vpow2.f32 %v1490_v18 }
 0xb7f   :  { %v4566_v16 = vpop.eup %3602 }
 0xb80   :  { %v1506_v22 = vsel %vm100_vm0, %v4566_v16, 0.0 }
 0xb84   :  { %v1532_v48 = vpop.permute.xlu1 %1531 }
 0xb85   :  { %1550 = vmatpush.bf16.msrb.mxu1 %v1532_v48 }
 0xb9f   :  { %1504 = vadd.xlane.f32.xlu0 %v1503_v52 }
 0xba0   :  { %1687 = vadd.xlane.f32.xlu2 %v1686_v40 }
 0xba7   :  { %1510 = vadd.xlane.f32.xlu0 %v1509_v3 }
 0xba8   :  { %1507 = vadd.xlane.f32.xlu2 %v1506_v22 }
 0xbbc   :  { %v1676_v42 = vpop.xlane.xlu0 %1675 }
 0xbbd   :  { %3604 = vrcp.f32 %v1676_v42 }
 0xbc2   :  { %v1496_v49 = vpop.xlane.xlu2 %1495 }
 0xbc3   :  { %v3605_v1 = vpop.eup %3604 }
 0xbc4   :  { %v1698_v19 = vmul.f32 %v3605_v1, %v4512_v7 }
 0xbca   :  { %v1679_v27 = vpop.xlane.xlu2 %1678  ;;  %v1499_v5 = vpop.xlane.xlu0 %1498 }
 0xbcb   :  { %3606 = vrcp.f32 %v1679_v27 }
 0xbd1   :  { %v3607_v51 = vpop.eup %3606 }
 0xbd2   :  { %v1699_v29 = vmul.f32 %v3607_v51, %v4522_v60  ;;  %v1682_v25 = vpop.xlane.xlu2 %1681  ;;  %v1502_v45 = vpop.xlane.xlu1 %1501 }
 0xbd4   :  { %v1704_v38 = vpack.c.bf16 %v1699_v29, %v1698_v19  ;;  %v1685_v30 = vpop.xlane.xlu0 %1684 }
 0xbd5   :  { %3608 = vrcp.f32 %v1685_v30 }
 0xbd6   :  { %3134 = vmatmul.msk.bf16.vlgmr.msrb.gmra.mxu3 %vm100_vm0, %v1704_v38  ;;  %3610 = vrcp.f32 %v1682_v25  ;;  %v1830_v38 = vperm.slane %v4365_v56, 3 }
 0xbd7   :  { %3612 = vrcp.f32 %v1499_v5 }
 0xbd8   :  { %3614 = vrcp.f32 %v1496_v49 }
 0xbd9   :  { %3616 = vrcp.f32 %v1502_v45 }
 0xbda   :  { %v1530_v28 = vpop.permute.xlu2 %1529 }
 0xbdb   :  { %1551 = vmatpush.bf16.msrb.mxu1 %v1530_v28  ;;  %v3609_v33 = vpop.eup %3608 }
 0xbdc   :  { %v3611_v20 = vpop.eup %3610  ;;  %v1701_v14 = vmul.f32 %v3609_v33, %v4540_v26  ;;  %v3422_v26 = vld [vmem:[%s5057_s6 + $0x18] sm:$0xff] }
 0xbdd   :  { %v3613_v57 = vpop.eup %3612  ;;  %v1700_v7 = vmul.f32 %v3611_v20, %v4532_v46  ;;  %1774 = vmatpush.bf16.msrb.mxu2 %v3422_v26 }
 0xbde   :  { %v3615_v15 = vpop.eup %3614  ;;  %v1519_v35 = vmul.f32 %v3613_v57, %v4525_v24 }
 0xbdf   :  { %v1705_v60 = vpack.c.bf16 %v1701_v14, %v1700_v7  ;;  %v1518_v31 = vmul.f32 %v3615_v15, %v4517_v23  ;;  %v3617_v0 = vpop.eup %3616 }
 0xbe0   :  { %v1520_v59 = vmul.f32 %v3617_v0, %v4534_v9 }
 0xbe1   :  { %v1524_v58 = vpack.c.bf16 %v1519_v35, %v1518_v31 }
 0xbe4   :  { %v1691_v47 = vpop.xlane.xlu1 %1690 }
 0xbe5   :  { %3618 = vrcp.f32 %v1691_v47 }
 0xbe6   :  { %3135 = vmatmul.msk.bf16.gmra.mxu3 %vm100_vm0, %v1705_v60 }
 0xbe7   :  { %v1528_v43 = vpop.permute.xlu0 %1527 }
 0xbe8   :  { %1552 = vmatpush.bf16.msrb.mxu1 %v1528_v43 }
 0xbeb   :  { %3128 = vmatmul.msk.bf16.vlgmr.msrb.gmra.mxu1 %vm100_vm0, %v1524_v58  ;;  %v3619_v23 = vpop.eup %3618 }
 0xbec   :  { %v1703_v54 = vmul.f32 %v3619_v23, %v4544_v44  ;;  %v3421_v44 = vld [vmem:[%s5057_s6 + $0x10] sm:$0xff] }
 0xbed   :  { %1813 = vmatpush.bf16.msra.mxu1 %v3421_v44 }
 0xc12   :  { %v1505_v46 = vpop.xlane.xlu0 %1504 }
 0xc13   :  { %3620 = vrcp.f32 %v1505_v46  ;;  %v1688_v24 = vpop.xlane.xlu2 %1687 }
 0xc14   :  { %3622 = vrcp.f32 %v1688_v24 }
 0xc19   :  { %v3621_v41 = vpop.eup %3620 }
 0xc1a   :  { %v3623_v50 = vpop.eup %3622  ;;  %v1521_v39 = vmul.f32 %v3621_v41, %v4556_v13  ;;  %v1511_v48 = vpop.xlane.xlu0 %1510 }
 0xc1b   :  { %v1702_v2 = vmul.f32 %v3623_v50, %v4558_v63  ;;  %v1508_v21 = vpop.xlane.xlu2 %1507  ;;  %3624 = vrcp.f32 %v1511_v48 }
 0xc1c   :  { %v1525_v8 = vpack.c.bf16 %v1521_v39, %v1520_v59  ;;  %3626 = vrcp.f32 %v1508_v21 }
 0xc1d   :  { %v1706_v6 = vpack.c.bf16 %v1703_v54, %v1702_v2 }
 0xc1e   :  { %3129 = vmatmul.msk.bf16.gmra.mxu1 %vm100_vm0, %v1525_v8 }
 0xc1f   :  { %3136 = vmatmul.msk.bf16.gmra.mxu3 %vm100_vm0, %v1706_v6 }
 0xc21   :  { %v3625_v62 = vpop.eup %3624 }
 0xc22   :  { %v3627_v53 = vpop.eup %3626  ;;  %v1523_v10 = vmul.f32 %v3625_v62, %v4564_v11 }
 0xc23   :  { %v1522_v9 = vmul.f32 %v3627_v53, %v4566_v16 }
 0xc25   :  { %v1526_v37 = vpack.c.bf16 %v1523_v10, %v1522_v9 }
 0xc2e   :  { %3130 = vmatmul.msk.bf16.gmra.mxu1 %vm100_vm0, %v1526_v37 }
 0xc59   :  { %v1734_v34 = vpop.f32.mrf.mxu3 }
 0xc61   :  { %v1736_v18 = vpop.f32.mrf.mxu3 }
 0xc62   :  { %v1749_v13 = vpack.c.bf16 %v1736_v18, %v1734_v34 }
 0xc64   :  { %3141 = vmatmul.msk.bf16.vlgmr.msrb.gmra.mxu2 %vm379_vm7, %v1749_v13 }
 0xc68   :  { %v1554_v63 = vpop.f32.mrf.mxu1 }
 0xc69   :  { %v1739_v52 = vpop.f32.mrf.mxu3 }
 0xc70   :  { %v1556_v40 = vpop.f32.mrf.mxu1 }
 0xc71   :  { %v1569_v3 = vpack.c.bf16 %v1556_v40, %v1554_v63  ;;  %v1741_v16 = vpop.f32.mrf.mxu3 }
 0xc72   :  { %v1750_v22 = vpack.c.bf16 %v1741_v16, %v1739_v52 }
 0xc73   :  { %3148 = vmatmul.msk.bf16.vlgmr.msra.gmra.mxu1 %vm379_vm7, %v1569_v3 }
 0xc74   :  { %3142 = vmatmul.msk.bf16.gmra.mxu2 %vm379_vm7, %v1750_v22 }
 0xc9b   :  { %v1559_v11 = vpop.f32.mrf.mxu1 }
 0xca2   :  { %v1744_v49 = vpop.f32.mrf.mxu3 }
 0xca3   :  { %v1561_v42 = vpop.f32.mrf.mxu1 }
 0xca4   :  { %v1570_v27 = vpack.c.bf16 %v1561_v42, %v1559_v11 }
 0xca6   :  { %3149 = vmatmul.msk.bf16.gmra.mxu1 %vm379_vm7, %v1570_v27 }
 0xcaa   :  { %v1746_v5 = vpop.f32.mrf.mxu3 }
 0xcab   :  { %v1751_v1 = vpack.c.bf16 %v1746_v5, %v1744_v49  ;;  %v1564_v51 = vpop.f32.mrf.mxu1 }
 0xcad   :  { %3143 = vmatmul.msk.bf16.gmra.mxu2 %vm379_vm7, %v1751_v1 }
 0xcb3   :  { %v1566_v19 = vpop.f32.mrf.mxu1 }
 0xcb4   :  { %v1571_v29 = vpack.c.bf16 %v1566_v19, %v1564_v51 }
 0xcb6   :  { %3150 = vmatmul.msk.bf16.gmra.mxu1 %vm379_vm7, %v1571_v29  ;;  %v3424_v29 = vld [vmem:[%s5058_s7 + $0x18] sm:$0xff] }
 0xcb7   :  { %2025 = vmatpush.bf16.msra.mxu0 %v3424_v29 }
 0xce7   :  { %v1776_v25 = vpop.f32.mrf.mxu2 }
 0xcef   :  { %v1778_v57 = vpop.f32.mrf.mxu2 }
 0xcf0   :  { %v1815_v30 = vpop.f32.mrf.mxu1 }
 0xcf1   :  { %v1816_v28 = vadd.f32 %v1815_v30, %v1776_v25 }
 0xcf3   :  { %v1831_v33 = vadd.f32 %v1830_v38, %v1816_v28  ;;  %v3423_v28 = vld [vmem:[%s5058_s7 + $0x10] sm:$0xff] }
 0xcf4   :  { %2026 = vmatpush.bf16.msra.mxu0 %v3423_v28 }
 0xcf5   :  { %v4604_v20 = vadd.f32 %v1831_v33, %v4283_v61 }
 0xcf7   :  { %v1843_v14 = vsel %vm141_vm1, %v4604_v20, 0.0  ;;  %v1781_v31 = vpop.f32.mrf.mxu2 }
 0xcf8   :  { %v1817_v7 = vpop.f32.mrf.mxu1  ;;  %1844 = vadd.xlane.f32.xlu1 %v1843_v14 }
 0xcf9   :  { %v1818_v15 = vadd.f32 %v1817_v7, %v1778_v57 }
 0xcfb   :  { %v1832_v60 = vadd.f32 %v1830_v38, %v1818_v15 }
 0xcfd   :  { %v4609_v35 = vadd.f32 %v1832_v60, %v4288_v32 }
 0xcff   :  { %v1846_v56 = vsel %vm141_vm1, %v4609_v35, 0.0  ;;  %v1783_v47 = vpop.f32.mrf.mxu2 }
 0xd00   :  { %1847 = vadd.xlane.f32.xlu2 %v1846_v56 }
 0xd23   :  { %v1820_v43 = vpop.f32.mrf.mxu1 }
 0xd24   :  { %v1821_v58 = vadd.f32 %v1820_v43, %v1781_v31 }
 0xd26   :  { %v1833_v61 = vadd.f32 %v1830_v38, %v1821_v58 }
 0xd28   :  { %v4614_v45 = vadd.f32 %v1833_v61, %v4293_v4 }
 0xd2a   :  { %v1849_v26 = vsel %vm141_vm1, %v4614_v45, 0.0 }
 0xd2b   :  { %v1822_v46 = vpop.f32.mrf.mxu1  ;;  %1850 = vadd.xlane.f32.xlu0 %v1849_v26 }
 0xd2c   :  { %v1823_v24 = vadd.f32 %v1822_v46, %v1783_v47 }
 0xd2e   :  { %v1834_v32 = vadd.f32 %v1830_v38, %v1823_v24 }
 0xd30   :  { %v4619_v0 = vadd.f32 %v1834_v32, %v4298_v55  ;;  %v1786_v41 = vpop.f32.mrf.mxu2 }
 0xd32   :  { %v1852_v23 = vsel %vm141_vm1, %v4619_v0, 0.0 }
 0xd33   :  { %1853 = vadd.xlane.f32.xlu1 %v1852_v23  ;;  %v1825_v50 = vpop.f32.mrf.mxu1 }
 0xd34   :  { %v1826_v59 = vadd.f32 %v1825_v50, %v1786_v41 }
 0xd36   :  { %v1835_v4 = vadd.f32 %v1830_v38, %v1826_v59 }
 0xd38   :  { %v4624_v39 = vadd.f32 %v1835_v4, %v4303_v12  ;;  %v1788_v21 = vpop.f32.mrf.mxu2  ;;  %v4686_v4 = vld [vmem:[%s5055_s4 + $0x8] sm:$0xff] }
 0xd3a   :  { %v1855_v48 = vsel %vm141_vm1, %v4624_v39, 0.0 }
 0xd3b   :  { %1856 = vadd.xlane.f32.xlu1 %v1855_v48  ;;  %v1827_v2 = vpop.f32.mrf.mxu1  ;;  %v4689_v48 = vperm.slane %v4686_v4, 4 }
 0xd3c   :  { %v1828_v8 = vadd.f32 %v1827_v2, %v1788_v21  ;;  %v4693_v21 = vperm.slane %v4686_v4, 5 }
 0xd3e   :  { %v1836_v53 = vadd.f32 %v1830_v38, %v1828_v8 }
 0xd40   :  { %v4637_v37 = vadd.f32 %v1836_v53, %v4308_v17 }
 0xd42   :  { %v1858_v13 = vsel %vm141_vm1, %v4637_v37, 0.0 }
 0xd6b   :  { %v1845_v54 = vpop.xlane.xlu1 %1844 }
 0xd6c   :  { %v1861_v55 = vmul.f32 %v1845_v54, %v3863_v36 }
 0xd6e   :  { %v4630_v6 = vsub.f32 %v4604_v20, %v1861_v55 }
 0xd70   :  { %v1873_v62 = vmul.f32 %v4630_v6, %v4630_v6 }
 0xd72   :  { %v1879_v12 = vsel %vm141_vm1, %v1873_v62, 0.0 }
 0xd73   :  { %v1848_v9 = vpop.xlane.xlu2 %1847  ;;  %1880 = vadd.xlane.f32.xlu2 %v1879_v12 }
 0xd74   :  { %v1862_v10 = vmul.f32 %v1848_v9, %v3863_v36 }
 0xd76   :  { %v4640_v44 = vsub.f32 %v4609_v35, %v1862_v10 }
 0xd78   :  { %v1874_v34 = vmul.f32 %v4640_v44, %v4640_v44 }
 0xd7a   :  { %v1882_v18 = vsel %vm141_vm1, %v1874_v34, 0.0 }
 0xd7b   :  { %1883 = vadd.xlane.f32.xlu0 %v1882_v18  ;;  %1859 = vadd.xlane.f32.xlu2 %v1858_v13 }
 0xd9e   :  { %v1851_v63 = vpop.xlane.xlu0 %1850 }
 0xd9f   :  { %v1863_v52 = vmul.f32 %v1851_v63, %v3863_v36 }
 0xda1   :  { %v4649_v40 = vsub.f32 %v4614_v45, %v1863_v52 }
 0xda3   :  { %v1875_v17 = vmul.f32 %v4649_v40, %v4649_v40 }
 0xda5   :  { %v1885_v3 = vsel %vm141_vm1, %v1875_v17, 0.0 }
 0xda6   :  { %1886 = vadd.xlane.f32.xlu0 %v1885_v3  ;;  %v1854_v16 = vpop.xlane.xlu1 %1853 }
 0xda7   :  { %v1864_v22 = vmul.f32 %v1854_v16, %v3863_v36 }
 0xda9   :  { %v4656_v11 = vsub.f32 %v4619_v0, %v1864_v22 }
 0xdab   :  { %v1876_v49 = vmul.f32 %v4656_v11, %v4656_v11 }
 0xdad   :  { %v1888_v42 = vsel %vm141_vm1, %v1876_v49, 0.0 }
 0xdae   :  { %1889 = vadd.xlane.f32.xlu1 %v1888_v42  ;;  %v1857_v27 = vpop.xlane.xlu1 %1856 }
 0xdaf   :  { %v1865_v5 = vmul.f32 %v1857_v27, %v3863_v36 }
 0xdb1   :  { %v4663_v1 = vsub.f32 %v4624_v39, %v1865_v5 }
 0xdb3   :  { %v1877_v51 = vmul.f32 %v4663_v1, %v4663_v1 }
 0xdb5   :  { %v1891_v19 = vsel %vm141_vm1, %v1877_v51, 0.0 }
 0xdb6   :  { %1892 = vadd.xlane.f32.xlu2 %v1891_v19 }
 0xde6   :  { %v1881_v25 = vpop.xlane.xlu2 %1880 }
 0xde7   :  { %v1897_v38 = vmul.f32 %v1881_v25, %v3863_v36 }
 0xde9   :  { %v1903_v30 = vadd.f32 1e-12, %v1897_v38 }
 0xdeb   :  { %3628 = vrsqrt.f32 %v1903_v30  ;;  %vm1915_vm7 = vweird.f32 %v1903_v30 }
 0xdee   :  { %v1884_v33 = vpop.xlane.xlu0 %1883  ;;  %v1860_v14 = vpop.xlane.xlu2 %1859 }
 0xdef   :  { %v1898_v57 = vmul.f32 %v1884_v33, %v3863_v36  ;;  %v1866_v7 = vmul.f32 %v1860_v14, %v3863_v36 }
 0xdf1   :  { %v3629_v15 = vpop.eup %3628  ;;  %v1904_v60 = vadd.f32 1e-12, %v1898_v57  ;;  %v4678_v56 = vsub.f32 %v4637_v37, %v1866_v7 }
 0xdf2   :  { %v1910_v31 = vmul.f32 %v3629_v15, %v1903_v30  ;;  %vm1916_vm0 = vweird.f32 %v3629_v15 }
 0xdf3   :  { %3630 = vrsqrt.f32 %v1904_v60  ;;  %v1878_v43 = vmul.f32 %v4678_v56, %v4678_v56  ;;  %vm1917_vm4 = vmor %vm1915_vm7, %vm1916_vm0  ;;  %vm1925_vm6 = vweird.f32 %v1904_v60 }
 0xdf4   :  { %v1911_v58 = vmul.f32 %v3629_v15, %v1910_v31 }
 0xdf5   :  { %v1894_v61 = vsel %vm141_vm1, %v1878_v43, 0.0 }
 0xdf6   :  { %v1912_v26 = vmul.f32 0.5, %v1911_v58  ;;  %1895 = vadd.xlane.f32.xlu0 %v1894_v61 }
 0xdf8   :  { %v1913_v47 = vsub.f32 1.5, %v1912_v26 }
 0xdf9   :  { %v3631_v46 = vpop.eup %3630 }
 0xdfa   :  { %v1914_v24 = vmul.f32 %v3629_v15, %v1913_v47  ;;  %v1920_v32 = vmul.f32 %v3631_v46, %v1904_v60  ;;  %vm1926_vm5 = vweird.f32 %v3631_v46 }
 0xdfb   :  { %vm1927_vm8 = vmor %vm1925_vm6, %vm1926_vm5 }
 0xdfc   :  { %v1921_v23 = vmul.f32 %v3631_v46, %v1920_v32  ;;  %v1918_v41 = vsel %vm1917_vm4, %v3629_v15, %v1914_v24  ;;  %v3432_v24 = vld [vmem:[%s5059_s8 + $0x78] sm:$0xff] }
 0xdfd   :  { %v1969_v2 = vmul.f32 %v1918_v41, %v4630_v6  ;;  %2166 = vmatpush.bf16.msra.mxu3 %v3432_v24 }
 0xdfe   :  { %v1922_v50 = vmul.f32 0.5, %v1921_v23  ;;  %v3431_v23 = vld [vmem:[%s5059_s8 + $0x70] sm:$0xff] }
 0xdff   :  { %v1976_v8 = vmul.f32 %v4689_v48, %v1969_v2  ;;  %v3430_v2 = vld [vmem:[%s5059_s8 + $0x68] sm:$0xff] }
 0xe00   :  { %v1923_v59 = vsub.f32 1.5, %v1922_v50 }
 0xe01   :  { %v1983_v12 = vadd.f32 %v4693_v21, %v1976_v8  ;;  %2167 = vmatpush.bf16.msra.mxu3 %v3431_v23 }
 0xe02   :  { %v1924_v54 = vmul.f32 %v3631_v46, %v1923_v59 }
 0xe04   :  { %v1928_v55 = vsel %vm1927_vm8, %v3631_v46, %v1924_v54 }
 0xe05   :  { %v1970_v62 = vmul.f32 %v1928_v55, %v4640_v44  ;;  %2168 = vmatpush.bf16.msra.mxu3 %v3430_v2 }
 0xe07   :  { %v1977_v53 = vmul.f32 %v4689_v48, %v1970_v62  ;;  %v3429_v62 = vld [vmem:[%s5059_s8 + $0x60] sm:$0xff] }
 0xe09   :  { %v1984_v9 = vadd.f32 %v4693_v21, %v1977_v53  ;;  %2169 = vmatpush.bf16.msra.mxu3 %v3429_v62 }
 0xe0b   :  { %v1989_v10 = vpack.c.bf16 %v1984_v9, %v1983_v12 }
 0xe0d   :  { %3163 = vmatmul.msk.bf16.vlgmr.msra.gmra.mxu0 %vm141_vm1, %v1989_v10  ;;  %v3428_v10 = vld [vmem:[%s5059_s8 + $0x58] sm:$0xff] }
 0xe0e   :  { %2170 = vmatpush.bf16.msra.mxu3 %v3428_v10 }
 0xe19   :  { %v1887_v6 = vpop.xlane.xlu0 %1886 }
 0xe1a   :  { %v1899_v34 = vmul.f32 %v1887_v6, %v3863_v36 }
 0xe1c   :  { %v1905_v18 = vadd.f32 1e-12, %v1899_v34 }
 0xe1e   :  { %3632 = vrsqrt.f32 %v1905_v18  ;;  %vm1935_vm10 = vweird.f32 %v1905_v18 }
 0xe21   :  { %v1890_v13 = vpop.xlane.xlu1 %1889 }
 0xe22   :  { %v1900_v63 = vmul.f32 %v1890_v13, %v3863_v36 }
 0xe24   :  { %v3633_v52 = vpop.eup %3632  ;;  %v1906_v17 = vadd.f32 1e-12, %v1900_v63 }
 0xe25   :  { %v1930_v44 = vmul.f32 %v3633_v52, %v1905_v18  ;;  %vm1936_vm9 = vweird.f32 %v3633_v52 }
 0xe26   :  { %3634 = vrsqrt.f32 %v1906_v17  ;;  %vm1937_vm11 = vmor %vm1935_vm10, %vm1936_vm9  ;;  %vm1945_vm13 = vweird.f32 %v1906_v17 }
 0xe27   :  { %v1931_v3 = vmul.f32 %v3633_v52, %v1930_v44  ;;  %v3426_v44 = vld [vmem:[%s5059_s8 + $0x48] sm:$0xff] }
 0xe29   :  { %v1932_v16 = vmul.f32 0.5, %v1931_v3  ;;  %v1893_v60 = vpop.xlane.xlu2 %1892  ;;  %v3425_v3 = vld [vmem:[%s5059_s8 + $0x40] sm:$0xff] }
 0xe2b   :  { %v1933_v22 = vsub.f32 1.5, %v1932_v16 }
 0xe2c   :  { %v3635_v49 = vpop.eup %3634 }
 0xe2d   :  { %v1934_v42 = vmul.f32 %v3633_v52, %v1933_v22  ;;  %v1940_v27 = vmul.f32 %v3635_v49, %v1906_v17  ;;  %vm1946_vm12 = vweird.f32 %v3635_v49 }
 0xe2e   :  { %vm1947_vm14 = vmor %vm1945_vm13, %vm1946_vm12 }
 0xe2f   :  { %v1941_v5 = vmul.f32 %v3635_v49, %v1940_v27  ;;  %v1938_v51 = vsel %vm1937_vm11, %v3633_v52, %v1934_v42 }
 0xe30   :  { %v1971_v25 = vmul.f32 %v1938_v51, %v4649_v40  ;;  %v1901_v40 = vmul.f32 %v1893_v60, %v3863_v36 }
 0xe31   :  { %v1942_v19 = vmul.f32 0.5, %v1941_v5 }
 0xe32   :  { %v1978_v33 = vmul.f32 %v4689_v48, %v1971_v25  ;;  %v1907_v31 = vadd.f32 1e-12, %v1901_v40 }
 0xe33   :  { %v1943_v29 = vsub.f32 1.5, %v1942_v19 }
 0xe34   :  { %v1985_v57 = vadd.f32 %v4693_v21, %v1978_v33  ;;  %3636 = vrsqrt.f32 %v1907_v31  ;;  %vm1955_vm2 = vweird.f32 %v1907_v31 }
 0xe35   :  { %v1944_v38 = vmul.f32 %v3635_v49, %v1943_v29 }
 0xe37   :  { %v1948_v30 = vsel %vm1947_vm14, %v3635_v49, %v1944_v38 }
 0xe38   :  { %v1972_v28 = vmul.f32 %v1948_v30, %v4656_v11 }
 0xe3a   :  { %v1979_v14 = vmul.f32 %v4689_v48, %v1972_v28  ;;  %v3637_v43 = vpop.eup %3636 }
 0xe3b   :  { %v1950_v58 = vmul.f32 %v3637_v43, %v1907_v31  ;;  %vm1956_vm15 = vweird.f32 %v3637_v43 }
 0xe3c   :  { %v1986_v7 = vadd.f32 %v4693_v21, %v1979_v14  ;;  %vm1957_vm3 = vmor %vm1955_vm2, %vm1956_vm15 }
 0xe3d   :  { %v1951_v61 = vmul.f32 %v3637_v43, %v1950_v58 }
 0xe3e   :  { %v1990_v15 = vpack.c.bf16 %v1986_v7, %v1985_v57 }
 0xe3f   :  { %v1952_v46 = vmul.f32 0.5, %v1951_v61 }
 0xe40   :  { %3164 = vmatmul.msk.bf16.gmra.mxu0 %vm141_vm1, %v1990_v15 }
 0xe41   :  { %v1953_v32 = vsub.f32 1.5, %v1952_v46 }
 0xe43   :  { %v1954_v50 = vmul.f32 %v3637_v43, %v1953_v32 }
 0xe45   :  { %v1958_v55 = vsel %vm1957_vm3, %v3637_v43, %v1954_v50 }
 0xe46   :  { %v1973_v12 = vmul.f32 %v1958_v55, %v4663_v1  ;;  %v3427_v1 = vld [vmem:[%s5059_s8 + $0x50] sm:$0xff] }
 0xe47   :  { %2171 = vmatpush.bf16.msra.mxu3 %v3427_v1 }
 0xe48   :  { %v1980_v18 = vmul.f32 %v4689_v48, %v1973_v12 }
 0xe4a   :  { %v1987_v63 = vadd.f32 %v4693_v21, %v1980_v18 }
 0xe4b   :  { %2172 = vmatpush.bf16.msra.mxu3 %v3426_v44 }
 0xe4f   :  { %2173 = vmatpush.bf16.msra.mxu3 %v3425_v3 }
 0xe69   :  { %v1896_v11 = vpop.xlane.xlu0 %1895 }
 0xe6a   :  { %v1902_v26 = vmul.f32 %v1896_v11, %v3863_v36 }
 0xe6c   :  { %v1908_v47 = vadd.f32 1e-12, %v1902_v26 }
 0xe6e   :  { %3638 = vrsqrt.f32 %v1908_v47  ;;  %vm1965_vm7 = vweird.f32 %v1908_v47 }
 0xe74   :  { %v3639_v41 = vpop.eup %3638 }
 0xe75   :  { %v1960_v59 = vmul.f32 %v3639_v41, %v1908_v47  ;;  %vm1966_vm0 = vweird.f32 %v3639_v41 }
 0xe76   :  { %vm1967_vm4 = vmor %vm1965_vm7, %vm1966_vm0 }
 0xe77   :  { %v1961_v54 = vmul.f32 %v3639_v41, %v1960_v59 }
 0xe79   :  { %v1962_v8 = vmul.f32 0.5, %v1961_v54 }
 0xe7b   :  { %v1963_v53 = vsub.f32 1.5, %v1962_v8 }
 0xe7d   :  { %v1964_v9 = vmul.f32 %v3639_v41, %v1963_v53 }
 0xe7f   :  { %v1968_v6 = vsel %vm1967_vm4, %v3639_v41, %v1964_v9 }
 0xe80   :  { %v1974_v34 = vmul.f32 %v1968_v6, %v4678_v56  ;;  %v4740_v56 = vperm.slane %v4686_v4, 6 }
 0xe82   :  { %v1981_v13 = vmul.f32 %v4689_v48, %v1974_v34 }
 0xe84   :  { %v1988_v52 = vadd.f32 %v4693_v21, %v1981_v13 }
 0xe86   :  { %v1991_v17 = vpack.c.bf16 %v1988_v52, %v1987_v63 }
 0xe88   :  { %3165 = vmatmul.msk.bf16.gmra.mxu0 %vm141_vm1, %v1991_v17 }
 0xe8a   :  { %v2028_v48 = vpop.f32.mrf.mxu0 }
 0xe8b   :  { %v2029_v16 = vadd.f32 %v2028_v48, %v4740_v56 }
 0xe8d   :  { %v2043_v21 = vmul.f32 %v2029_v16, %v2029_v16 }
 0xe8f   :  { %v2049_v22 = vmul.f32 %v2043_v21, %v2029_v16 }
 0xe91   :  { %v2055_v49 = vmul.f32 0.044715, %v2049_v22 }
 0xe92   :  { %v2030_v42 = vpop.f32.mrf.mxu0 }
 0xe93   :  { %v2061_v27 = vadd.f32 %v2055_v49, %v2029_v16  ;;  %v2031_v5 = vadd.f32 %v2030_v42, %v4740_v56 }
 0xe95   :  { %v2067_v51 = vmul.f32 0.7978846, %v2061_v27  ;;  %v2044_v19 = vmul.f32 %v2031_v5, %v2031_v5 }
 0xe97   :  { %v2050_v29 = vmul.f32 %v2044_v19, %v2031_v5  ;;  %3640 = vtanh.f32 %v2067_v51 }
 0xe99   :  { %v2056_v25 = vmul.f32 0.044715, %v2050_v29 }
 0xe9b   :  { %v2062_v38 = vadd.f32 %v2056_v25, %v2031_v5 }
 0xe9d   :  { %v2068_v30 = vmul.f32 0.7978846, %v2062_v38  ;;  %v3641_v28 = vpop.eup %3640 }
 0xe9e   :  { %v2079_v33 = vadd.f32 1.0, %v3641_v28 }
 0xe9f   :  { %3642 = vtanh.f32 %v2068_v30 }
 0xea0   :  { %v2085_v57 = vmul.f32 0.5, %v2079_v33 }
 0xea2   :  { %v2091_v60 = vmul.f32 %v2085_v57, %v2029_v16 }
 0xea5   :  { %v3643_v14 = vpop.eup %3642 }
 0xea6   :  { %v2080_v7 = vadd.f32 1.0, %v3643_v14 }
 0xea8   :  { %v2086_v15 = vmul.f32 0.5, %v2080_v7 }
 0xeaa   :  { %v2092_v40 = vmul.f32 %v2086_v15, %v2031_v5 }
 0xeac   :  { %v2097_v31 = vpack.c.bf16 %v2092_v40, %v2091_v60 }
 0xeae   :  { %2174 = vmatmul.bf16.vlgmr.msra.gmra.mxu3 %v2097_v31 }
 0xebd   :  { %v2033_v43 = vpop.f32.mrf.mxu0 }
 0xebe   :  { %v2034_v58 = vadd.f32 %v2033_v43, %v4740_v56 }
 0xec0   :  { %v2045_v61 = vmul.f32 %v2034_v58, %v2034_v58 }
 0xec2   :  { %v2051_v11 = vmul.f32 %v2045_v61, %v2034_v58 }
 0xec4   :  { %v2057_v26 = vmul.f32 0.044715, %v2051_v11 }
 0xec5   :  { %v2035_v47 = vpop.f32.mrf.mxu0 }
 0xec6   :  { %v2063_v46 = vadd.f32 %v2057_v26, %v2034_v58  ;;  %v2036_v24 = vadd.f32 %v2035_v47, %v4740_v56 }
 0xec8   :  { %v2069_v32 = vmul.f32 0.7978846, %v2063_v46  ;;  %v2046_v23 = vmul.f32 %v2036_v24, %v2036_v24 }
 0xeca   :  { %v2052_v41 = vmul.f32 %v2046_v23, %v2036_v24  ;;  %3644 = vtanh.f32 %v2069_v32 }
 0xecc   :  { %v2058_v50 = vmul.f32 0.044715, %v2052_v41 }
 0xece   :  { %v2064_v59 = vadd.f32 %v2058_v50, %v2036_v24 }
 0xed0   :  { %v2070_v2 = vmul.f32 0.7978846, %v2064_v59  ;;  %v3645_v54 = vpop.eup %3644 }
 0xed1   :  { %v2081_v55 = vadd.f32 1.0, %v3645_v54 }
 0xed2   :  { %3646 = vtanh.f32 %v2070_v2 }
 0xed3   :  { %v2087_v53 = vmul.f32 0.5, %v2081_v55 }
 0xed5   :  { %v2093_v9 = vmul.f32 %v2087_v53, %v2034_v58 }
 0xed8   :  { %v3647_v8 = vpop.eup %3646 }
 0xed9   :  { %v2082_v62 = vadd.f32 1.0, %v3647_v8 }
 0xedb   :  { %v2088_v12 = vmul.f32 0.5, %v2082_v62 }
 0xedd   :  { %v2094_v10 = vmul.f32 %v2088_v12, %v2036_v24 }
 0xedf   :  { %v2098_v6 = vpack.c.bf16 %v2094_v10, %v2093_v9 }
 0xee1   :  { %2179 = vmatmul.bf16.gmra.mxu3 %v2098_v6 }
 0xf05   :  { %v2038_v34 = vpop.f32.mrf.mxu0 }
 0xf06   :  { %v2039_v18 = vadd.f32 %v2038_v34, %v4740_v56 }
 0xf08   :  { %v2047_v13 = vmul.f32 %v2039_v18, %v2039_v18 }
 0xf0a   :  { %v2053_v1 = vmul.f32 %v2047_v13, %v2039_v18 }
 0xf0c   :  { %v2059_v63 = vmul.f32 0.044715, %v2053_v1 }
 0xf0d   :  { %v2040_v52 = vpop.f32.mrf.mxu0 }
 0xf0e   :  { %v2065_v17 = vadd.f32 %v2059_v63, %v2039_v18  ;;  %v2041_v44 = vadd.f32 %v2040_v52, %v4740_v56  ;;  %v2117_v56 = vperm.slane %v4686_v4, 7  ;;  %v3434_v52 = vld [vmem:[%s5061_s10 + $0x8] sm:$0xff] }
 0xf0f   :  { %2378 = vmatpush.bf16.msra.mxu2 %v3434_v52 }
 0xf10   :  { %v2071_v48 = vmul.f32 0.7978846, %v2065_v17  ;;  %v2048_v3 = vmul.f32 %v2041_v44, %v2041_v44 }
 0xf12   :  { %v2054_v16 = vmul.f32 %v2048_v3, %v2041_v44  ;;  %3648 = vtanh.f32 %v2071_v48 }
 0xf14   :  { %v2060_v21 = vmul.f32 0.044715, %v2054_v16 }
 0xf16   :  { %v2066_v22 = vadd.f32 %v2060_v21, %v2041_v44 }
 0xf18   :  { %v2072_v49 = vmul.f32 0.7978846, %v2066_v22  ;;  %v3649_v42 = vpop.eup %3648  ;;  %v3433_v22 = vld [vmem:[%s5061_s10] sm:$0xff] }
 0xf19   :  { %v2083_v27 = vadd.f32 1.0, %v3649_v42  ;;  %2379 = vmatpush.bf16.msra.mxu2 %v3433_v22 }
 0xf1a   :  { %3650 = vtanh.f32 %v2072_v49 }
 0xf1b   :  { %v2089_v19 = vmul.f32 0.5, %v2083_v27 }
 0xf1d   :  { %v2095_v25 = vmul.f32 %v2089_v19, %v2039_v18 }
 0xf20   :  { %v3651_v5 = vpop.eup %3650 }
 0xf21   :  { %v2084_v51 = vadd.f32 1.0, %v3651_v5 }
 0xf23   :  { %v2090_v29 = vmul.f32 0.5, %v2084_v51 }
 0xf25   :  { %v2096_v38 = vmul.f32 %v2090_v29, %v2041_v44 }
 0xf27   :  { %v2099_v30 = vpack.c.bf16 %v2096_v38, %v2095_v25 }
 0xf29   :  { %2184 = vmatmul.bf16.gmra.mxu3 %v2099_v30 }
 0xf31   :  { %v2175_v28 = vpop.f32.mrf.mxu3 }
 0xf32   :  { %v2176_v33 = vadd.f32 %v2175_v28, %v2117_v56 }
 0xf34   :  { %v2190_v14 = vadd.f32 %v2176_v33, %v4604_v20 }
 0xf36   :  { %v2197_v57 = vsel %vm141_vm1, %v2190_v14, 0.0 }
 0xf37   :  { %2198 = vadd.xlane.f32.xlu1 %v2197_v57 }
 0xf39   :  { %v2177_v7 = vpop.f32.mrf.mxu3 }
 0xf3a   :  { %v2178_v15 = vadd.f32 %v2177_v7, %v2117_v56 }
 0xf3c   :  { %v2191_v60 = vadd.f32 %v2178_v15, %v4609_v35 }
 0xf3e   :  { %v2200_v40 = vsel %vm141_vm1, %v2191_v60, 0.0 }
 0xf3f   :  { %2201 = vadd.xlane.f32.xlu2 %v2200_v40 }
 0xf64   :  { %v2180_v31 = vpop.f32.mrf.mxu3 }
 0xf65   :  { %v2181_v43 = vadd.f32 %v2180_v31, %v2117_v56  ;;  %v4812_v31 = vld [vmem:[%s5060_s9] sm:$0xf] }
 0xf67   :  { %v2192_v58 = vadd.f32 %v2181_v43, %v4614_v45 }
 0xf69   :  { %v2203_v4 = vsel %vm141_vm1, %v2192_v58, 0.0 }
 0xf6a   :  { %2204 = vadd.xlane.f32.xlu0 %v2203_v4 }
 0xf6c   :  { %v2182_v61 = vpop.f32.mrf.mxu3 }
 0xf6d   :  { %v2183_v11 = vadd.f32 %v2182_v61, %v2117_v56  ;;  %v4815_v61 = vperm.slane %v4812_v31, 0 }
 0xf6f   :  { %v2193_v20 = vadd.f32 %v2183_v11, %v4619_v0 }
 0xf71   :  { %v2206_v26 = vsel %vm141_vm1, %v2193_v20, 0.0 }
 0xf72   :  { %2207 = vadd.xlane.f32.xlu1 %v2206_v26 }
 0xfaa   :  { %v2199_v47 = vpop.xlane.xlu1 %2198 }
 0xfab   :  { %v2215_v35 = vmul.f32 %v2199_v47, %v3863_v36  ;;  %v4819_v47 = vperm.slane %v4812_v31, 1 }
 0xfac   :  { %v2185_v46 = vpop.f32.mrf.mxu3 }
 0xfad   :  { %v4762_v24 = vsub.f32 %v2190_v14, %v2215_v35  ;;  %v2186_v32 = vadd.f32 %v2185_v46, %v2117_v56 }
 0xfaf   :  { %v2194_v23 = vadd.f32 %v2186_v32, %v4624_v39  ;;  %v2227_v45 = vmul.f32 %v4762_v24, %v4762_v24 }
 0xfb1   :  { %v2209_v41 = vsel %vm141_vm1, %v2194_v23, 0.0  ;;  %v2233_v50 = vsel %vm141_vm1, %v2227_v45, 0.0 }
 0xfb2   :  { %v2202_v0 = vpop.xlane.xlu2 %2201  ;;  %2210 = vadd.xlane.f32.xlu1 %v2209_v41  ;;  %2234 = vadd.xlane.f32.xlu2 %v2233_v50 }
 0xfb3   :  { %v2216_v59 = vmul.f32 %v2202_v0, %v3863_v36 }
 0xfb4   :  { %v2187_v2 = vpop.f32.mrf.mxu3 }
 0xfb5   :  { %v4770_v54 = vsub.f32 %v2191_v60, %v2216_v59  ;;  %v2188_v55 = vadd.f32 %v2187_v2, %v2117_v56 }
 0xfb7   :  { %v2228_v8 = vmul.f32 %v4770_v54, %v4770_v54  ;;  %v2195_v39 = vadd.f32 %v2188_v55, %v4637_v37 }
 0xfb9   :  { %v2236_v62 = vsel %vm141_vm1, %v2228_v8, 0.0  ;;  %v2212_v53 = vsel %vm141_vm1, %v2195_v39, 0.0 }
 0xfba   :  { %2237 = vadd.xlane.f32.xlu0 %v2236_v62  ;;  %2213 = vadd.xlane.f32.xlu2 %v2212_v53 }
 0xfdd   :  { %v2205_v12 = vpop.xlane.xlu0 %2204 }
 0xfde   :  { %v2217_v9 = vmul.f32 %v2205_v12, %v3863_v36 }
 0xfe0   :  { %v4778_v10 = vsub.f32 %v2192_v58, %v2217_v9 }
 0xfe2   :  { %v2229_v6 = vmul.f32 %v4778_v10, %v4778_v10 }
 0xfe4   :  { %v2239_v34 = vsel %vm141_vm1, %v2229_v6, 0.0 }
 0xfe5   :  { %2240 = vadd.xlane.f32.xlu0 %v2239_v34  ;;  %v2208_v18 = vpop.xlane.xlu1 %2207 }
 0xfe6   :  { %v2218_v37 = vmul.f32 %v2208_v18, %v3863_v36 }
 0xfe8   :  { %v4784_v13 = vsub.f32 %v2193_v20, %v2218_v37 }
 0xfea   :  { %v2230_v1 = vmul.f32 %v4784_v13, %v4784_v13 }
 0xfec   :  { %v2242_v63 = vsel %vm141_vm1, %v2230_v1, 0.0 }
 0xfed   :  { %2243 = vadd.xlane.f32.xlu1 %v2242_v63 }
0x1025   :  { %v2235_v17 = vpop.xlane.xlu2 %2234  ;;  %v2211_v44 = vpop.xlane.xlu1 %2210 }
0x1026   :  { %v2251_v48 = vmul.f32 %v2235_v17, %v3863_v36  ;;  %v2219_v3 = vmul.f32 %v2211_v44, %v3863_v36 }
0x1028   :  { %v2257_v16 = vadd.f32 1e-12, %v2251_v48  ;;  %v4794_v21 = vsub.f32 %v2194_v23, %v2219_v3 }
0x102a   :  { %3652 = vrsqrt.f32 %v2257_v16  ;;  %v2231_v49 = vmul.f32 %v4794_v21, %v4794_v21  ;;  %vm2269_vm6 = vweird.f32 %v2257_v16 }
0x102c   :  { %v2245_v42 = vsel %vm141_vm1, %v2231_v49, 0.0 }
0x102d   :  { %v2238_v27 = vpop.xlane.xlu0 %2237  ;;  %v2214_v5 = vpop.xlane.xlu2 %2213  ;;  %2246 = vadd.xlane.f32.xlu2 %v2245_v42 }
0x102e   :  { %v2252_v51 = vmul.f32 %v2238_v27, %v3863_v36  ;;  %v2220_v19 = vmul.f32 %v2214_v5, %v3863_v36 }
0x1030   :  { %v3653_v29 = vpop.eup %3652  ;;  %v2258_v25 = vadd.f32 1e-12, %v2252_v51  ;;  %v4804_v38 = vsub.f32 %v2195_v39, %v2220_v19 }
0x1031   :  { %v2264_v30 = vmul.f32 %v3653_v29, %v2257_v16  ;;  %vm2270_vm5 = vweird.f32 %v3653_v29 }
0x1032   :  { %3654 = vrsqrt.f32 %v2258_v25  ;;  %v2232_v56 = vmul.f32 %v4804_v38, %v4804_v38  ;;  %vm2271_vm8 = vmor %vm2269_vm6, %vm2270_vm5  ;;  %vm2279_vm10 = vweird.f32 %v2258_v25 }
0x1033   :  { %v2265_v28 = vmul.f32 %v3653_v29, %v2264_v30 }
0x1034   :  { %v2248_v33 = vsel %vm141_vm1, %v2232_v56, 0.0 }
0x1035   :  { %v2266_v14 = vmul.f32 0.5, %v2265_v28  ;;  %2249 = vadd.xlane.f32.xlu0 %v2248_v33 }
0x1037   :  { %v2267_v57 = vsub.f32 1.5, %v2266_v14 }
0x1038   :  { %v3655_v7 = vpop.eup %3654 }
0x1039   :  { %v2268_v15 = vmul.f32 %v3653_v29, %v2267_v57  ;;  %v2274_v60 = vmul.f32 %v3655_v7, %v2258_v25  ;;  %vm2280_vm9 = vweird.f32 %v3655_v7 }
0x103a   :  { %vm2281_vm11 = vmor %vm2279_vm10, %vm2280_vm9 }
0x103b   :  { %v2275_v40 = vmul.f32 %v3655_v7, %v2274_v60  ;;  %v2272_v43 = vsel %vm2271_vm8, %v3653_v29, %v2268_v15 }
0x103c   :  { %v2323_v11 = vmul.f32 %v2272_v43, %v4762_v24 }
0x103d   :  { %v2276_v58 = vmul.f32 0.5, %v2275_v40  ;;  %v3441_v40 = vld [vmem:[%s5062_s11 + $0x2c] sm:$0xf0] }
0x103e   :  { %v2330_v35 = vmul.f32 %v4815_v61, %v2323_v11  ;;  %v3245_v11 = vld [vmem:[%s5062_s11 + $0x30] sm:$0xf0] }
0x103f   :  { %v2277_v4 = vsub.f32 1.5, %v2276_v58 }
0x1040   :  { %v2337_v23 = vadd.f32 %v4819_v47, %v2330_v35 }
0x1041   :  { %v2278_v20 = vmul.f32 %v3655_v7, %v2277_v4  ;;  %v3439_v4 = vld [vmem:[%s5062_s11 + $0x24] sm:$0xf] }
0x1042   :  { %v3248_v35 = vor.u32 %v3439_v4, %v3245_v11  ;;  %v3453_v4 = vld [vmem:[%s5064_s13 + $0x50] sm:$0xff]  ;;  %v3462_v11 = vld [vmem:[%s5064_s13 + $0x98] sm:$0xff] }
0x1043   :  { %v2282_v26 = vsel %vm2281_vm11, %v3655_v7, %v2278_v20  ;;  %v3251_v20 = vld [vmem:[%s5062_s11 + $0x28] sm:$0xf]  ;;  %vm2979_vm11 = vcmask 57344  }
0x1044   :  { %v2324_v46 = vmul.f32 %v2282_v26, %v4770_v54  ;;  %2502 = vmatpush.bf16.msrb.mxu0 %v3248_v35  ;;  %v3452_v35 = vld [vmem:[%s5064_s13 + $0x48] sm:$0xff] }
0x1046   :  { %v2331_v32 = vmul.f32 %v4815_v61, %v2324_v46  ;;  %v3440_v46 = vld [vmem:[%s5062_s11 + $0x2c] sm:$0xf] }
0x1048   :  { %v2338_v45 = vadd.f32 %v4819_v47, %v2331_v32  ;;  %v3253_v32 = vld [vmem:[%s5062_s11 + $0x38] sm:$0xf0] }
0x104a   :  { %v2343_v41 = vpack.c.bf16 %v2338_v45, %v2337_v23  ;;  %v3256_v45 = vor.u32 %v3440_v46, %v3253_v32  ;;  %v3469_v46 = vld [vmem:[%s5064_s13 + $0xd0] sm:$0xff] }
0x104c   :  { %3222 = vmatmul.msk.bf16.vlgmr.msra.gmra.mxu2 %vm141_vm1, %v2343_v41 }
0x104d   :  { %2550 = vmatpush.bf16.msrb.mxu2 %v3256_v45  ;;  %v3451_v45 = vld [vmem:[%s5064_s13 + $0x40] sm:$0xff] }
0x1058   :  { %v2241_v24 = vpop.xlane.xlu0 %2240 }
0x1059   :  { %v2253_v50 = vmul.f32 %v2241_v24, %v3863_v36  ;;  %v3227_v24 = vld [vmem:[%s5062_s11] sm:$0xf] }
0x105b   :  { %v2259_v0 = vadd.f32 1e-12, %v2253_v50  ;;  %v3437_v50 = vld [vmem:[%s5062_s11 + $0xc] sm:$0xf0] }
0x105d   :  { %3656 = vrsqrt.f32 %v2259_v0  ;;  %vm2289_vm13 = vweird.f32 %v2259_v0 }
0x1060   :  { %v2244_v59 = vpop.xlane.xlu1 %2243 }
0x1061   :  { %v2254_v2 = vmul.f32 %v2244_v59, %v3863_v36 }
0x1063   :  { %v3657_v55 = vpop.eup %3656  ;;  %v2260_v8 = vadd.f32 1e-12, %v2254_v2 }
0x1064   :  { %v2284_v54 = vmul.f32 %v3657_v55, %v2259_v0  ;;  %vm2290_vm12 = vweird.f32 %v3657_v55  ;;  %v3435_v0 = vld [vmem:[%s5062_s11 + $0x4] sm:$0xf] }
0x1065   :  { %3658 = vrsqrt.f32 %v2260_v8  ;;  %vm2291_vm14 = vmor %vm2289_vm13, %vm2290_vm12  ;;  %vm2299_vm2 = vweird.f32 %v2260_v8 }
0x1066   :  { %v2285_v39 = vmul.f32 %v3657_v55, %v2284_v54  ;;  %v3235_v54 = vld [vmem:[%s5062_s11 + $0x8] sm:$0xf] }
0x1068   :  { %v2286_v62 = vmul.f32 0.5, %v2285_v39  ;;  %v3438_v39 = vld [vmem:[%s5062_s11 + $0x14] sm:$0xf0] }
0x106a   :  { %v2287_v53 = vsub.f32 1.5, %v2286_v62 }
0x106b   :  { %v3659_v12 = vpop.eup %3658 }
0x106c   :  { %v2288_v9 = vmul.f32 %v3657_v55, %v2287_v53  ;;  %v2294_v6 = vmul.f32 %v3659_v12, %v2260_v8  ;;  %vm2300_vm15 = vweird.f32 %v3659_v12  ;;  %v3229_v8 = vld [vmem:[%s5062_s11 + $0x10] sm:$0xf0]  ;;  %v3236_v53 = vor.u32 %v3438_v39, %v3235_v54 }
0x106d   :  { %vm2301_vm3 = vmor %vm2299_vm2, %vm2300_vm15  ;;  %v3232_v62 = vor.u32 %v3435_v0, %v3229_v8  ;;  %v3459_v0 = vld [vmem:[%s5064_s13 + $0x80] sm:$0xff] }
0x106e   :  { %v2295_v34 = vmul.f32 %v3659_v12, %v2294_v6  ;;  %v2292_v18 = vsel %vm2291_vm14, %v3657_v55, %v2288_v9  ;;  %v3228_v55 = vor.u32 %v3437_v50, %v3227_v24  ;;  %v3468_v24 = vld [vmem:[%s5064_s13 + $0xc8] sm:$0xff] }
0x106f   :  { %v2325_v63 = vmul.f32 %v2292_v18, %v4778_v10  ;;  %2503 = vmatpush.bf16.msrb.mxu0 %v3232_v62  ;;  %v2413_v62 = vld [vmem:[%s5063_s12] sm:$0xf]  ;;  %s3724_s12 = smov [#allocation2]  }
0x1070   :  { %v2296_v37 = vmul.f32 0.5, %v2295_v34  ;;  %s2987_s29 = sshll.u32 %s3724_s12, 4  ;;  %s2988_s29 = int_to_ptr.vmem [resolvable:$true] %s2987_s29 }
0x1071   :  { %v2332_v48 = vmul.f32 %v4815_v61, %v2325_v63  ;;  %v4894_v63 = vperm.slane %v4812_v31, 2 }
0x1072   :  { %v2297_v1 = vsub.f32 1.5, %v2296_v37 }
0x1073   :  { %v2339_v16 = vadd.f32 %v4819_v47, %v2332_v48 }
0x1074   :  { %v2298_v52 = vmul.f32 %v3659_v12, %v2297_v1 }
0x1076   :  { %v2302_v17 = vsel %vm2301_vm3, %v3659_v12, %v2298_v52  ;;  %v3237_v12 = vld [vmem:[%s5062_s11 + $0x18] sm:$0xf0] }
0x1077   :  { %v2326_v44 = vmul.f32 %v2302_v17, %v4784_v13 }
0x1079   :  { %v2333_v3 = vmul.f32 %v4815_v61, %v2326_v44 }
0x107b   :  { %v2340_v22 = vadd.f32 %v4819_v47, %v2333_v3 }
0x107d   :  { %v2344_v49 = vpack.c.bf16 %v2340_v22, %v2339_v16 }
0x107f   :  { %3223 = vmatmul.msk.bf16.gmra.mxu2 %vm141_vm1, %v2344_v49 }
0x10a0   :  { %v2247_v42 = vpop.xlane.xlu2 %2246 }
0x10a1   :  { %v2255_v10 = vmul.f32 %v2247_v42, %v3863_v36 }
0x10a3   :  { %v2261_v27 = vadd.f32 1e-12, %v2255_v10 }
0x10a5   :  { %3660 = vrsqrt.f32 %v2261_v27  ;;  %vm2309_vm7 = vweird.f32 %v2261_v27 }
0x10a8   :  { %v2250_v5 = vpop.xlane.xlu0 %2249 }
0x10a9   :  { %v2256_v51 = vmul.f32 %v2250_v5, %v3863_v36  ;;  %v3243_v36 = vld [vmem:[%s5062_s11 + $0x20] sm:$0xf]  ;;  %v3450_v5 = vld [vmem:[%s5064_s13 + $0x38] sm:$0xff] }
0x10aa   :  { %v3244_v58 = vor.u32 %v3441_v40, %v3243_v36  ;;  %v3454_v36 = vld [vmem:[%s5064_s13 + $0x58] sm:$0xff]  ;;  %v3463_v40 = vld [vmem:[%s5064_s13 + $0xa0] sm:$0xff] }
0x10ab   :  { %v3661_v13 = vpop.eup %3660  ;;  %v2262_v19 = vadd.f32 1e-12, %v2256_v51  ;;  %v3458_v51 = vld [vmem:[%s5064_s13 + $0x78] sm:$0xff] }
0x10ac   :  { %v2304_v29 = vmul.f32 %v3661_v13, %v2261_v27  ;;  %vm2310_vm0 = vweird.f32 %v3661_v13  ;;  %2478 = vmatpush.bf16.msrb.mxu1 %v3244_v58  ;;  %2881 = vmatpush.bf16.msra.mxu0 %v3458_v51  ;;  %v3445_v58 = vld [vmem:[%s5064_s13 + $0x10] sm:$0xff] }
0x10ad   :  { %3662 = vrsqrt.f32 %v2262_v19  ;;  %vm2311_vm4 = vmor %vm2309_vm7, %vm2310_vm0  ;;  %vm2319_vm6 = vweird.f32 %v2262_v19 }
0x10ae   :  { %v2305_v25 = vmul.f32 %v3661_v13, %v2304_v29  ;;  %v3466_v29 = vld [vmem:[%s5064_s13 + $0xb8] sm:$0xff] }
0x10b0   :  { %v2306_v30 = vmul.f32 0.5, %v2305_v25  ;;  %2479 = vmatpush.bf16.msrb.mxu1 %v3228_v55  ;;  %v3474_v25 = vld [vmem:[%s5064_s13 + $0xf8] sm:$0xff] }
0x10b2   :  { %v2307_v56 = vsub.f32 1.5, %v2306_v30  ;;  %v3448_v30 = vld [vmem:[%s5064_s13 + $0x28] sm:$0xff] }
0x10b3   :  { %v3663_v28 = vpop.eup %3662 }
0x10b4   :  { %v2308_v33 = vmul.f32 %v3661_v13, %v2307_v56  ;;  %v2314_v14 = vmul.f32 %v3663_v28, %v2262_v19  ;;  %vm2320_vm5 = vweird.f32 %v3663_v28  ;;  %2861 = vmatpush.bf16.msra.mxu1 %v3450_v5  ;;  %v3457_v19 = vld [vmem:[%s5064_s13 + $0x70] sm:$0xff]  ;;  %v3456_v56 = vld [vmem:[%s5064_s13 + $0x68] sm:$0xff] }
0x10b5   :  { %vm2321_vm8 = vmor %vm2319_vm6, %vm2320_vm5  ;;  %2882 = vmatpush.bf16.msra.mxu0 %v3457_v19 }
0x10b6   :  { %v2315_v57 = vmul.f32 %v3663_v28, %v2314_v14  ;;  %v2312_v7 = vsel %vm2311_vm4, %v3661_v13, %v2308_v33  ;;  %v3449_v13 = vld [vmem:[%s5064_s13 + $0x30] sm:$0xff]  ;;  %v3447_v14 = vld [vmem:[%s5064_s13 + $0x20] sm:$0xff] }
0x10b7   :  { %v2327_v43 = vmul.f32 %v2312_v7, %v4794_v21  ;;  %v3442_v21 = vld [vmem:[%s5062_s11 + $0x34] sm:$0xf0]  ;;  %v3473_v33 = vld [vmem:[%s5064_s13 + $0xf0] sm:$0xff]  ;;  %v3464_v7 = vld [vmem:[%s5064_s13 + $0xa8] sm:$0xff] }
0x10b8   :  { %v2316_v15 = vmul.f32 0.5, %v2315_v57  ;;  %v3252_v23 = vor.u32 %v3442_v21, %v3251_v20  ;;  %2862 = vmatpush.bf16.msra.mxu1 %v3449_v13  ;;  %v3455_v57 = vld [vmem:[%s5064_s13 + $0x60] sm:$0xff]  ;;  %v3470_v20 = vld [vmem:[%s5064_s13 + $0xd8] sm:$0xff]  ;;  %v3461_v21 = vld [vmem:[%s5064_s13 + $0x90] sm:$0xff] }
0x10b9   :  { %v2334_v2 = vmul.f32 %v4815_v61, %v2327_v43  ;;  %2883 = vmatpush.bf16.msra.mxu0 %v3456_v56  ;;  %v3471_v43 = vld [vmem:[%s5064_s13 + $0xe0] sm:$0xff] }
0x10ba   :  { %v2317_v60 = vsub.f32 1.5, %v2316_v15  ;;  %2526 = vmatpush.bf16.msrb.mxu3 %v3252_v23  ;;  %v3472_v15 = vld [vmem:[%s5064_s13 + $0xe8] sm:$0xff]  ;;  %v3443_v23 = vld [vmem:[%s5064_s13] sm:$0xff] }
0x10bb   :  { %v2341_v34 = vadd.f32 %v4819_v47, %v2334_v2 }
0x10bc   :  { %v2318_v26 = vmul.f32 %v3663_v28, %v2317_v60  ;;  %2863 = vmatpush.bf16.msra.mxu1 %v3448_v30  ;;  %v3446_v60 = vld [vmem:[%s5064_s13 + $0x18] sm:$0xff] }
0x10bd   :  { %2884 = vmatpush.bf16.msra.mxu0 %v3455_v57 }
0x10be   :  { %v2322_v41 = vsel %vm2321_vm8, %v3663_v28, %v2318_v26  ;;  %2527 = vmatpush.bf16.msrb.mxu3 %v3236_v53  ;;  %v3465_v28 = vld [vmem:[%s5064_s13 + $0xb0] sm:$0xff]  ;;  %v3444_v26 = vld [vmem:[%s5064_s13 + $0x8] sm:$0xff] }
0x10bf   :  { %v2328_v59 = vmul.f32 %v2322_v41, %v4804_v38  ;;  %v3436_v38 = vld [vmem:[%s5062_s11 + $0xc] sm:$0xf] }
0x10c0   :  { %v3240_v6 = vor.u32 %v3436_v38, %v3237_v12  ;;  %2864 = vmatpush.bf16.msra.mxu1 %v3447_v14  ;;  %v3460_v41 = vld [vmem:[%s5064_s13 + $0x88] sm:$0xff]  ;;  %v5013_v12 = vperm.slane %v2413_v62, 0 }
0x10c1   :  { %v2335_v9 = vmul.f32 %v4815_v61, %v2328_v59  ;;  %2885 = vmatpush.bf16.msra.mxu0 %v3454_v36  ;;  %v3467_v59 = vld [vmem:[%s5064_s13 + $0xc0] sm:$0xff] }
0x10c2   :  { %2551 = vmatpush.bf16.msrb.mxu2 %v3240_v6  ;;  %2901 = vmatpush.bf16.msra.mxu3 %v3466_v29 }
0x10c3   :  { %v2342_v18 = vadd.f32 %v4819_v47, %v2335_v9  ;;  %v5015_v9 = vperm.slane %v2413_v62, 1 }
0x10c4   :  { %2865 = vmatpush.bf16.msra.mxu1 %v3446_v60 }
0x10c5   :  { %v2345_v37 = vpack.c.bf16 %v2342_v18, %v2341_v34  ;;  %2886 = vmatpush.bf16.msra.mxu0 %v3453_v4 }
0x10c6   :  { %2921 = vmatpush.bf16.msra.mxu2 %v3474_v25  ;;  %2902 = vmatpush.bf16.msra.mxu3 %v3465_v28 }
0x10c7   :  { %3224 = vmatmul.msk.bf16.gmra.mxu2 %vm141_vm1, %v2345_v37 }
0x10c8   :  { %2866 = vmatpush.bf16.msra.mxu1 %v3445_v58 }
0x10c9   :  { %2887 = vmatpush.bf16.msra.mxu0 %v3452_v35 }
0x10ca   :  { %2922 = vmatpush.bf16.msra.mxu2 %v3473_v33  ;;  %2903 = vmatpush.bf16.msra.mxu3 %v3464_v7 }
0x10cc   :  { %2867 = vmatpush.bf16.msra.mxu1 %v3444_v26 }
0x10cd   :  { %2888 = vmatpush.bf16.msra.mxu0 %v3451_v45 }
0x10ce   :  { %2923 = vmatpush.bf16.msra.mxu2 %v3472_v15  ;;  %2904 = vmatpush.bf16.msra.mxu3 %v3463_v40 }
0x10cf   :  { %v2381_v1 = vpop.f32.mrf.mxu2 }
0x10d0   :  { %v2382_v52 = vadd.f32 %v2381_v1, %v4894_v63  ;;  %2868 = vmatpush.bf16.msra.mxu1 %v3443_v23 }
0x10d2   :  { %3664 = vtanh.f32 %v2382_v52  ;;  %2924 = vmatpush.bf16.msra.mxu2 %v3471_v43  ;;  %2905 = vmatpush.bf16.msra.mxu3 %v3462_v11 }
0x10d6   :  { %2925 = vmatpush.bf16.msra.mxu2 %v3470_v20  ;;  %2906 = vmatpush.bf16.msra.mxu3 %v3461_v21 }
0x10d7   :  { %v2383_v17 = vpop.f32.mrf.mxu2 }
0x10d8   :  { %v2384_v61 = vadd.f32 %v2383_v17, %v4894_v63  ;;  %v3665_v44 = vpop.eup %3664 }
0x10da   :  { %3666 = vtanh.f32 %v2384_v61  ;;  %2926 = vmatpush.bf16.msra.mxu2 %v3469_v46  ;;  %2907 = vmatpush.bf16.msra.mxu3 %v3460_v41  ;;  %v5021_v61 = vperm.slane %v2413_v62, 2 }
0x10de   :  { %2927 = vmatpush.bf16.msra.mxu2 %v3468_v24  ;;  %2908 = vmatpush.bf16.msra.mxu3 %v3459_v0 }
0x10e0   :  { %v3667_v48 = vpop.eup %3666 }
0x10e1   :  { %v2402_v3 = vpack.c.bf16 %v3667_v48, %v3665_v44  ;;  %v5023_v44 = vperm.slane %v2413_v62, 3 }
0x10e2   :  { %2928 = vmatpush.bf16.msra.mxu2 %v3467_v59 }
0x10e3   :  { %3257 = vmatmul.msk.bf16.vlgmr.msrb.gmra.mxu1 %vm141_vm1, %v2402_v3  ;;  %3260 = vmatmul.msk.bf16.vlgmr.msrb.gmra.mxu0 %vm141_vm1, %v2402_v3 }
0x10e4   :  { %3263 = vmatmul.msk.bf16.vlgmr.msrb.gmra.mxu3 %vm141_vm1, %v2402_v3  ;;  %3266 = vmatmul.msk.bf16.vlgmr.msrb.gmra.mxu2 %vm141_vm1, %v2402_v3 }
0x1102   :  { %v2386_v47 = vpop.f32.mrf.mxu2 }
0x1103   :  { %v2387_v16 = vadd.f32 %v2386_v47, %v4894_v63 }
0x1105   :  { %3668 = vtanh.f32 %v2387_v16 }
0x110a   :  { %v2388_v22 = vpop.f32.mrf.mxu2 }
0x110b   :  { %v2389_v49 = vadd.f32 %v2388_v22, %v4894_v63  ;;  %v3669_v42 = vpop.eup %3668 }
0x110d   :  { %3670 = vtanh.f32 %v2389_v49 }
0x1113   :  { %v3671_v10 = vpop.eup %3670 }
0x1114   :  { %v2403_v27 = vpack.c.bf16 %v3671_v10, %v3669_v42 }
0x1116   :  { %3258 = vmatmul.msk.bf16.gmra.mxu1 %vm141_vm1, %v2403_v27  ;;  %3261 = vmatmul.msk.bf16.gmra.mxu0 %vm141_vm1, %v2403_v27 }
0x1117   :  { %3264 = vmatmul.msk.bf16.gmra.mxu3 %vm141_vm1, %v2403_v27  ;;  %3267 = vmatmul.msk.bf16.gmra.mxu2 %vm141_vm1, %v2403_v27 }
0x114a   :  { %v2391_v32 = vpop.f32.mrf.mxu2 }
0x114b   :  { %v2392_v50 = vadd.f32 %v2391_v32, %v4894_v63 }
0x114d   :  { %3672 = vtanh.f32 %v2392_v50 }
0x1152   :  { %v2393_v2 = vpop.f32.mrf.mxu2 }
0x1153   :  { %v2394_v55 = vadd.f32 %v2393_v2, %v4894_v63  ;;  %v3673_v8 = vpop.eup %3672 }
0x1155   :  { %3674 = vtanh.f32 %v2394_v55 }
0x115b   :  { %v3675_v54 = vpop.eup %3674 }
0x115c   :  { %v2404_v39 = vpack.c.bf16 %v3675_v54, %v3673_v8 }
0x115e   :  { %3259 = vmatmul.msk.bf16.gmra.mxu1 %vm141_vm1, %v2404_v39  ;;  %3262 = vmatmul.msk.bf16.gmra.mxu0 %vm141_vm1, %v2404_v39 }
0x115f   :  { %3265 = vmatmul.msk.bf16.gmra.mxu3 %vm141_vm1, %v2404_v39  ;;  %3268 = vmatmul.msk.bf16.gmra.mxu2 %vm141_vm1, %v2404_v39 }
0x1160   :  { %v2481_v53 = vpop.f32.mrf.mxu1  ;;  %v2505_v38 = vpop.f32.mrf.mxu0 }
0x1161   :  { %v2482_v6 = vadd.f32 %v2481_v53, %v5013_v12  ;;  %v2506_v34 = vadd.f32 %v2505_v38, %v5015_v9 }
0x1163   :  { %v2568_v48 = vmax.f32 %v2482_v6, 0.0  ;;  %v2569_v3 = vmax.f32 %v2506_v34, 0.0 }
0x1167   :  { %v2529_v18 = vpop.f32.mrf.mxu3  ;;  %v2553_v37 = vpop.f32.mrf.mxu2 }
0x1168   :  { %v2483_v1 = vpop.f32.mrf.mxu1  ;;  %v2507_v63 = vpop.f32.mrf.mxu0  ;;  %v2530_v42 = vadd.f32 %v2529_v18, %v5021_v61  ;;  %v2554_v10 = vadd.f32 %v2553_v37, %v5023_v44 }
0x1169   :  { %v2484_v52 = vadd.f32 %v2483_v1, %v5013_v12  ;;  %v2508_v17 = vadd.f32 %v2507_v63, %v5015_v9 }
0x116a   :  { %v2570_v19 = vmax.f32 %v2530_v42, 0.0  ;;  %v2571_v29 = vmax.f32 %v2554_v10, 0.0 }
0x116b   :  { %v2572_v47 = vmax.f32 %v2484_v52, 0.0  ;;  %v2573_v16 = vmax.f32 %v2508_v17, 0.0 }
0x116d   :  { %v2592_v22 = vpack.c.bf16 %v2572_v47, %v2568_v48  ;;  %v2593_v49 = vpack.c.bf16 %v2573_v16, %v2569_v3 }
0x116f   :  { %v2531_v27 = vpop.f32.mrf.mxu3  ;;  %v2555_v5 = vpop.f32.mrf.mxu2  ;;  %2869 = vmatmul.bf16.vlgmr.msra.gmra.mxu1 %v2592_v22  ;;  %2889 = vmatmul.bf16.vlgmr.msra.gmra.mxu0 %v2593_v49 }
0x1170   :  { %v2532_v51 = vadd.f32 %v2531_v27, %v5021_v61  ;;  %v2556_v13 = vadd.f32 %v2555_v5, %v5023_v44 }
0x1172   :  { %v2574_v25 = vmax.f32 %v2532_v51, 0.0  ;;  %v2575_v30 = vmax.f32 %v2556_v13, 0.0 }
0x1174   :  { %v2594_v56 = vpack.c.bf16 %v2574_v25, %v2570_v19  ;;  %v2595_v28 = vpack.c.bf16 %v2575_v30, %v2571_v29  ;;  %v2668_v30 = vperm.slane %v4812_v31, 3 }
0x1176   :  { %2909 = vmatmul.bf16.vlgmr.msra.gmra.mxu3 %v2594_v56  ;;  %2929 = vmatmul.bf16.vlgmr.msra.gmra.mxu2 %v2595_v28 }
0x1193   :  { %v2486_v33 = vpop.f32.mrf.mxu1  ;;  %v2510_v14 = vpop.f32.mrf.mxu0 }
0x1194   :  { %v2487_v57 = vadd.f32 %v2486_v33, %v5013_v12  ;;  %v2511_v7 = vadd.f32 %v2510_v14, %v5015_v9 }
0x1196   :  { %v2576_v4 = vmax.f32 %v2487_v57, 0.0  ;;  %v2577_v11 = vmax.f32 %v2511_v7, 0.0 }
0x119a   :  { %v2534_v15 = vpop.f32.mrf.mxu3  ;;  %v2558_v60 = vpop.f32.mrf.mxu2 }
0x119b   :  { %v2488_v36 = vpop.f32.mrf.mxu1  ;;  %v2512_v40 = vpop.f32.mrf.mxu0  ;;  %v2535_v46 = vadd.f32 %v2534_v15, %v5021_v61  ;;  %v2559_v32 = vadd.f32 %v2558_v60, %v5023_v44 }
0x119c   :  { %v2489_v43 = vadd.f32 %v2488_v36, %v5013_v12  ;;  %v2513_v58 = vadd.f32 %v2512_v40, %v5015_v9 }
0x119d   :  { %v2578_v50 = vmax.f32 %v2535_v46, 0.0  ;;  %v2579_v0 = vmax.f32 %v2559_v32, 0.0 }
0x119e   :  { %v2580_v20 = vmax.f32 %v2489_v43, 0.0  ;;  %v2581_v26 = vmax.f32 %v2513_v58, 0.0 }
0x11a0   :  { %v2596_v35 = vpack.c.bf16 %v2580_v20, %v2576_v4  ;;  %v2597_v21 = vpack.c.bf16 %v2581_v26, %v2577_v11 }
0x11a2   :  { %v2536_v23 = vpop.f32.mrf.mxu3  ;;  %v2560_v45 = vpop.f32.mrf.mxu2  ;;  %2873 = vmatmul.bf16.gmra.mxu1 %v2596_v35  ;;  %2893 = vmatmul.bf16.gmra.mxu0 %v2597_v21 }
0x11a3   :  { %v2537_v41 = vadd.f32 %v2536_v23, %v5021_v61  ;;  %v2561_v24 = vadd.f32 %v2560_v45, %v5023_v44 }
0x11a5   :  { %v2582_v59 = vmax.f32 %v2537_v41, 0.0  ;;  %v2583_v2 = vmax.f32 %v2561_v24, 0.0 }
0x11a7   :  { %v2598_v55 = vpack.c.bf16 %v2582_v59, %v2578_v50  ;;  %v2599_v8 = vpack.c.bf16 %v2583_v2, %v2579_v0 }
0x11a9   :  { %2913 = vmatmul.bf16.gmra.mxu3 %v2598_v55  ;;  %2933 = vmatmul.bf16.gmra.mxu2 %v2599_v8 }
0x11db   :  { %v2491_v54 = vpop.f32.mrf.mxu1  ;;  %v2515_v39 = vpop.f32.mrf.mxu0 }
0x11dc   :  { %v2492_v62 = vadd.f32 %v2491_v54, %v5013_v12  ;;  %v2516_v53 = vadd.f32 %v2515_v39, %v5015_v9 }
0x11de   :  { %v2584_v63 = vmax.f32 %v2492_v62, 0.0  ;;  %v2585_v52 = vmax.f32 %v2516_v53, 0.0 }
0x11e2   :  { %v2539_v38 = vpop.f32.mrf.mxu3  ;;  %v2563_v6 = vpop.f32.mrf.mxu2 }
0x11e3   :  { %v2493_v34 = vpop.f32.mrf.mxu1  ;;  %v2517_v18 = vpop.f32.mrf.mxu0  ;;  %v2540_v16 = vadd.f32 %v2539_v38, %v5021_v61  ;;  %v2564_v22 = vadd.f32 %v2563_v6, %v5023_v44 }
0x11e4   :  { %v2494_v37 = vadd.f32 %v2493_v34, %v5013_v12  ;;  %v2518_v1 = vadd.f32 %v2517_v18, %v5015_v9 }
0x11e5   :  { %v2586_v5 = vmax.f32 %v2540_v16, 0.0  ;;  %v2587_v51 = vmax.f32 %v2564_v22, 0.0 }
0x11e6   :  { %v2588_v17 = vmax.f32 %v2494_v37, 0.0  ;;  %v2589_v48 = vmax.f32 %v2518_v1, 0.0 }
0x11e8   :  { %v2600_v3 = vpack.c.bf16 %v2588_v17, %v2584_v63  ;;  %v2601_v47 = vpack.c.bf16 %v2589_v48, %v2585_v52 }
0x11ea   :  { %v2541_v49 = vpop.f32.mrf.mxu3  ;;  %v2565_v42 = vpop.f32.mrf.mxu2  ;;  %2877 = vmatmul.bf16.gmra.mxu1 %v2600_v3  ;;  %2897 = vmatmul.bf16.gmra.mxu0 %v2601_v47 }
0x11eb   :  { %v2542_v10 = vadd.f32 %v2541_v49, %v5021_v61  ;;  %v2566_v12 = vadd.f32 %v2565_v42, %v5023_v44 }
0x11ec   :  { %v2870_v27 = vpop.f32.mrf.mxu1  ;;  %v2890_v9 = vpop.f32.mrf.mxu0 }
0x11ed   :  { %v2590_v13 = vmax.f32 %v2542_v10, 0.0  ;;  %v2591_v19 = vmax.f32 %v2566_v12, 0.0  ;;  %v2871_v56 = vadd.f32 %v2870_v27, %v2668_v30 }
0x11ef   :  { %v2602_v29 = vpack.c.bf16 %v2590_v13, %v2586_v5  ;;  %v2603_v25 = vpack.c.bf16 %v2591_v19, %v2587_v51  ;;  %v2891_v14 = vadd.f32 %v2890_v9, %v2871_v56 }
0x11f1   :  { %2917 = vmatmul.bf16.gmra.mxu3 %v2602_v29  ;;  %2937 = vmatmul.bf16.gmra.mxu2 %v2603_v25 }
0x11f4   :  { %v2872_v28 = vpop.f32.mrf.mxu1  ;;  %v2892_v33 = vpop.f32.mrf.mxu0 }
0x11f9   :  { %v2910_v57 = vpop.f32.mrf.mxu3  ;;  %v2930_v61 = vpop.f32.mrf.mxu2 }
0x11fa   :  { %v2911_v7 = vadd.f32 %v2910_v57, %v2891_v14 }
0x11fc   :  { %v2931_v44 = vadd.f32 %v2930_v61, %v2911_v7 }
0x11fe   :  { %v3397_v15 = vmul.f32 -1.442695, %v2931_v44 }
0x1200   :  { %3676 = vpow2.f32 %v3397_v15 }
0x1201   :  { %v2912_v60 = vpop.f32.mrf.mxu3  ;;  %v2932_v36 = vpop.f32.mrf.mxu2 }
0x1206   :  { %v3677_v40 = vpop.eup %3676 }
0x1207   :  { %v2947_v43 = vadd.f32 1.0, %v3677_v40 }
0x1209   :  { %3678 = vrcp.f32 %v2947_v43  ;;  %v2960_v11 = vand.u32 2147483648, %v2947_v43  ;;  %v2958_v26 = vand.u32 2147483647, %v2947_v43  ;;  %vm2954_vm9 = vweird.f32 %v2947_v43 }
0x120b   :  { %v2961_v21 = vor.u32 1.1754944e-38, %v2960_v11  ;;  %vm2959_vm12 = vcmp.eq.f32.partialorder %v2958_v26, 8.507059e+37 }
0x120f   :  { %v3679_v58 = vpop.eup %3678 }
0x1210   :  { %v2950_v4 = vmul.f32 %v3679_v58, %v2947_v43  ;;  %vm2955_vm1 = vweird.f32 %v3679_v58 }
0x1211   :  { %vm2956_vm10 = vmor %vm2954_vm9, %vm2955_vm1 }
0x1212   :  { %v2951_v31 = vsub.f32 1.0, %v2950_v4 }
0x1214   :  { %v2952_v20 = vmul.f32 %v3679_v58, %v2951_v31 }
0x1216   :  { %v2953_v35 = vadd.f32 %v3679_v58, %v2952_v20 }
0x1218   :  { %v2957_v46 = vsel %vm2956_vm10, %v3679_v58, %v2953_v35 }
0x1219   :  { %v2962_v32 = vsel %vm2959_vm12, %v2961_v21, %v2957_v46 }
0x121a   :  { %2980 = vst.msk [vmem:[#allocation2] sm:$0x1] %vm2979_vm11, %v2962_v32 }
0x121f   :  { %v2874_v23 = vpop.f32.mrf.mxu1  ;;  %v2894_v45 = vpop.f32.mrf.mxu0 }
0x1227   :  { %v2875_v41 = vpop.f32.mrf.mxu1  ;;  %v2895_v59 = vpop.f32.mrf.mxu0 }
0x1228   :  { %v2876_v0 = vadd.f32 %v2875_v41, %v2668_v30 }
0x122a   :  { %v2896_v2 = vadd.f32 %v2895_v59, %v2876_v0 }
0x122c   :  { %v2914_v24 = vpop.f32.mrf.mxu3  ;;  %v2934_v50 = vpop.f32.mrf.mxu2 }
0x1234   :  { %v2915_v55 = vpop.f32.mrf.mxu3  ;;  %v2935_v54 = vpop.f32.mrf.mxu2 }
0x1235   :  { %v2916_v8 = vadd.f32 %v2915_v55, %v2896_v2 }
0x1237   :  { %v2936_v39 = vadd.f32 %v2935_v54, %v2916_v8 }
0x1239   :  { %v3398_v62 = vmul.f32 -1.442695, %v2936_v39 }
0x123b   :  { %3680 = vpow2.f32 %v3398_v62 }
0x1241   :  { %v3681_v53 = vpop.eup %3680 }
0x1242   :  { %v2948_v38 = vadd.f32 1.0, %v3681_v53 }
0x1244   :  { %3682 = vrcp.f32 %v2948_v38  ;;  %v2975_v37 = vand.u32 2147483648, %v2948_v38  ;;  %v2973_v63 = vand.u32 2147483647, %v2948_v38  ;;  %vm2969_vm14 = vweird.f32 %v2948_v38 }
0x1246   :  { %v2976_v17 = vor.u32 1.1754944e-38, %v2975_v37  ;;  %vm2974_vm2 = vcmp.eq.f32.partialorder %v2973_v63, 8.507059e+37 }
0x124a   :  { %v3683_v6 = vpop.eup %3682 }
0x124b   :  { %v2965_v34 = vmul.f32 %v3683_v6, %v2948_v38  ;;  %vm2970_vm13 = vweird.f32 %v3683_v6 }
0x124c   :  { %vm2971_vm15 = vmor %vm2969_vm14, %vm2970_vm13 }
0x124d   :  { %v2966_v18 = vsub.f32 1.0, %v2965_v34 }
0x124f   :  { %v2967_v1 = vmul.f32 %v3683_v6, %v2966_v18 }
0x1251   :  { %v2968_v52 = vadd.f32 %v3683_v6, %v2967_v1 }
0x1253   :  { %v2972_v48 = vsel %vm2971_vm15, %v3683_v6, %v2968_v52 }
0x1254   :  { %v2977_v3 = vsel %vm2974_vm2, %v2976_v17, %v2972_v48 }
0x1255   :  { %2981 = vst.msk [vmem:[#allocation2 + $0x1] sm:$0x1] %vm2979_vm11, %v2977_v3 }
0x1256   :  { %2992 = dma.vmem_to_hbm [thread:$0]  %s2988_s29, 32, %s2990_s16, [#allocation3]  }
0x1267   :  { %v2878_v47 = vpop.f32.mrf.mxu1  ;;  %v2898_v16 = vpop.f32.mrf.mxu0 }
0x126f   :  { %v2879_v22 = vpop.f32.mrf.mxu1  ;;  %v2899_v49 = vpop.f32.mrf.mxu0 }
0x1274   :  { %v2918_v42 = vpop.f32.mrf.mxu3  ;;  %v2938_v10 = vpop.f32.mrf.mxu2 }
0x127c   :  { %v2919_v12 = vpop.f32.mrf.mxu3  ;;  %v2939_v27 = vpop.f32.mrf.mxu2 }
0x127d   :  { %3716 = dma.done.wait [#allocation3], 32  }
0x127e   :  { %3717 = vsyncadd [#allocation3], 4294967264 }
0x127f   :  { %2997 = vsyncpa [#allocation3], 1 }

</bundles_post_ra>
